<compile_context>
chip_gen: v5e
topology: v5e:2x2
jax: 0.10.0
libtpu: 0.0.40
codegen_flags: <defaults>
</compile_context>

<pallas_src>
import functools

import jax
import jax.numpy as jnp
import numpy as np
from jax.experimental import pallas as pl
from jax.experimental.pallas import tpu as pltpu

TN = 128          # Cout tile (lane-dense output; MXU column width on v5e)
_BN_EPS = 1e-5


# ----------------------------------------------------------------------------
# Pallas kernel: implicit-GEMM 3x3 conv + folded BN (+ fused shortcut) (+ ReLU)
# ----------------------------------------------------------------------------
def _fused_conv3x3_kernel(*refs, stride, ho, wo, apply_relu, shortcut):
    """Computes one (batch element, Cout tile) of a 3x3 conv with folded BN.

    refs = (inputs..., output, scratch):
      x_ref   : (stride*stride, 1, Hq, Wq, Cin) bf16  phase-split padded image
      w_ref   : (9, Cin, TN)                    bf16  BN-scale-folded weights
      b_ref   : (1, TN)                         f32   folded BN bias
      [proj]  xs_ref (1, M, Cin_sc) bf16, ws_ref (Cin_sc, TN) bf16, bs_ref (1, TN) f32
      [add ]  r_ref  (1, M, TN) bf16            identity-shortcut residual
      o_ref   : (1, M, TN)
      acc_ref : (M, TN) f32                     VMEM accumulator scratch
    """
    if shortcut == "proj":
        x_ref, w_ref, b_ref, xs_ref, ws_ref, bs_ref, o_ref, acc_ref = refs
    elif shortcut == "add":
        x_ref, w_ref, b_ref, r_ref, o_ref, acc_ref = refs
    else:
        x_ref, w_ref, b_ref, o_ref, acc_ref = refs

    cin = x_ref.shape[-1]
    m = ho * wo

    acc_ref[...] = jnp.zeros_like(acc_ref)
    # Implicit GEMM over the 9 taps: static shifted windows of the phase-split
    # image, each a (M, Cin) x (Cin, TN) MXU matmul accumulated in f32.
    for ky in range(3):
        for kx in range(3):
            p = (ky % stride) * stride + (kx % stride)
            oy, ox = ky // stride, kx // stride
            patch = x_ref[p, 0, oy:oy + ho, ox:ox + wo, :]       # (ho, wo, cin)
            lhs = patch.reshape(m, cin)                          # lane dim kept
            acc_ref[...] += jnp.dot(lhs, w_ref[3 * ky + kx],
                                    preferred_element_type=jnp.float32)

    y = acc_ref[...] + b_ref[...]                                # folded BN bias
    if shortcut == "proj":        # fused strided 1x1-conv + BN shortcut
        y = y + jnp.dot(xs_ref[0], ws_ref[...],
                        preferred_element_type=jnp.float32) + bs_ref[...]
    elif shortcut == "add":       # identity shortcut
        y = y + r_ref[0].astype(jnp.float32)
    if apply_relu:
        y = jnp.maximum(y, 0.0)
    o_ref[0] = y.astype(o_ref.dtype)


def _fused_conv3x3(x_phases, w9, bias, *, stride, ho, wo, apply_relu,
                   shortcut="none", extras=(), out_dtype=jnp.float32):
    ss, n, hq, wq, cin = x_phases.shape
    cout_p = w9.shape[-1]
    m = ho * wo
    j_tiles = cout_p // TN

    in_specs = [
        pl.BlockSpec((ss, 1, hq, wq, cin), lambda j, b: (0, b, 0, 0, 0)),
        pl.BlockSpec((9, cin, TN), lambda j, b: (0, 0, j)),
        pl.BlockSpec((1, TN), lambda j, b: (0, j)),
    ]
    args = [x_phases, w9, bias]
    if shortcut == "proj":
        xs, wsf, bsf = extras
        cin_sc = xs.shape[-1]
        in_specs += [
            pl.BlockSpec((1, m, cin_sc), lambda j, b: (b, 0, 0)),
            pl.BlockSpec((cin_sc, TN), lambda j, b: (0, j)),
            pl.BlockSpec((1, TN), lambda j, b: (0, j)),
        ]
        args += [xs, wsf, bsf]
    elif shortcut == "add":
        (res,) = extras
        in_specs.append(pl.BlockSpec((1, m, TN), lambda j, b: (b, 0, j)))
        args.append(res)

    kernel = functools.partial(_fused_conv3x3_kernel, stride=stride, ho=ho,
                               wo=wo, apply_relu=apply_relu, shortcut=shortcut)
    return pl.pallas_call(
        kernel,
        out_shape=jax.ShapeDtypeStruct((n, m, cout_p), out_dtype),
        grid_spec=pltpu.PrefetchScalarGridSpec(
            num_scalar_prefetch=0,
            grid=(j_tiles, n),          # Cout tiles outer -> weights stay resident
            in_specs=in_specs,
            out_specs=pl.BlockSpec((1, m, TN), lambda j, b: (b, 0, j)),
            scratch_shapes=[pltpu.VMEM((m, TN), jnp.float32)],
        ),
        compiler_params=pltpu.CompilerParams(
            dimension_semantics=("parallel", "parallel"),
            vmem_limit_bytes=32 * 1024 * 1024,
        ),
    )(*args)


# ----------------------------------------------------------------------------
# Wrapper-side glue: phase split (no 9x im2col), BN folding into weights
# ----------------------------------------------------------------------------
def _round_up(v, mult):
    return -(-v // mult) * mult


def _phase_split(x_nhwc, stride, pad=1):
    """Pad spatially, then split into stride*stride phase images so every conv
    tap is a static contiguous window inside the kernel (1x data, no 9x copy)."""
    n, h, w, c = x_nhwc.shape
    xp = jnp.pad(x_nhwc, ((0, 0), (pad, pad), (pad, pad), (0, 0)))
    hp, wp = h + 2 * pad, w + 2 * pad
    hq, wq = _round_up(hp, stride) // stride, _round_up(wp, stride) // stride
    xp = jnp.pad(xp, ((0, 0), (0, hq * stride - hp), (0, wq * stride - wp), (0, 0)))
    xp = xp.reshape(n, hq, stride, wq, stride, c)
    xp = jnp.transpose(xp, (2, 4, 0, 1, 3, 5))
    return xp.reshape(stride * stride, n, hq, wq, c)


def _fold_bn_conv(w_hwio, gamma, beta, mean, var, cin_pad, cout_pad):
    scale = gamma / jnp.sqrt(var + _BN_EPS)
    bias = beta - mean * scale
    wf = w_hwio * scale                                   # fold BN scale into W
    kh, kw, ci, co = wf.shape
    wf = jnp.pad(wf, ((0, 0), (0, 0), (0, cin_pad - ci), (0, cout_pad - co)))
    wf = wf.reshape(kh * kw, cin_pad, cout_pad).astype(jnp.bfloat16)
    bias = jnp.pad(bias, (0, cout_pad - co)).reshape(1, cout_pad).astype(jnp.float32)
    return wf, bias


def _fold_bn_proj(w_io, gamma, beta, mean, var, cout_pad):
    scale = gamma / jnp.sqrt(var + _BN_EPS)
    bias = beta - mean * scale
    wf = w_io * scale
    ci, co = wf.shape
    wf = jnp.pad(wf, ((0, 0), (0, cout_pad - co))).astype(jnp.bfloat16)
    bias = jnp.pad(bias, (0, cout_pad - co)).reshape(1, cout_pad).astype(jnp.float32)
    return wf, bias


# ----------------------------------------------------------------------------
# BasicBlock forward (two fused pallas_calls total)
# ----------------------------------------------------------------------------
def basic_block_forward(x_nchw, params, stride):
    x = jnp.transpose(x_nchw, (0, 2, 3, 1)).astype(jnp.float32)    # NHWC
    n, h, w, cin = x.shape
    cout = params["w1"].shape[-1]
    cout_p = _round_up(cout, TN)
    ho = (h - 1) // stride + 1
    wo = (w - 1) // stride + 1
    m = ho * wo

    x_bf = x.astype(jnp.bfloat16)

    # ---- conv3x3(stride) -> BN -> ReLU --------------------------------------
    x_ph = _phase_split(x_bf, stride)                              # (s*s,N,Hq,Wq,Cin)
    w1f, b1 = _fold_bn_conv(params["w1"], params["bn1_g"], params["bn1_b"],
                            params["bn1_m"], params["bn1_v"], cin, cout_p)
    h1 = _fused_conv3x3(x_ph, w1f, b1, stride=stride, ho=ho, wo=wo,
                        apply_relu=True, shortcut="none",
                        out_dtype=jnp.bfloat16)                    # (N, M, Cout_p)

    # ---- conv3x3(1) -> BN, fused with shortcut and final ReLU ---------------
    h1_ph = _phase_split(h1.reshape(n, ho, wo, cout_p), 1)         # (1,N,Ho+2,Wo+2,Cp)
    w2f, b2 = _fold_bn_conv(params["w2"], params["bn2_g"], params["bn2_b"],
                            params["bn2_m"], params["bn2_v"], cout_p, cout_p)

    if stride != 1 or cin != cout:
        # projection shortcut: strided 1x1 conv + BN, fused into the 2nd kernel
        wsf, bs = _fold_bn_proj(params["ws"], params["bns_g"], params["bns_b"],
                                params["bns_m"], params["bns_v"], cout_p)
        xs = x_bf[:, ::stride, ::stride, :][:, :ho, :wo, :].reshape(n, m, cin)
        out = _fused_conv3x3(h1_ph, w2f, b2, stride=1, ho=ho, wo=wo,
                             apply_relu=True, shortcut="proj",
                             extras=(xs, wsf, bs), out_dtype=jnp.float32)
    else:
        # identity shortcut: residual streamed straight into the epilogue
        res = jnp.pad(x_bf.reshape(n, m, cin), ((0, 0), (0, 0), (0, cout_p - cin)))
        out = _fused_conv3x3(h1_ph, w2f, b2, stride=1, ho=ho, wo=wo,
                             apply_relu=True, shortcut="add",
                             extras=(res,), out_dtype=jnp.float32)

    out = out[:, :, :cout].reshape(n, ho, wo, cout)
    return jnp.transpose(out, (0, 3, 1, 2))                        # back to NCHW


# ----------------------------------------------------------------------------
# Pure-JAX reference (sanity check) and deterministic synthetic parameters
# ----------------------------------------------------------------------------
def _ref_forward(x_nchw, params, stride):
    def conv(x, w_hwio, s, p):
        return jax.lax.conv_general_dilated(
            x, w_hwio, window_strides=(s, s), padding=[(p, p), (p, p)],
            dimension_numbers=("NHWC", "HWIO", "NHWC"),
            precision=jax.lax.Precision.HIGHEST)

    def bn(x, g, b, m, v):
        return (x - m) / jnp.sqrt(v + _BN_EPS) * g + b

    x = jnp.transpose(x_nchw, (0, 2, 3, 1)).astype(jnp.float32)
    cin, cout = params["w1"].shape[2], params["w1"].shape[3]
    h1 = jnp.maximum(bn(conv(x, params["w1"], stride, 1),
                        params["bn1_g"], params["bn1_b"],
                        params["bn1_m"], params["bn1_v"]), 0.0)
    r = bn(conv(h1, params["w2"], 1, 1),
           params["bn2_g"], params["bn2_b"], params["bn2_m"], params["bn2_v"])
    if stride != 1 or cin != cout:
        ws = params["ws"].reshape(1, 1, cin, cout)
        sc = bn(conv(x, ws, stride, 0),
                params["bns_g"], params["bns_b"], params["bns_m"], params["bns_v"])
    else:
        sc = x
    return jnp.transpose(jnp.maximum(r + sc, 0.0), (0, 3, 1, 2))


def make_params(key, cin, cout):
    ks = jax.random.split(key, 16)

    def bn_params(k):
        k1, k2, k3, k4 = jax.random.split(k, 4)
        return (1.0 + 0.1 * jax.random.normal(k1, (cout,)),
                0.1 * jax.random.normal(k2, (cout,)),
                0.1 * jax.random.normal(k3, (cout,)),
                jax.random.uniform(k4, (cout,), minval=0.5, maxval=1.5))

    bn1 = bn_params(ks[1]); bn2 = bn_params(ks[3]); bns = bn_params(ks[5])
    return {
        "w1": 0.1 * jax.random.normal(ks[0], (3, 3, cin, cout), jnp.float32),
        "w2": 0.1 * jax.random.normal(ks[2], (3, 3, cout, cout), jnp.float32),
        "ws": 0.1 * jax.random.normal(ks[4], (cin, cout), jnp.float32),
        "bn1_g": bn1[0], "bn1_b": bn1[1], "bn1_m": bn1[2], "bn1_v": bn1[3],
        "bn2_g": bn2[0], "bn2_b": bn2[1], "bn2_m": bn2[2], "bn2_v": bn2[3],
        "bns_g": bns[0], "bns_b": bns[1], "bns_m": bns[2], "bns_v": bns[3],
    }


if __name__ == "__main__":
    key = jax.random.PRNGKey(0)
    kx1, kp1, kx2, kp2 = jax.random.split(key, 4)

    fwd = jax.jit(basic_block_forward, static_argnames=("stride",))

    # Case 1: projection-shortcut path (stride=2, Cin != Cout)
    N, CIN, H, W, COUT, STRIDE = 2, 4, 16, 16, 8, 2
    x1 = jax.random.normal(kx1, (N, CIN, H, W), jnp.float32)
    p1 = make_params(kp1, CIN, COUT)
    out1 = jax.block_until_ready(fwd(x1, p1, stride=STRIDE))
    ref1 = jax.block_until_ready(_ref_forward(x1, p1, STRIDE))
    assert out1.shape == (N, COUT, H // STRIDE, W // STRIDE), out1.shape
    np.testing.assert_allclose(np.asarray(out1), np.asarray(ref1),
                               rtol=2e-2, atol=2e-2)

    # Case 2: identity-shortcut path (stride=1, Cin == Cout)
    x2 = jax.random.normal(kx2, (N, COUT, H, W), jnp.float32)
    p2 = make_params(kp2, COUT, COUT)
    out2 = jax.block_until_ready(fwd(x2, p2, stride=1))
    ref2 = jax.block_until_ready(_ref_forward(x2, p2, 1))
    assert out2.shape == (N, COUT, H, W), out2.shape
    np.testing.assert_allclose(np.asarray(out2), np.asarray(ref2),
                               rtol=2e-2, atol=2e-2)

    print("KERNEL_OK")
</pallas_src>

<mosaic_0001>
module attributes {stable_mosaic.version = 11 : i64} {
  func.func @_fused_conv3x3_kernel(%arg0: i32, %arg1: i32, %arg2: memref<4x1x9x9x4xbf16, #tpu.memory_space<vmem>>, %arg3: memref<9x4x128xbf16, #tpu.memory_space<vmem>>, %arg4: memref<1x128xf32, #tpu.memory_space<vmem>>, %arg5: memref<1x64x128xbf16, #tpu.memory_space<vmem>>, %arg6: memref<64x128xf32, #tpu.memory_space<vmem>>) attributes {dimension_semantics = [#tpu.dimension_semantics<parallel>, #tpu.dimension_semantics<parallel>], iteration_bounds = array<i64: 1, 2>, scalar_prefetch = 0 : i64, scratch_operands = 1 : i64, tpu.core_type = #tpu.core_type<tc>, window_params = [{transform_indices = @transform_0, window_bounds = array<i64: 4, 1, 9, 9, 4>}, {transform_indices = @transform_1, window_bounds = array<i64: 9, 4, 128>}, {transform_indices = @transform_2, window_bounds = array<i64: 1, 128>}, {transform_indices = @transform_3, window_bounds = array<i64: 1, 64, 128>}]} {
    %cst = arith.constant 0.000000e+00 : f32
    %0 = vector.broadcast %cst : f32 to vector<64x128xf32>
    %c0 = arith.constant 0 : index
    %c0_0 = arith.constant 0 : index
    %1 = vector.load %arg6[%c0, %c0_0] : memref<64x128xf32, #tpu.memory_space<vmem>>, vector<64x128xf32>
    tpu.vector_store %arg6[%c0, %c0_0], %0 {strides = array<i32>} : memref<64x128xf32, #tpu.memory_space<vmem>>, vector<64x128xf32>,
    %c0_1 = arith.constant 0 : index
    %c0_2 = arith.constant 0 : index
    %c0_3 = arith.constant 0 : index
    %c0_4 = arith.constant 0 : index
    %c0_5 = arith.constant 0 : index
    %2 = vector.load %arg2[%c0_1, %c0_2, %c0_3, %c0_4, %c0_5] : memref<4x1x9x9x4xbf16, #tpu.memory_space<vmem>>, vector<1x1x8x8x4xbf16>
    %3 = vector.shape_cast %2 : vector<1x1x8x8x4xbf16> to vector<8x8x4xbf16>
    %4 = vector.shape_cast %3 : vector<8x8x4xbf16> to vector<64x4xbf16>
    %c0_6 = arith.constant 0 : index
    %c0_7 = arith.constant 0 : index
    %5 = vector.load %arg6[%c0_6, %c0_7] : memref<64x128xf32, #tpu.memory_space<vmem>>, vector<64x128xf32>
    %c0_8 = arith.constant 0 : index
    %c0_9 = arith.constant 0 : index
    %c0_10 = arith.constant 0 : index
    %6 = vector.load %arg3[%c0_8, %c0_9, %c0_10] : memref<9x4x128xbf16, #tpu.memory_space<vmem>>, vector<1x4x128xbf16>
    %7 = vector.shape_cast %6 : vector<1x4x128xbf16> to vector<4x128xbf16>
    %cst_11 = arith.constant dense<0.000000e+00> : vector<64x128xf32>
    %8 = tpu.matmul %4, %7, %cst_11 {dimension_numbers = #tpu.dot_dimension_numbers<[1], [0], [0], [1], [0, 0, 1, 1], [], []>} : vector<64x4xbf16>, vector<4x128xbf16>, vector<64x128xf32> -> vector<64x128xf32>
    %9 = arith.addf %5, %8 : vector<64x128xf32>
    %c0_12 = arith.constant 0 : index
    %c0_13 = arith.constant 0 : index
    %10 = vector.load %arg6[%c0_12, %c0_13] : memref<64x128xf32, #tpu.memory_space<vmem>>, vector<64x128xf32>
    tpu.vector_store %arg6[%c0_12, %c0_13], %9 {strides = array<i32>} : memref<64x128xf32, #tpu.memory_space<vmem>>, vector<64x128xf32>,
    %c1 = arith.constant 1 : index
    %c0_14 = arith.constant 0 : index
    %c0_15 = arith.constant 0 : index
    %c0_16 = arith.constant 0 : index
    %c0_17 = arith.constant 0 : index
    %11 = vector.load %arg2[%c1, %c0_14, %c0_15, %c0_16, %c0_17] : memref<4x1x9x9x4xbf16, #tpu.memory_space<vmem>>, vector<1x1x8x8x4xbf16>
    %12 = vector.shape_cast %11 : vector<1x1x8x8x4xbf16> to vector<8x8x4xbf16>
    %13 = vector.shape_cast %12 : vector<8x8x4xbf16> to vector<64x4xbf16>
    %c0_18 = arith.constant 0 : index
    %c0_19 = arith.constant 0 : index
    %14 = vector.load %arg6[%c0_18, %c0_19] : memref<64x128xf32, #tpu.memory_space<vmem>>, vector<64x128xf32>
    %c1_20 = arith.constant 1 : index
    %c0_21 = arith.constant 0 : index
    %c0_22 = arith.constant 0 : index
    %15 = vector.load %arg3[%c1_20, %c0_21, %c0_22] : memref<9x4x128xbf16, #tpu.memory_space<vmem>>, vector<1x4x128xbf16>
    %16 = vector.shape_cast %15 : vector<1x4x128xbf16> to vector<4x128xbf16>
    %cst_23 = arith.constant dense<0.000000e+00> : vector<64x128xf32>
    %17 = tpu.matmul %13, %16, %cst_23 {dimension_numbers = #tpu.dot_dimension_numbers<[1], [0], [0], [1], [0, 0, 1, 1], [], []>} : vector<64x4xbf16>, vector<4x128xbf16>, vector<64x128xf32> -> vector<64x128xf32>
    %18 = arith.addf %14, %17 : vector<64x128xf32>
    %c0_24 = arith.constant 0 : index
    %c0_25 = arith.constant 0 : index
    %19 = vector.load %arg6[%c0_24, %c0_25] : memref<64x128xf32, #tpu.memory_space<vmem>>, vector<64x128xf32>
    tpu.vector_store %arg6[%c0_24, %c0_25], %18 {strides = array<i32>} : memref<64x128xf32, #tpu.memory_space<vmem>>, vector<64x128xf32>,
    %c0_26 = arith.constant 0 : index
    %c0_27 = arith.constant 0 : index
    %c0_28 = arith.constant 0 : index
    %c1_29 = arith.constant 1 : index
    %c0_30 = arith.constant 0 : index
    %20 = vector.load %arg2[%c0_26, %c0_27, %c0_28, %c1_29, %c0_30] : memref<4x1x9x9x4xbf16, #tpu.memory_space<vmem>>, vector<1x1x8x8x4xbf16>
    %21 = vector.shape_cast %20 : vector<1x1x8x8x4xbf16> to vector<8x8x4xbf16>
    %22 = vector.shape_cast %21 : vector<8x8x4xbf16> to vector<64x4xbf16>
    %c0_31 = arith.constant 0 : index
    %c0_32 = arith.constant 0 : index
    %23 = vector.load %arg6[%c0_31, %c0_32] : memref<64x128xf32, #tpu.memory_space<vmem>>, vector<64x128xf32>
    %c2 = arith.constant 2 : index
    %c0_33 = arith.constant 0 : index
    %c0_34 = arith.constant 0 : index
    %24 = vector.load %arg3[%c2, %c0_33, %c0_34] : memref<9x4x128xbf16, #tpu.memory_space<vmem>>, vector<1x4x128xbf16>
    %25 = vector.shape_cast %24 : vector<1x4x128xbf16> to vector<4x128xbf16>
    %cst_35 = arith.constant dense<0.000000e+00> : vector<64x128xf32>
    %26 = tpu.matmul %22, %25, %cst_35 {dimension_numbers = #tpu.dot_dimension_numbers<[1], [0], [0], [1], [0, 0, 1, 1], [], []>} : vector<64x4xbf16>, vector<4x128xbf16>, vector<64x128xf32> -> vector<64x128xf32>
    %27 = arith.addf %23, %26 : vector<64x128xf32>
    %c0_36 = arith.constant 0 : index
    %c0_37 = arith.constant 0 : index
    %28 = vector.load %arg6[%c0_36, %c0_37] : memref<64x128xf32, #tpu.memory_space<vmem>>, vector<64x128xf32>
    tpu.vector_store %arg6[%c0_36, %c0_37], %27 {strides = array<i32>} : memref<64x128xf32, #tpu.memory_space<vmem>>, vector<64x128xf32>,
    %c2_38 = arith.constant 2 : index
    %c0_39 = arith.constant 0 : index
    %c0_40 = arith.constant 0 : index
    %c0_41 = arith.constant 0 : index
    %c0_42 = arith.constant 0 : index
    %29 = vector.load %arg2[%c2_38, %c0_39, %c0_40, %c0_41, %c0_42] : memref<4x1x9x9x4xbf16, #tpu.memory_space<vmem>>, vector<1x1x8x8x4xbf16>
    %30 = vector.shape_cast %29 : vector<1x1x8x8x4xbf16> to vector<8x8x4xbf16>
    %31 = vector.shape_cast %30 : vector<8x8x4xbf16> to vector<64x4xbf16>
    %c0_43 = arith.constant 0 : index
    %c0_44 = arith.constant 0 : index
    %32 = vector.load %arg6[%c0_43, %c0_44] : memref<64x128xf32, #tpu.memory_space<vmem>>, vector<64x128xf32>
    %c3 = arith.constant 3 : index
    %c0_45 = arith.constant 0 : index
    %c0_46 = arith.constant 0 : index
    %33 = vector.load %arg3[%c3, %c0_45, %c0_46] : memref<9x4x128xbf16, #tpu.memory_space<vmem>>, vector<1x4x128xbf16>
    %34 = vector.shape_cast %33 : vector<1x4x128xbf16> to vector<4x128xbf16>
    %cst_47 = arith.constant dense<0.000000e+00> : vector<64x128xf32>
    %35 = tpu.matmul %31, %34, %cst_47 {dimension_numbers = #tpu.dot_dimension_numbers<[1], [0], [0], [1], [0, 0, 1, 1], [], []>} : vector<64x4xbf16>, vector<4x128xbf16>, vector<64x128xf32> -> vector<64x128xf32>
    %36 = arith.addf %32, %35 : vector<64x128xf32>
    %c0_48 = arith.constant 0 : index
    %c0_49 = arith.constant 0 : index
    %37 = vector.load %arg6[%c0_48, %c0_49] : memref<64x128xf32, #tpu.memory_space<vmem>>, vector<64x128xf32>
    tpu.vector_store %arg6[%c0_48, %c0_49], %36 {strides = array<i32>} : memref<64x128xf32, #tpu.memory_space<vmem>>, vector<64x128xf32>,
    %c3_50 = arith.constant 3 : index
    %c0_51 = arith.constant 0 : index
    %c0_52 = arith.constant 0 : index
    %c0_53 = arith.constant 0 : index
    %c0_54 = arith.constant 0 : index
    %38 = vector.load %arg2[%c3_50, %c0_51, %c0_52, %c0_53, %c0_54] : memref<4x1x9x9x4xbf16, #tpu.memory_space<vmem>>, vector<1x1x8x8x4xbf16>
    %39 = vector.shape_cast %38 : vector<1x1x8x8x4xbf16> to vector<8x8x4xbf16>
    %40 = vector.shape_cast %39 : vector<8x8x4xbf16> to vector<64x4xbf16>
    %c0_55 = arith.constant 0 : index
    %c0_56 = arith.constant 0 : index
    %41 = vector.load %arg6[%c0_55, %c0_56] : memref<64x128xf32, #tpu.memory_space<vmem>>, vector<64x128xf32>
    %c4 = arith.constant 4 : index
    %c0_57 = arith.constant 0 : index
    %c0_58 = arith.constant 0 : index
    %42 = vector.load %arg3[%c4, %c0_57, %c0_58] : memref<9x4x128xbf16, #tpu.memory_space<vmem>>, vector<1x4x128xbf16>
    %43 = vector.shape_cast %42 : vector<1x4x128xbf16> to vector<4x128xbf16>
    %cst_59 = arith.constant dense<0.000000e+00> : vector<64x128xf32>
    %44 = tpu.matmul %40, %43, %cst_59 {dimension_numbers = #tpu.dot_dimension_numbers<[1], [0], [0], [1], [0, 0, 1, 1], [], []>} : vector<64x4xbf16>, vector<4x128xbf16>, vector<64x128xf32> -> vector<64x128xf32>
    %45 = arith.addf %41, %44 : vector<64x128xf32>
    %c0_60 = arith.constant 0 : index
    %c0_61 = arith.constant 0 : index
    %46 = vector.load %arg6[%c0_60, %c0_61] : memref<64x128xf32, #tpu.memory_space<vmem>>, vector<64x128xf32>
    tpu.vector_store %arg6[%c0_60, %c0_61], %45 {strides = array<i32>} : memref<64x128xf32, #tpu.memory_space<vmem>>, vector<64x128xf32>,
    %c2_62 = arith.constant 2 : index
    %c0_63 = arith.constant 0 : index
    %c0_64 = arith.constant 0 : index
    %c1_65 = arith.constant 1 : index
    %c0_66 = arith.constant 0 : index
    %47 = vector.load %arg2[%c2_62, %c0_63, %c0_64, %c1_65, %c0_66] : memref<4x1x9x9x4xbf16, #tpu.memory_space<vmem>>, vector<1x1x8x8x4xbf16>
    %48 = vector.shape_cast %47 : vector<1x1x8x8x4xbf16> to vector<8x8x4xbf16>
    %49 = vector.shape_cast %48 : vector<8x8x4xbf16> to vector<64x4xbf16>
    %c0_67 = arith.constant 0 : index
    %c0_68 = arith.constant 0 : index
    %50 = vector.load %arg6[%c0_67, %c0_68] : memref<64x128xf32, #tpu.memory_space<vmem>>, vector<64x128xf32>
    %c5 = arith.constant 5 : index
    %c0_69 = arith.constant 0 : index
    %c0_70 = arith.constant 0 : index
    %51 = vector.load %arg3[%c5, %c0_69, %c0_70] : memref<9x4x128xbf16, #tpu.memory_space<vmem>>, vector<1x4x128xbf16>
    %52 = vector.shape_cast %51 : vector<1x4x128xbf16> to vector<4x128xbf16>
    %cst_71 = arith.constant dense<0.000000e+00> : vector<64x128xf32>
    %53 = tpu.matmul %49, %52, %cst_71 {dimension_numbers = #tpu.dot_dimension_numbers<[1], [0], [0], [1], [0, 0, 1, 1], [], []>} : vector<64x4xbf16>, vector<4x128xbf16>, vector<64x128xf32> -> vector<64x128xf32>
    %54 = arith.addf %50, %53 : vector<64x128xf32>
    %c0_72 = arith.constant 0 : index
    %c0_73 = arith.constant 0 : index
    %55 = vector.load %arg6[%c0_72, %c0_73] : memref<64x128xf32, #tpu.memory_space<vmem>>, vector<64x128xf32>
    tpu.vector_store %arg6[%c0_72, %c0_73], %54 {strides = array<i32>} : memref<64x128xf32, #tpu.memory_space<vmem>>, vector<64x128xf32>,
    %c0_74 = arith.constant 0 : index
    %c0_75 = arith.constant 0 : index
    %c1_76 = arith.constant 1 : index
    %c0_77 = arith.constant 0 : index
    %c0_78 = arith.constant 0 : index
    %56 = vector.load %arg2[%c0_74, %c0_75, %c1_76, %c0_77, %c0_78] : memref<4x1x9x9x4xbf16, #tpu.memory_space<vmem>>, vector<1x1x8x8x4xbf16>
    %57 = vector.shape_cast %56 : vector<1x1x8x8x4xbf16> to vector<8x8x4xbf16>
    %58 = vector.shape_cast %57 : vector<8x8x4xbf16> to vector<64x4xbf16>
    %c0_79 = arith.constant 0 : index
    %c0_80 = arith.constant 0 : index
    %59 = vector.load %arg6[%c0_79, %c0_80] : memref<64x128xf32, #tpu.memory_space<vmem>>, vector<64x128xf32>
    %c6 = arith.constant 6 : index
    %c0_81 = arith.constant 0 : index
    %c0_82 = arith.constant 0 : index
    %60 = vector.load %arg3[%c6, %c0_81, %c0_82] : memref<9x4x128xbf16, #tpu.memory_space<vmem>>, vector<1x4x128xbf16>
    %61 = vector.shape_cast %60 : vector<1x4x128xbf16> to vector<4x128xbf16>
    %cst_83 = arith.constant dense<0.000000e+00> : vector<64x128xf32>
    %62 = tpu.matmul %58, %61, %cst_83 {dimension_numbers = #tpu.dot_dimension_numbers<[1], [0], [0], [1], [0, 0, 1, 1], [], []>} : vector<64x4xbf16>, vector<4x128xbf16>, vector<64x128xf32> -> vector<64x128xf32>
    %63 = arith.addf %59, %62 : vector<64x128xf32>
    %c0_84 = arith.constant 0 : index
    %c0_85 = arith.constant 0 : index
    %64 = vector.load %arg6[%c0_84, %c0_85] : memref<64x128xf32, #tpu.memory_space<vmem>>, vector<64x128xf32>
    tpu.vector_store %arg6[%c0_84, %c0_85], %63 {strides = array<i32>} : memref<64x128xf32, #tpu.memory_space<vmem>>, vector<64x128xf32>,
    %c1_86 = arith.constant 1 : index
    %c0_87 = arith.constant 0 : index
    %c1_88 = arith.constant 1 : index
    %c0_89 = arith.constant 0 : index
    %c0_90 = arith.constant 0 : index
    %65 = vector.load %arg2[%c1_86, %c0_87, %c1_88, %c0_89, %c0_90] : memref<4x1x9x9x4xbf16, #tpu.memory_space<vmem>>, vector<1x1x8x8x4xbf16>
    %66 = vector.shape_cast %65 : vector<1x1x8x8x4xbf16> to vector<8x8x4xbf16>
    %67 = vector.shape_cast %66 : vector<8x8x4xbf16> to vector<64x4xbf16>
    %c0_91 = arith.constant 0 : index
    %c0_92 = arith.constant 0 : index
    %68 = vector.load %arg6[%c0_91, %c0_92] : memref<64x128xf32, #tpu.memory_space<vmem>>, vector<64x128xf32>
    %c7 = arith.constant 7 : index
    %c0_93 = arith.constant 0 : index
    %c0_94 = arith.constant 0 : index
    %69 = vector.load %arg3[%c7, %c0_93, %c0_94] : memref<9x4x128xbf16, #tpu.memory_space<vmem>>, vector<1x4x128xbf16>
    %70 = vector.shape_cast %69 : vector<1x4x128xbf16> to vector<4x128xbf16>
    %cst_95 = arith.constant dense<0.000000e+00> : vector<64x128xf32>
    %71 = tpu.matmul %67, %70, %cst_95 {dimension_numbers = #tpu.dot_dimension_numbers<[1], [0], [0], [1], [0, 0, 1, 1], [], []>} : vector<64x4xbf16>, vector<4x128xbf16>, vector<64x128xf32> -> vector<64x128xf32>
    %72 = arith.addf %68, %71 : vector<64x128xf32>
    %c0_96 = arith.constant 0 : index
    %c0_97 = arith.constant 0 : index
    %73 = vector.load %arg6[%c0_96, %c0_97] : memref<64x128xf32, #tpu.memory_space<vmem>>, vector<64x128xf32>
    tpu.vector_store %arg6[%c0_96, %c0_97], %72 {strides = array<i32>} : memref<64x128xf32, #tpu.memory_space<vmem>>, vector<64x128xf32>,
    %c0_98 = arith.constant 0 : index
    %c0_99 = arith.constant 0 : index
    %c1_100 = arith.constant 1 : index
    %c1_101 = arith.constant 1 : index
    %c0_102 = arith.constant 0 : index
    %74 = vector.load %arg2[%c0_98, %c0_99, %c1_100, %c1_101, %c0_102] : memref<4x1x9x9x4xbf16, #tpu.memory_space<vmem>>, vector<1x1x8x8x4xbf16>
    %75 = vector.shape_cast %74 : vector<1x1x8x8x4xbf16> to vector<8x8x4xbf16>
    %76 = vector.shape_cast %75 : vector<8x8x4xbf16> to vector<64x4xbf16>
    %c0_103 = arith.constant 0 : index
    %c0_104 = arith.constant 0 : index
    %77 = vector.load %arg6[%c0_103, %c0_104] : memref<64x128xf32, #tpu.memory_space<vmem>>, vector<64x128xf32>
    %c8 = arith.constant 8 : index
    %c0_105 = arith.constant 0 : index
    %c0_106 = arith.constant 0 : index
    %78 = vector.load %arg3[%c8, %c0_105, %c0_106] : memref<9x4x128xbf16, #tpu.memory_space<vmem>>, vector<1x4x128xbf16>
    %79 = vector.shape_cast %78 : vector<1x4x128xbf16> to vector<4x128xbf16>
    %cst_107 = arith.constant dense<0.000000e+00> : vector<64x128xf32>
    %80 = tpu.matmul %76, %79, %cst_107 {dimension_numbers = #tpu.dot_dimension_numbers<[1], [0], [0], [1], [0, 0, 1, 1], [], []>} : vector<64x4xbf16>, vector<4x128xbf16>, vector<64x128xf32> -> vector<64x128xf32>
    %81 = arith.addf %77, %80 : vector<64x128xf32>
    %c0_108 = arith.constant 0 : index
    %c0_109 = arith.constant 0 : index
    %82 = vector.load %arg6[%c0_108, %c0_109] : memref<64x128xf32, #tpu.memory_space<vmem>>, vector<64x128xf32>
    tpu.vector_store %arg6[%c0_108, %c0_109], %81 {strides = array<i32>} : memref<64x128xf32, #tpu.memory_space<vmem>>, vector<64x128xf32>,
    %c0_110 = arith.constant 0 : index
    %c0_111 = arith.constant 0 : index
    %83 = vector.load %arg6[%c0_110, %c0_111] : memref<64x128xf32, #tpu.memory_space<vmem>>, vector<64x128xf32>
    %c0_112 = arith.constant 0 : index
    %c0_113 = arith.constant 0 : index
    %84 = vector.load %arg4[%c0_112, %c0_113] : memref<1x128xf32, #tpu.memory_space<vmem>>, vector<1x128xf32>
    %85 = vector.broadcast %84 : vector<1x128xf32> to vector<64x128xf32>
    %86 = arith.addf %83, %85 : vector<64x128xf32>
    %cst_114 = arith.constant 0.000000e+00 : f32
    %87 = vector.broadcast %cst_114 : f32 to vector<64x128xf32>
    %88 = arith.maximumf %86, %87 : vector<64x128xf32>
    %89 = arith.truncf %88 : vector<64x128xf32> to vector<64x128xbf16>
    %c0_115 = arith.constant 0 : index
    %c0_116 = arith.constant 0 : index
    %c0_117 = arith.constant 0 : index
    %90 = vector.load %arg5[%c0_115, %c0_116, %c0_117] : memref<1x64x128xbf16, #tpu.memory_space<vmem>>, vector<1x64x128xbf16>
    %91 = vector.shape_cast %90 : vector<1x64x128xbf16> to vector<64x128xbf16>
    %92 = vector.shape_cast %89 : vector<64x128xbf16> to vector<1x64x128xbf16>
    tpu.vector_store %arg5[%c0_115, %c0_116, %c0_117], %92 {strides = array<i32>} : memref<1x64x128xbf16, #tpu.memory_space<vmem>>, vector<1x64x128xbf16>,
    return
  }
  func.func @transform_0(%arg0: i32, %arg1: i32) -> (i32, i32, i32, i32, i32) {
    %c0_i32 = arith.constant 0 : i32
    %c0_i32_0 = arith.constant 0 : i32
    %c0_i32_1 = arith.constant 0 : i32
    %c0_i32_2 = arith.constant 0 : i32
    %c0_i32_3 = arith.constant 0 : i32
    return %c0_i32, %arg1, %c0_i32_0, %c0_i32_1, %c0_i32_2 : i32, i32, i32, i32, i32
  }
  func.func @transform_1(%arg0: i32, %arg1: i32) -> (i32, i32, i32) {
    %c0_i32 = arith.constant 0 : i32
    %c0_i32_0 = arith.constant 0 : i32
    %c0_i32_1 = arith.constant 0 : i32
    return %c0_i32, %c0_i32_0, %arg0 : i32, i32, i32
  }
  func.func @transform_2(%arg0: i32, %arg1: i32) -> (i32, i32) {
    %c0_i32 = arith.constant 0 : i32
    %c0_i32_0 = arith.constant 0 : i32
    return %c0_i32, %arg0 : i32, i32
  }
  func.func @transform_3(%arg0: i32, %arg1: i32) -> (i32, i32, i32) {
    %c0_i32 = arith.constant 0 : i32
    %c0_i32_0 = arith.constant 0 : i32
    return %arg1, %c0_i32, %arg0 : i32, i32, i32
  }
}

module attributes {stable_mosaic.version = 11 : i64} {
  func.func @_fused_conv3x3_kernel(%arg0: i32, %arg1: i32, %arg2: memref<1x1x10x10x128xbf16, #tpu.memory_space<vmem>>, %arg3: memref<9x128x128xbf16, #tpu.memory_space<vmem>>, %arg4: memref<1x128xf32, #tpu.memory_space<vmem>>, %arg5: memref<1x64x4xbf16, #tpu.memory_space<vmem>>, %arg6: memref<4x128xbf16, #tpu.memory_space<vmem>>, %arg7: memref<1x128xf32, #tpu.memory_space<vmem>>, %arg8: memref<1x64x128xf32, #tpu.memory_space<vmem>>, %arg9: memref<64x128xf32, #tpu.memory_space<vmem>>) attributes {dimension_semantics = [#tpu.dimension_semantics<parallel>, #tpu.dimension_semantics<parallel>], iteration_bounds = array<i64: 1, 2>, scalar_prefetch = 0 : i64, scratch_operands = 1 : i64, tpu.core_type = #tpu.core_type<tc>, window_params = [{transform_indices = @transform_0, window_bounds = array<i64: 1, 1, 10, 10, 128>}, {transform_indices = @transform_1, window_bounds = array<i64: 9, 128, 128>}, {transform_indices = @transform_2, window_bounds = array<i64: 1, 128>}, {transform_indices = @transform_3, window_bounds = array<i64: 1, 64, 4>}, {transform_indices = @transform_4, window_bounds = array<i64: 4, 128>}, {transform_indices = @transform_5, window_bounds = array<i64: 1, 128>}, {transform_indices = @transform_6, window_bounds = array<i64: 1, 64, 128>}]} {
    %cst = arith.constant 0.000000e+00 : f32
    %0 = vector.broadcast %cst : f32 to vector<64x128xf32>
    %c0 = arith.constant 0 : index
    %c0_0 = arith.constant 0 : index
    %1 = vector.load %arg9[%c0, %c0_0] : memref<64x128xf32, #tpu.memory_space<vmem>>, vector<64x128xf32>
    tpu.vector_store %arg9[%c0, %c0_0], %0 {strides = array<i32>} : memref<64x128xf32, #tpu.memory_space<vmem>>, vector<64x128xf32>,
    %c0_1 = arith.constant 0 : index
    %c0_2 = arith.constant 0 : index
    %c0_3 = arith.constant 0 : index
    %c0_4 = arith.constant 0 : index
    %c0_5 = arith.constant 0 : index
    %2 = vector.load %arg2[%c0_1, %c0_2, %c0_3, %c0_4, %c0_5] : memref<1x1x10x10x128xbf16, #tpu.memory_space<vmem>>, vector<1x1x8x8x128xbf16>
    %3 = vector.shape_cast %2 : vector<1x1x8x8x128xbf16> to vector<8x8x128xbf16>
    %4 = vector.shape_cast %3 : vector<8x8x128xbf16> to vector<64x128xbf16>
    %c0_6 = arith.constant 0 : index
    %c0_7 = arith.constant 0 : index
    %5 = vector.load %arg9[%c0_6, %c0_7] : memref<64x128xf32, #tpu.memory_space<vmem>>, vector<64x128xf32>
    %c0_8 = arith.constant 0 : index
    %c0_9 = arith.constant 0 : index
    %c0_10 = arith.constant 0 : index
    %6 = vector.load %arg3[%c0_8, %c0_9, %c0_10] : memref<9x128x128xbf16, #tpu.memory_space<vmem>>, vector<1x128x128xbf16>
    %7 = vector.shape_cast %6 : vector<1x128x128xbf16> to vector<128x128xbf16>
    %cst_11 = arith.constant dense<0.000000e+00> : vector<64x128xf32>
    %8 = tpu.matmul %4, %7, %cst_11 {dimension_numbers = #tpu.dot_dimension_numbers<[1], [0], [0], [1], [0, 0, 1, 1], [], []>} : vector<64x128xbf16>, vector<128x128xbf16>, vector<64x128xf32> -> vector<64x128xf32>
    %9 = arith.addf %5, %8 : vector<64x128xf32>
    %c0_12 = arith.constant 0 : index
    %c0_13 = arith.constant 0 : index
    %10 = vector.load %arg9[%c0_12, %c0_13] : memref<64x128xf32, #tpu.memory_space<vmem>>, vector<64x128xf32>
    tpu.vector_store %arg9[%c0_12, %c0_13], %9 {strides = array<i32>} : memref<64x128xf32, #tpu.memory_space<vmem>>, vector<64x128xf32>,
    %c0_14 = arith.constant 0 : index
    %c0_15 = arith.constant 0 : index
    %c0_16 = arith.constant 0 : index
    %c1 = arith.constant 1 : index
    %c0_17 = arith.constant 0 : index
    %11 = vector.load %arg2[%c0_14, %c0_15, %c0_16, %c1, %c0_17] : memref<1x1x10x10x128xbf16, #tpu.memory_space<vmem>>, vector<1x1x8x8x128xbf16>
    %12 = vector.shape_cast %11 : vector<1x1x8x8x128xbf16> to vector<8x8x128xbf16>
    %13 = vector.shape_cast %12 : vector<8x8x128xbf16> to vector<64x128xbf16>
    %c0_18 = arith.constant 0 : index
    %c0_19 = arith.constant 0 : index
    %14 = vector.load %arg9[%c0_18, %c0_19] : memref<64x128xf32, #tpu.memory_space<vmem>>, vector<64x128xf32>
    %c1_20 = arith.constant 1 : index
    %c0_21 = arith.constant 0 : index
    %c0_22 = arith.constant 0 : index
    %15 = vector.load %arg3[%c1_20, %c0_21, %c0_22] : memref<9x128x128xbf16, #tpu.memory_space<vmem>>, vector<1x128x128xbf16>
    %16 = vector.shape_cast %15 : vector<1x128x128xbf16> to vector<128x128xbf16>
    %cst_23 = arith.constant dense<0.000000e+00> : vector<64x128xf32>
    %17 = tpu.matmul %13, %16, %cst_23 {dimension_numbers = #tpu.dot_dimension_numbers<[1], [0], [0], [1], [0, 0, 1, 1], [], []>} : vector<64x128xbf16>, vector<128x128xbf16>, vector<64x128xf32> -> vector<64x128xf32>
    %18 = arith.addf %14, %17 : vector<64x128xf32>
    %c0_24 = arith.constant 0 : index
    %c0_25 = arith.constant 0 : index
    %19 = vector.load %arg9[%c0_24, %c0_25] : memref<64x128xf32, #tpu.memory_space<vmem>>, vector<64x128xf32>
    tpu.vector_store %arg9[%c0_24, %c0_25], %18 {strides = array<i32>} : memref<64x128xf32, #tpu.memory_space<vmem>>, vector<64x128xf32>,
    %c0_26 = arith.constant 0 : index
    %c0_27 = arith.constant 0 : index
    %c0_28 = arith.constant 0 : index
    %c2 = arith.constant 2 : index
    %c0_29 = arith.constant 0 : index
    %20 = vector.load %arg2[%c0_26, %c0_27, %c0_28, %c2, %c0_29] : memref<1x1x10x10x128xbf16, #tpu.memory_space<vmem>>, vector<1x1x8x8x128xbf16>
    %21 = vector.shape_cast %20 : vector<1x1x8x8x128xbf16> to vector<8x8x128xbf16>
    %22 = vector.shape_cast %21 : vector<8x8x128xbf16> to vector<64x128xbf16>
    %c0_30 = arith.constant 0 : index
    %c0_31 = arith.constant 0 : index
    %23 = vector.load %arg9[%c0_30, %c0_31] : memref<64x128xf32, #tpu.memory_space<vmem>>, vector<64x128xf32>
    %c2_32 = arith.constant 2 : index
    %c0_33 = arith.constant 0 : index
    %c0_34 = arith.constant 0 : index
    %24 = vector.load %arg3[%c2_32, %c0_33, %c0_34] : memref<9x128x128xbf16, #tpu.memory_space<vmem>>, vector<1x128x128xbf16>
    %25 = vector.shape_cast %24 : vector<1x128x128xbf16> to vector<128x128xbf16>
    %cst_35 = arith.constant dense<0.000000e+00> : vector<64x128xf32>
    %26 = tpu.matmul %22, %25, %cst_35 {dimension_numbers = #tpu.dot_dimension_numbers<[1], [0], [0], [1], [0, 0, 1, 1], [], []>} : vector<64x128xbf16>, vector<128x128xbf16>, vector<64x128xf32> -> vector<64x128xf32>
    %27 = arith.addf %23, %26 : vector<64x128xf32>
    %c0_36 = arith.constant 0 : index
    %c0_37 = arith.constant 0 : index
    %28 = vector.load %arg9[%c0_36, %c0_37] : memref<64x128xf32, #tpu.memory_space<vmem>>, vector<64x128xf32>
    tpu.vector_store %arg9[%c0_36, %c0_37], %27 {strides = array<i32>} : memref<64x128xf32, #tpu.memory_space<vmem>>, vector<64x128xf32>,
    %c0_38 = arith.constant 0 : index
    %c0_39 = arith.constant 0 : index
    %c1_40 = arith.constant 1 : index
    %c0_41 = arith.constant 0 : index
    %c0_42 = arith.constant 0 : index
    %29 = vector.load %arg2[%c0_38, %c0_39, %c1_40, %c0_41, %c0_42] : memref<1x1x10x10x128xbf16, #tpu.memory_space<vmem>>, vector<1x1x8x8x128xbf16>
    %30 = vector.shape_cast %29 : vector<1x1x8x8x128xbf16> to vector<8x8x128xbf16>
    %31 = vector.shape_cast %30 : vector<8x8x128xbf16> to vector<64x128xbf16>
    %c0_43 = arith.constant 0 : index
    %c0_44 = arith.constant 0 : index
    %32 = vector.load %arg9[%c0_43, %c0_44] : memref<64x128xf32, #tpu.memory_space<vmem>>, vector<64x128xf32>
    %c3 = arith.constant 3 : index
    %c0_45 = arith.constant 0 : index
    %c0_46 = arith.constant 0 : index
    %33 = vector.load %arg3[%c3, %c0_45, %c0_46] : memref<9x128x128xbf16, #tpu.memory_space<vmem>>, vector<1x128x128xbf16>
    %34 = vector.shape_cast %33 : vector<1x128x128xbf16> to vector<128x128xbf16>
    %cst_47 = arith.constant dense<0.000000e+00> : vector<64x128xf32>
    %35 = tpu.matmul %31, %34, %cst_47 {dimension_numbers = #tpu.dot_dimension_numbers<[1], [0], [0], [1], [0, 0, 1, 1], [], []>} : vector<64x128xbf16>, vector<128x128xbf16>, vector<64x128xf32> -> vector<64x128xf32>
    %36 = arith.addf %32, %35 : vector<64x128xf32>
    %c0_48 = arith.constant 0 : index
    %c0_49 = arith.constant 0 : index
    %37 = vector.load %arg9[%c0_48, %c0_49] : memref<64x128xf32, #tpu.memory_space<vmem>>, vector<64x128xf32>
    tpu.vector_store %arg9[%c0_48, %c0_49], %36 {strides = array<i32>} : memref<64x128xf32, #tpu.memory_space<vmem>>, vector<64x128xf32>,
    %c0_50 = arith.constant 0 : index
    %c0_51 = arith.constant 0 : index
    %c1_52 = arith.constant 1 : index
    %c1_53 = arith.constant 1 : index
    %c0_54 = arith.constant 0 : index
    %38 = vector.load %arg2[%c0_50, %c0_51, %c1_52, %c1_53, %c0_54] : memref<1x1x10x10x128xbf16, #tpu.memory_space<vmem>>, vector<1x1x8x8x128xbf16>
    %39 = vector.shape_cast %38 : vector<1x1x8x8x128xbf16> to vector<8x8x128xbf16>
    %40 = vector.shape_cast %39 : vector<8x8x128xbf16> to vector<64x128xbf16>
    %c0_55 = arith.constant 0 : index
    %c0_56 = arith.constant 0 : index
    %41 = vector.load %arg9[%c0_55, %c0_56] : memref<64x128xf32, #tpu.memory_space<vmem>>, vector<64x128xf32>
    %c4 = arith.constant 4 : index
    %c0_57 = arith.constant 0 : index
    %c0_58 = arith.constant 0 : index
    %42 = vector.load %arg3[%c4, %c0_57, %c0_58] : memref<9x128x128xbf16, #tpu.memory_space<vmem>>, vector<1x128x128xbf16>
    %43 = vector.shape_cast %42 : vector<1x128x128xbf16> to vector<128x128xbf16>
    %cst_59 = arith.constant dense<0.000000e+00> : vector<64x128xf32>
    %44 = tpu.matmul %40, %43, %cst_59 {dimension_numbers = #tpu.dot_dimension_numbers<[1], [0], [0], [1], [0, 0, 1, 1], [], []>} : vector<64x128xbf16>, vector<128x128xbf16>, vector<64x128xf32> -> vector<64x128xf32>
    %45 = arith.addf %41, %44 : vector<64x128xf32>
    %c0_60 = arith.constant 0 : index
    %c0_61 = arith.constant 0 : index
    %46 = vector.load %arg9[%c0_60, %c0_61] : memref<64x128xf32, #tpu.memory_space<vmem>>, vector<64x128xf32>
    tpu.vector_store %arg9[%c0_60, %c0_61], %45 {strides = array<i32>} : memref<64x128xf32, #tpu.memory_space<vmem>>, vector<64x128xf32>,
    %c0_62 = arith.constant 0 : index
    %c0_63 = arith.constant 0 : index
    %c1_64 = arith.constant 1 : index
    %c2_65 = arith.constant 2 : index
    %c0_66 = arith.constant 0 : index
    %47 = vector.load %arg2[%c0_62, %c0_63, %c1_64, %c2_65, %c0_66] : memref<1x1x10x10x128xbf16, #tpu.memory_space<vmem>>, vector<1x1x8x8x128xbf16>
    %48 = vector.shape_cast %47 : vector<1x1x8x8x128xbf16> to vector<8x8x128xbf16>
    %49 = vector.shape_cast %48 : vector<8x8x128xbf16> to vector<64x128xbf16>
    %c0_67 = arith.constant 0 : index
    %c0_68 = arith.constant 0 : index
    %50 = vector.load %arg9[%c0_67, %c0_68] : memref<64x128xf32, #tpu.memory_space<vmem>>, vector<64x128xf32>
    %c5 = arith.constant 5 : index
    %c0_69 = arith.constant 0 : index
    %c0_70 = arith.constant 0 : index
    %51 = vector.load %arg3[%c5, %c0_69, %c0_70] : memref<9x128x128xbf16, #tpu.memory_space<vmem>>, vector<1x128x128xbf16>
    %52 = vector.shape_cast %51 : vector<1x128x128xbf16> to vector<128x128xbf16>
    %cst_71 = arith.constant dense<0.000000e+00> : vector<64x128xf32>
    %53 = tpu.matmul %49, %52, %cst_71 {dimension_numbers = #tpu.dot_dimension_numbers<[1], [0], [0], [1], [0, 0, 1, 1], [], []>} : vector<64x128xbf16>, vector<128x128xbf16>, vector<64x128xf32> -> vector<64x128xf32>
    %54 = arith.addf %50, %53 : vector<64x128xf32>
    %c0_72 = arith.constant 0 : index
    %c0_73 = arith.constant 0 : index
    %55 = vector.load %arg9[%c0_72, %c0_73] : memref<64x128xf32, #tpu.memory_space<vmem>>, vector<64x128xf32>
    tpu.vector_store %arg9[%c0_72, %c0_73], %54 {strides = array<i32>} : memref<64x128xf32, #tpu.memory_space<vmem>>, vector<64x128xf32>,
    %c0_74 = arith.constant 0 : index
    %c0_75 = arith.constant 0 : index
    %c2_76 = arith.constant 2 : index
    %c0_77 = arith.constant 0 : index
    %c0_78 = arith.constant 0 : index
    %56 = vector.load %arg2[%c0_74, %c0_75, %c2_76, %c0_77, %c0_78] : memref<1x1x10x10x128xbf16, #tpu.memory_space<vmem>>, vector<1x1x8x8x128xbf16>
    %57 = vector.shape_cast %56 : vector<1x1x8x8x128xbf16> to vector<8x8x128xbf16>
    %58 = vector.shape_cast %57 : vector<8x8x128xbf16> to vector<64x128xbf16>
    %c0_79 = arith.constant 0 : index
    %c0_80 = arith.constant 0 : index
    %59 = vector.load %arg9[%c0_79, %c0_80] : memref<64x128xf32, #tpu.memory_space<vmem>>, vector<64x128xf32>
    %c6 = arith.constant 6 : index
    %c0_81 = arith.constant 0 : index
    %c0_82 = arith.constant 0 : index
    %60 = vector.load %arg3[%c6, %c0_81, %c0_82] : memref<9x128x128xbf16, #tpu.memory_space<vmem>>, vector<1x128x128xbf16>
    %61 = vector.shape_cast %60 : vector<1x128x128xbf16> to vector<128x128xbf16>
    %cst_83 = arith.constant dense<0.000000e+00> : vector<64x128xf32>
    %62 = tpu.matmul %58, %61, %cst_83 {dimension_numbers = #tpu.dot_dimension_numbers<[1], [0], [0], [1], [0, 0, 1, 1], [], []>} : vector<64x128xbf16>, vector<128x128xbf16>, vector<64x128xf32> -> vector<64x128xf32>
    %63 = arith.addf %59, %62 : vector<64x128xf32>
    %c0_84 = arith.constant 0 : index
    %c0_85 = arith.constant 0 : index
    %64 = vector.load %arg9[%c0_84, %c0_85] : memref<64x128xf32, #tpu.memory_space<vmem>>, vector<64x128xf32>
    tpu.vector_store %arg9[%c0_84, %c0_85], %63 {strides = array<i32>} : memref<64x128xf32, #tpu.memory_space<vmem>>, vector<64x128xf32>,
    %c0_86 = arith.constant 0 : index
    %c0_87 = arith.constant 0 : index
    %c2_88 = arith.constant 2 : index
    %c1_89 = arith.constant 1 : index
    %c0_90 = arith.constant 0 : index
    %65 = vector.load %arg2[%c0_86, %c0_87, %c2_88, %c1_89, %c0_90] : memref<1x1x10x10x128xbf16, #tpu.memory_space<vmem>>, vector<1x1x8x8x128xbf16>
    %66 = vector.shape_cast %65 : vector<1x1x8x8x128xbf16> to vector<8x8x128xbf16>
    %67 = vector.shape_cast %66 : vector<8x8x128xbf16> to vector<64x128xbf16>
    %c0_91 = arith.constant 0 : index
    %c0_92 = arith.constant 0 : index
    %68 = vector.load %arg9[%c0_91, %c0_92] : memref<64x128xf32, #tpu.memory_space<vmem>>, vector<64x128xf32>
    %c7 = arith.constant 7 : index
    %c0_93 = arith.constant 0 : index
    %c0_94 = arith.constant 0 : index
    %69 = vector.load %arg3[%c7, %c0_93, %c0_94] : memref<9x128x128xbf16, #tpu.memory_space<vmem>>, vector<1x128x128xbf16>
    %70 = vector.shape_cast %69 : vector<1x128x128xbf16> to vector<128x128xbf16>
    %cst_95 = arith.constant dense<0.000000e+00> : vector<64x128xf32>
    %71 = tpu.matmul %67, %70, %cst_95 {dimension_numbers = #tpu.dot_dimension_numbers<[1], [0], [0], [1], [0, 0, 1, 1], [], []>} : vector<64x128xbf16>, vector<128x128xbf16>, vector<64x128xf32> -> vector<64x128xf32>
    %72 = arith.addf %68, %71 : vector<64x128xf32>
    %c0_96 = arith.constant 0 : index
    %c0_97 = arith.constant 0 : index
    %73 = vector.load %arg9[%c0_96, %c0_97] : memref<64x128xf32, #tpu.memory_space<vmem>>, vector<64x128xf32>
    tpu.vector_store %arg9[%c0_96, %c0_97], %72 {strides = array<i32>} : memref<64x128xf32, #tpu.memory_space<vmem>>, vector<64x128xf32>,
    %c0_98 = arith.constant 0 : index
    %c0_99 = arith.constant 0 : index
    %c2_100 = arith.constant 2 : index
    %c2_101 = arith.constant 2 : index
    %c0_102 = arith.constant 0 : index
    %74 = vector.load %arg2[%c0_98, %c0_99, %c2_100, %c2_101, %c0_102] : memref<1x1x10x10x128xbf16, #tpu.memory_space<vmem>>, vector<1x1x8x8x128xbf16>
    %75 = vector.shape_cast %74 : vector<1x1x8x8x128xbf16> to vector<8x8x128xbf16>
    %76 = vector.shape_cast %75 : vector<8x8x128xbf16> to vector<64x128xbf16>
    %c0_103 = arith.constant 0 : index
    %c0_104 = arith.constant 0 : index
    %77 = vector.load %arg9[%c0_103, %c0_104] : memref<64x128xf32, #tpu.memory_space<vmem>>, vector<64x128xf32>
    %c8 = arith.constant 8 : index
    %c0_105 = arith.constant 0 : index
    %c0_106 = arith.constant 0 : index
    %78 = vector.load %arg3[%c8, %c0_105, %c0_106] : memref<9x128x128xbf16, #tpu.memory_space<vmem>>, vector<1x128x128xbf16>
    %79 = vector.shape_cast %78 : vector<1x128x128xbf16> to vector<128x128xbf16>
    %cst_107 = arith.constant dense<0.000000e+00> : vector<64x128xf32>
    %80 = tpu.matmul %76, %79, %cst_107 {dimension_numbers = #tpu.dot_dimension_numbers<[1], [0], [0], [1], [0, 0, 1, 1], [], []>} : vector<64x128xbf16>, vector<128x128xbf16>, vector<64x128xf32> -> vector<64x128xf32>
    %81 = arith.addf %77, %80 : vector<64x128xf32>
    %c0_108 = arith.constant 0 : index
    %c0_109 = arith.constant 0 : index
    %82 = vector.load %arg9[%c0_108, %c0_109] : memref<64x128xf32, #tpu.memory_space<vmem>>, vector<64x128xf32>
    tpu.vector_store %arg9[%c0_108, %c0_109], %81 {strides = array<i32>} : memref<64x128xf32, #tpu.memory_space<vmem>>, vector<64x128xf32>,
    %c0_110 = arith.constant 0 : index
    %c0_111 = arith.constant 0 : index
    %83 = vector.load %arg9[%c0_110, %c0_111] : memref<64x128xf32, #tpu.memory_space<vmem>>, vector<64x128xf32>
    %c0_112 = arith.constant 0 : index
    %c0_113 = arith.constant 0 : index
    %84 = vector.load %arg4[%c0_112, %c0_113] : memref<1x128xf32, #tpu.memory_space<vmem>>, vector<1x128xf32>
    %85 = vector.broadcast %84 : vector<1x128xf32> to vector<64x128xf32>
    %86 = arith.addf %83, %85 : vector<64x128xf32>
    %c0_114 = arith.constant 0 : index
    %c0_115 = arith.constant 0 : index
    %c0_116 = arith.constant 0 : index
    %87 = vector.load %arg5[%c0_114, %c0_115, %c0_116] : memref<1x64x4xbf16, #tpu.memory_space<vmem>>, vector<1x64x4xbf16>
    %88 = vector.shape_cast %87 : vector<1x64x4xbf16> to vector<64x4xbf16>
    %c0_117 = arith.constant 0 : index
    %c0_118 = arith.constant 0 : index
    %89 = vector.load %arg6[%c0_117, %c0_118] : memref<4x128xbf16, #tpu.memory_space<vmem>>, vector<4x128xbf16>
    %cst_119 = arith.constant dense<0.000000e+00> : vector<64x128xf32>
    %90 = tpu.matmul %88, %89, %cst_119 {dimension_numbers = #tpu.dot_dimension_numbers<[1], [0], [0], [1], [0, 0, 1, 1], [], []>} : vector<64x4xbf16>, vector<4x128xbf16>, vector<64x128xf32> -> vector<64x128xf32>
    %91 = arith.addf %86, %90 : vector<64x128xf32>
    %c0_120 = arith.constant 0 : index
    %c0_121 = arith.constant 0 : index
    %92 = vector.load %arg7[%c0_120, %c0_121] : memref<1x128xf32, #tpu.memory_space<vmem>>, vector<1x128xf32>
    %93 = vector.broadcast %92 : vector<1x128xf32> to vector<64x128xf32>
    %94 = arith.addf %91, %93 : vector<64x128xf32>
    %cst_122 = arith.constant 0.000000e+00 : f32
    %95 = vector.broadcast %cst_122 : f32 to vector<64x128xf32>
    %96 = arith.maximumf %94, %95 : vector<64x128xf32>
    %c0_123 = arith.constant 0 : index
    %c0_124 = arith.constant 0 : index
    %c0_125 = arith.constant 0 : index
    %97 = vector.load %arg8[%c0_123, %c0_124, %c0_125] : memref<1x64x128xf32, #tpu.memory_space<vmem>>, vector<1x64x128xf32>
    %98 = vector.shape_cast %97 : vector<1x64x128xf32> to vector<64x128xf32>
    %99 = vector.shape_cast %96 : vector<64x128xf32> to vector<1x64x128xf32>
    tpu.vector_store %arg8[%c0_123, %c0_124, %c0_125], %99 {strides = array<i32>} : memref<1x64x128xf32, #tpu.memory_space<vmem>>, vector<1x64x128xf32>,
    return
  }
  func.func @transform_0(%arg0: i32, %arg1: i32) -> (i32, i32, i32, i32, i32) {
    %c0_i32 = arith.constant 0 : i32
    %c0_i32_0 = arith.constant 0 : i32
    %c0_i32_1 = arith.constant 0 : i32
    %c0_i32_2 = arith.constant 0 : i32
    %c0_i32_3 = arith.constant 0 : i32
    return %c0_i32, %arg1, %c0_i32_0, %c0_i32_1, %c0_i32_2 : i32, i32, i32, i32, i32
  }
  func.func @transform_1(%arg0: i32, %arg1: i32) -> (i32, i32, i32) {
    %c0_i32 = arith.constant 0 : i32
    %c0_i32_0 = arith.constant 0 : i32
    %c0_i32_1 = arith.constant 0 : i32
    return %c0_i32, %c0_i32_0, %arg0 : i32, i32, i32
  }
  func.func @transform_2(%arg0: i32, %arg1: i32) -> (i32, i32) {
    %c0_i32 = arith.constant 0 : i32
    %c0_i32_0 = arith.constant 0 : i32
    return %c0_i32, %arg0 : i32, i32
  }
  func.func @transform_3(%arg0: i32, %arg1: i32) -> (i32, i32, i32) {
    %c0_i32 = arith.constant 0 : i32
    %c0_i32_0 = arith.constant 0 : i32
    %c0_i32_1 = arith.constant 0 : i32
    return %arg1, %c0_i32, %c0_i32_0 : i32, i32, i32
  }
  func.func @transform_4(%arg0: i32, %arg1: i32) -> (i32, i32) {
    %c0_i32 = arith.constant 0 : i32
    %c0_i32_0 = arith.constant 0 : i32
    return %c0_i32, %arg0 : i32, i32
  }
  func.func @transform_5(%arg0: i32, %arg1: i32) -> (i32, i32) {
    %c0_i32 = arith.constant 0 : i32
    %c0_i32_0 = arith.constant 0 : i32
    return %c0_i32, %arg0 : i32, i32
  }
  func.func @transform_6(%arg0: i32, %arg1: i32) -> (i32, i32, i32) {
    %c0_i32 = arith.constant 0 : i32
    %c0_i32_0 = arith.constant 0 : i32
    return %arg1, %c0_i32, %arg0 : i32, i32, i32
  }
}

</mosaic_0001>

<bundles_post_ra>
// kernel: basic_block_forward.2
= control target key start
LH: loop header
LB: loop body
LE: loop exit
PB: predicated region body
PF: predicated region fallthrough
CT: control target
= control target key end

     0   :  { %s2320_s12 = smov 0   ;;  %s2322_s13 = smov 0   ;;  %s2747_s0 = inlined_call_operand.vmem [shape: bf16[4,2,9,9,4], index: 0, kind: input, shape index: {}]   ;;  %s2748_s1 = inlined_call_operand.vmem [shape: bf16[9,4,128], index: 1, kind: input, shape index: {}]   ;;  %s2749_s2 = inlined_call_operand.vmem [shape: f32[1,128], index: 2, kind: input, shape index: {}]   ;;  %s2750_s3 = inlined_call_operand.vmem [shape: bf16[2,64,128], index: 3, kind: output, shape index: {}]  }
   0x1   :  { %s2324_s14 = smov 0   ;;  %s2326_s15 = smov 0  }
   0x2   :  { %s2328_s16 = smov 0  }
   0x3 LB: > { %s22_s17 = sadd.s32 1, %s2294_s15  ;;  %p39_p1 = scmp.ne.s32.totalorder %s2286_s13, %s2282_s12  ;;  %s2298_s16 = sphi %s2328_s16, %s13_s16   ;;  %s2294_s15 = sphi %s2326_s15, %s2756_s15   ;;  %s2290_s14 = sphi %s2324_s14, %s2755_s14   ;;  %s2286_s13 = sphi %s2322_s13, %s2754_s13   ;;  %s2282_s12 = sphi %s2320_s12, %s2753_s12  }
   0x4   : > { %p23_p0 = scmp.ge.s32.totalorder %s22_s17, 2  ;;  %p40_p2 = scmp.eq.s32.totalorder %s2298_s16, 0 }
   0x5   : > { %s32_s19 = sadd.s32 1, %s2286_s13  ;;  %p1946_p5 = scmp.ge.s32.totalorder %s2298_s16, 2 }
   0x6   : > { %s2758_s17 = smov (%p23_p0, %s22_s17), 0  ;;  %p41_p3 = por %p40_p2, %p39_p1 }
   0x7   : > { %s29_s18 = ssub.s32 %s2294_s15, %s2758_s17  ;;  %158 = sbr.rel (%p1946_p5) target bundleno = 53 (0x35), region = 24 }
   0x8   : > { %p30_p4 = scmp.eq.s32.totalorder %s29_s18, 0 }
   0xa   : > { %s2355_s20 = scalar_select %p30_p4, %s2286_s13, %s32_s19  }
   0xc   : > { %161 = sbr.rel (!%p41_p3) target bundleno = 53 (0x35), region = 28  ;;  %s163_s21 = sand.u32 (%p41_p3), 1, %s2286_s13  }
   0xd   : > { %s2217_s22 = smul.u32 (%p41_p3), 72, %s2294_s15 }
   0xe   : > { %s2216_s23 = smul.u32 (%p41_p3), 288, %s163_s21 }
   0xf   : > { %s2363_s26 = scalar_lea.vmem (%p41_p3), %s2747_s0, %s2217_s22 }
  0x10   : > { %v185_v0 = vld [vmem:[%s2363_s26] sm:$0xff] (%p41_p3)   ;;  %v189_v1 = vld [vmem:[%s2363_s26 + $0x8] sm:$0xff] (%p41_p3)   ;;  %v193_v2 = vld [vmem:[%s2363_s26 + $0x10] sm:$0xff] (%p41_p3)   ;;  %s2368_s27 = scalar_lea.vmem (%p41_p3), [#allocation3], %s2216_s23 }
  0x11   : > { %186 = vst [vmem:[%s2368_s27] sm:$0xff] %v185_v0   ;;  %v197_v3 = vld [vmem:[%s2363_s26 + $0x18] sm:$0xff]   ;;  %v201_v4 = vld [vmem:[%s2363_s26 + $0x20] sm:$0xff]   ;;  %v205_v5 = vld [vmem:[%s2363_s26 + $0x28] sm:$0xff]  }
  0x12   : > { %190 = vst [vmem:[%s2368_s27 + $0x8] sm:$0xff] %v189_v1   ;;  %v209_v6 = vld [vmem:[%s2363_s26 + $0x30] sm:$0xff]   ;;  %v213_v7 = vld [vmem:[%s2363_s26 + $0x38] sm:$0xff]   ;;  %v217_v8 = vld [vmem:[%s2363_s26 + $0x40] sm:$0xff]  }
  0x13   : > { %194 = vst [vmem:[%s2368_s27 + $0x10] sm:$0xff] %v193_v2   ;;  %v221_v9 = vld [vmem:[%s2363_s26 + $0x90] sm:$0xff]   ;;  %v225_v10 = vld [vmem:[%s2363_s26 + $0x98] sm:$0xff]   ;;  %v229_v11 = vld [vmem:[%s2363_s26 + $0xa0] sm:$0xff]  }
  0x14   : > { %198 = vst [vmem:[%s2368_s27 + $0x18] sm:$0xff] %v197_v3   ;;  %v233_v12 = vld [vmem:[%s2363_s26 + $0xa8] sm:$0xff]   ;;  %v237_v13 = vld [vmem:[%s2363_s26 + $0xb0] sm:$0xff]   ;;  %v241_v14 = vld [vmem:[%s2363_s26 + $0xb8] sm:$0xff]  }
  0x15   : > { %202 = vst [vmem:[%s2368_s27 + $0x20] sm:$0xff] %v201_v4   ;;  %v245_v15 = vld [vmem:[%s2363_s26 + $0xc0] sm:$0xff]   ;;  %v249_v16 = vld [vmem:[%s2363_s26 + $0xc8] sm:$0xff]   ;;  %v253_v17 = vld [vmem:[%s2363_s26 + $0xd0] sm:$0xff]  }
  0x16   : > { %206 = vst [vmem:[%s2368_s27 + $0x28] sm:$0xff] %v205_v5   ;;  %v257_v18 = vld [vmem:[%s2363_s26 + $0x120] sm:$0xff]   ;;  %v261_v19 = vld [vmem:[%s2363_s26 + $0x128] sm:$0xff]   ;;  %v265_v20 = vld [vmem:[%s2363_s26 + $0x130] sm:$0xff]  }
  0x17   : > { %210 = vst [vmem:[%s2368_s27 + $0x30] sm:$0xff] %v209_v6   ;;  %v269_v21 = vld [vmem:[%s2363_s26 + $0x138] sm:$0xff]   ;;  %v273_v22 = vld [vmem:[%s2363_s26 + $0x140] sm:$0xff]   ;;  %v277_v23 = vld [vmem:[%s2363_s26 + $0x148] sm:$0xff]  }
  0x18   : > { %214 = vst [vmem:[%s2368_s27 + $0x38] sm:$0xff] %v213_v7   ;;  %v281_v24 = vld [vmem:[%s2363_s26 + $0x150] sm:$0xff]   ;;  %v285_v25 = vld [vmem:[%s2363_s26 + $0x158] sm:$0xff]   ;;  %v289_v26 = vld [vmem:[%s2363_s26 + $0x160] sm:$0xff]  }
  0x19   : > { %218 = vst [vmem:[%s2368_s27 + $0x40] sm:$0xff] %v217_v8   ;;  %v293_v27 = vld [vmem:[%s2363_s26 + $0x1b0] sm:$0xff]   ;;  %v297_v28 = vld [vmem:[%s2363_s26 + $0x1b8] sm:$0xff]   ;;  %v301_v29 = vld [vmem:[%s2363_s26 + $0x1c0] sm:$0xff]  }
  0x1a   : > { %222 = vst [vmem:[%s2368_s27 + $0x48] sm:$0xff] %v221_v9   ;;  %v305_v30 = vld [vmem:[%s2363_s26 + $0x1c8] sm:$0xff]   ;;  %v309_v31 = vld [vmem:[%s2363_s26 + $0x1d0] sm:$0xff]   ;;  %v313_v32 = vld [vmem:[%s2363_s26 + $0x1d8] sm:$0xff]  }
  0x1b   : > { %226 = vst [vmem:[%s2368_s27 + $0x50] sm:$0xff] %v225_v10   ;;  %v317_v33 = vld [vmem:[%s2363_s26 + $0x1e0] sm:$0xff]   ;;  %v321_v34 = vld [vmem:[%s2363_s26 + $0x1e8] sm:$0xff]   ;;  %v325_v35 = vld [vmem:[%s2363_s26 + $0x1f0] sm:$0xff]  }
  0x1c   : > { %230 = vst [vmem:[%s2368_s27 + $0x58] sm:$0xff] %v229_v11  }
  0x1d   : > { %234 = vst [vmem:[%s2368_s27 + $0x60] sm:$0xff] %v233_v12  }
  0x1e   : > { %238 = vst [vmem:[%s2368_s27 + $0x68] sm:$0xff] %v237_v13  }
  0x1f   : > { %242 = vst [vmem:[%s2368_s27 + $0x70] sm:$0xff] %v241_v14  }
  0x20   : > { %246 = vst [vmem:[%s2368_s27 + $0x78] sm:$0xff] %v245_v15  }
  0x21   : > { %250 = vst [vmem:[%s2368_s27 + $0x80] sm:$0xff] %v249_v16  }
  0x22   : > { %254 = vst [vmem:[%s2368_s27 + $0x88] sm:$0xff] %v253_v17  }
  0x23   : > { %258 = vst [vmem:[%s2368_s27 + $0x90] sm:$0xff] %v257_v18  }
  0x24   : > { %262 = vst [vmem:[%s2368_s27 + $0x98] sm:$0xff] %v261_v19  }
  0x25   : > { %266 = vst [vmem:[%s2368_s27 + $0xa0] sm:$0xff] %v265_v20  }
  0x26   : > { %270 = vst [vmem:[%s2368_s27 + $0xa8] sm:$0xff] %v269_v21  }
  0x27   : > { %274 = vst [vmem:[%s2368_s27 + $0xb0] sm:$0xff] %v273_v22  }
  0x28   : > { %278 = vst [vmem:[%s2368_s27 + $0xb8] sm:$0xff] %v277_v23  }
  0x29   : > { %282 = vst [vmem:[%s2368_s27 + $0xc0] sm:$0xff] %v281_v24  }
  0x2a   : > { %286 = vst [vmem:[%s2368_s27 + $0xc8] sm:$0xff] %v285_v25  }
  0x2b   : > { %290 = vst [vmem:[%s2368_s27 + $0xd0] sm:$0xff] %v289_v26  }
  0x2c   : > { %294 = vst [vmem:[%s2368_s27 + $0xd8] sm:$0xff] %v293_v27  }
  0x2d   : > { %298 = vst [vmem:[%s2368_s27 + $0xe0] sm:$0xff] %v297_v28  }
  0x2e   : > { %302 = vst [vmem:[%s2368_s27 + $0xe8] sm:$0xff] %v301_v29  }
  0x2f   : > { %306 = vst [vmem:[%s2368_s27 + $0xf0] sm:$0xff] %v305_v30  }
  0x30   : > { %310 = vst [vmem:[%s2368_s27 + $0xf8] sm:$0xff] %v309_v31  }
  0x31   : > { %314 = vst [vmem:[%s2368_s27 + $0x100] sm:$0xff] %v313_v32  }
  0x32   : > { %318 = vst [vmem:[%s2368_s27 + $0x108] sm:$0xff] %v317_v33  }
  0x33   : > { %322 = vst [vmem:[%s2368_s27 + $0x110] sm:$0xff] %v321_v34  }
  0x34   : > { %326 = vst [vmem:[%s2368_s27 + $0x118] sm:$0xff] %v325_v35  }
  0x35 PF: > { %p1948_p6 = scmp.ge.s32.totalorder %s2298_s16, 1  ;;  %p495_p7 = scmp.lt.s32.totalorder %s2298_s16, 3 }
  0x37   : > { %p496_p8 = pnand %p1948_p6, %p495_p7 }
  0x38   : > { %s502_s30 = sand.u32 (!%p496_p8), 1, %s2282_s12   ;;  %p542_p9 = scmp.lt.s32.totalorder (!%p496_p8), %s2290_s14, 1 }
  0x39   : > { %499 = sbr.rel (%p496_p8) target bundleno = 351 (0x15f), region = 69 }
  0x3a   : > { %s2218_s4 = smul.u32 (!%p496_p8), 288, %s502_s30 }
  0x3c   : > { %s2462_s18 = scalar_lea.vmem (!%p496_p8), [#allocation3], %s2218_s4 }
  0x3e   : > { %v575_v36 = vld [vmem:[%s2748_s1] sm:$0x3]  ;;  %vm609_vm0 = vcmask 1041408   ;;  %v2000_v38 = vld [vmem:[%s2748_s1 + $0x4] sm:$0x3]  ;;  %vm596_vm1 = vcmask 31744  }
  0x3f   : > { %v611_v37 = vsel %vm609_vm0, %v575_v36, 0  ;;  %v2013_v39 = vld [vmem:[%s2748_s1 + $0x6] sm:$0x3]  ;;  %v923_v40 = vsel %vm609_vm0, %v2000_v38, 0  ;;  %v1979_v42 = vld [vmem:[%s2748_s1 + $0x2] sm:$0x3] }
  0x40   : > { %2213 = vmatpush.bf16.msra.mxu1 %v611_v37  ;;  %2214 = vmatpush.bf16.msra.mxu2 %v611_v37  ;;  %v1022_v41 = vsel %vm609_vm0, %v2013_v39, 0  ;;  %v2042_v43 = vld [vmem:[%s2748_s1 + $0x8] sm:$0x3]  ;;  %v710_v44 = vsel %vm609_vm0, %v1979_v42, 0  ;;  %v1957_v46 = vld [vmem:[%s2462_s18 + $0x10] sm:$0xf] }
  0x41   : > { %2215 = vmatpush.bf16.msra.mxu3 %v611_v37  ;;  %620 = vmatpush.bf16.msra.mxu0 %v611_v37  ;;  %v1121_v45 = vsel %vm609_vm0, %v2042_v43, 0  ;;  %v2167_v47 = vld [vmem:[%s2462_s18 + $0x14] sm:$0xf0]  ;;  %v1961_v48 = vld [vmem:[%s2462_s18 + $0x20] sm:$0xf]  ;;  %s2760_s14 = smov (!%p542_p9, %s2290_s14), 1 }
  0x42   : > { %v1958_v49 = vor.u32 %v2167_v47, %v1957_v46  ;;  %v2168_v50 = vld [vmem:[%s2462_s18 + $0x24] sm:$0xf0]  ;;  %v1965_v51 = vld [vmem:[%s2462_s18 + $0x30] sm:$0xf]  ;;  %v2169_v52 = vld [vmem:[%s2462_s18 + $0x34] sm:$0xf0] }
  0x43   : > { %v1962_v53 = vor.u32 %v2168_v50, %v1961_v48  ;;  %v1966_v54 = vor.u32 %v2169_v52, %v1965_v51  ;;  %v1953_v55 = vld [vmem:[%s2462_s18] sm:$0xf]  ;;  %v2166_v56 = vld [vmem:[%s2462_s18 + $0x4] sm:$0xf0]  ;;  %v758_v59 = vld [vmem:[%s2462_s18 + $0x4] sm:$0x1] }
  0x44   : > { %932 = vmatpush.bf16.msrb.mxu2 %v923_v40  ;;  %719 = vmatpush.bf16.msrb.mxu1 %v710_v44  ;;  %v1954_v57 = vor.u32 %v2166_v56, %v1953_v55  ;;  %v757_v58 = vld [vmem:[%s2462_s18] sm:$0xf]  ;;  %v759_v60 = vld [vmem:[%s2462_s18 + $0x8] sm:$0xf]  ;;  %v760_v61 = vld [vmem:[%s2462_s18 + $0xc] sm:$0x1] }
  0x45   : > { %1031 = vmatpush.bf16.msrb.mxu3 %v1022_v41  ;;  %1130 = vmatpush.bf16.msrb.mxu0 %v1121_v45  ;;  %v777_v62 = vshrl.u32 %v757_v58, 16  ;;  %v780_v63 = vshll.u32 %v757_v58, 16  ;;  %v786_v0 = vshll.u32 %v758_v59, 16  ;;  %v791_v1 = vshrl.u32 %v759_v60, 16  ;;  %v2092_v4 = vld [vmem:[%s2748_s1 + $0xc] sm:$0x3] }
  0x46   : > { %1968 = vmatmul.msk.bf16.vlgmr.msra.gmra.mxu1 %vm596_vm1, %v1958_v49  ;;  %1969 = vmatmul.msk.bf16.vlgmr.msra.gmra.mxu2 %vm596_vm1, %v1962_v53  ;;  %vm773_vm2 = vsmask.f32 3328  ;;  %v794_v2 = vshll.u32 %v759_v60, 16  ;;  %v800_v3 = vshll.u32 %v760_v61, 16  ;;  %vm774_vm3 = vsmask.f32 7440 }
  0x47   : > { %1970 = vmatmul.msk.bf16.vlgmr.msra.gmra.mxu3 %vm596_vm1, %v1966_v54  ;;  %1967 = vmatmul.msk.bf16.vlgmr.msra.gmra.mxu0 %vm596_vm1, %v1954_v57  ;;  %v779_v5 = vrot.slane %v777_v62, 4  ;;  %v782_v6 = vrot.slane %v780_v63, 5  ;;  %v793_v7 = vrot.slane %v791_v1, 4  ;;  %v788_v8 = vrot.slane %v786_v0, 5  ;;  %v2121_v13 = vld [vmem:[%s2748_s1 + $0xe] sm:$0x3]  ;;  %vm2497_vm4 = vmor %vm773_vm2, %vm774_vm3 }
  0x48   : > { %v796_v9 = vrot.slane %v794_v2, 5  ;;  %v802_v10 = vrot.slane %v800_v3, 5  ;;  %v1430_v11 = vsel %vm609_vm0, %v2092_v4, 0  ;;  %v2079_v14 = vld [vmem:[%s2748_s1 + $0xa] sm:$0x3]  ;;  %v1529_v20 = vsel %vm609_vm0, %v2121_v13, 0 }
  0x49   : > { %v783_v12 = vor.u32 %v782_v6, %v779_v5  ;;  %1439 = vmatpush.bf16.msra.mxu2 %v1430_v11  ;;  %v2158_v15 = vld [vmem:[%s2748_s1 + $0x10] sm:$0x3]  ;;  %v1982_v16 = vld [vmem:[%s2462_s18 + $0x48] sm:$0xf]  ;;  %v1331_v21 = vsel %vm609_vm0, %v2079_v14, 0  ;;  %1538 = vmatpush.bf16.msra.mxu3 %v1529_v20  ;;  %s2165_s30 = sshll.u32 %s2760_s14, 5 }
  0x4a   : > { %v2170_v17 = vld [vmem:[%s2462_s18 + $0x4c] sm:$0xf0]  ;;  %v797_v19 = vor.u32 %v796_v9, %v793_v7  ;;  %v1739_v22 = vsel %vm609_vm0, %v2158_v15, 0  ;;  %1340 = vmatpush.bf16.msra.mxu1 %v1331_v21  ;;  %v2174_v27 = vld [vmem:[%s2462_s18 + $0x94] sm:$0xf0]  ;;  %s2707_s6 = scalar_lea.vmem %s2750_s3, %s2165_s30 }
  0x4b   : > { %v784_v23 = vrot.slane %v783_v12, 4  ;;  %v2016_v24 = vld [vmem:[%s2462_s18 + $0x90] sm:$0xf]  ;;  %1748 = vmatpush.bf16.msra.mxu0 %v1739_v22  ;;  %v763_v28 = vld [vmem:[%s2462_s18 + $0x18] sm:$0xf]  ;;  %v1983_v41 = vor.u32 %v2170_v17, %v1982_v16 }
  0x4c   : > { %v761_v25 = vld [vmem:[%s2462_s18 + $0x10] sm:$0xf]  ;;  %v798_v26 = vrot.slane %v797_v19, 4  ;;  %v2045_v31 = vld [vmem:[%s2462_s18 + $0xd8] sm:$0xf]  ;;  %v819_v34 = vshrl.u32 %v763_v28, 16  ;;  %v2017_v45 = vor.u32 %v2174_v27, %v2016_v24 }
  0x4d   : > { %v805_v29 = vshrl.u32 %v761_v25, 16  ;;  %v789_v30 = vsel %vm2497_vm4, %v784_v23, %v788_v8  ;;  %v2178_v32 = vld [vmem:[%s2462_s18 + $0xdc] sm:$0xf0]  ;;  %v808_v33 = vshll.u32 %v761_v25, 16  ;;  %v762_v37 = vld [vmem:[%s2462_s18 + $0x14] sm:$0x1] }
  0x4e   : > { %v803_v35 = vsel %vm2497_vm4, %v798_v26, %v802_v10  ;;  %v898_v36 = vunpack.c.l.b16 %v789_v30  ;;  %v764_v38 = vld [vmem:[%s2462_s18 + $0x1c] sm:$0x1]  ;;  %v822_v40 = vshll.u32 %v763_v28, 16  ;;  %v821_v44 = vrot.slane %v819_v34, 4  ;;  %v765_v57 = vld [vmem:[%s2462_s18 + $0x20] sm:$0xf] }
  0x4f   : > { %v807_v39 = vrot.slane %v805_v29, 4  ;;  %v899_v42 = vunpack.c.l.b16 %v803_v35  ;;  %v810_v43 = vrot.slane %v808_v33, 5  ;;  %v2046_v46 = vor.u32 %v2178_v32, %v2045_v31  ;;  %v767_v58 = vld [vmem:[%s2462_s18 + $0x28] sm:$0xf]  ;;  %v1986_v1 = vld [vmem:[%s2462_s18 + $0x58] sm:$0xf] }
  0x50   : > { %v824_v47 = vrot.slane %v822_v40, 5  ;;  %v814_v50 = vshll.u32 %v762_v37, 16  ;;  %v828_v51 = vshll.u32 %v764_v38, 16  ;;  %v833_v59 = vshrl.u32 %v765_v57, 16  ;;  %v2171_v2 = vld [vmem:[%s2462_s18 + $0x5c] sm:$0xf0] }
  0x51   : > { %v906_v48 = vpack.c.b16 %v899_v42, %v898_v36  ;;  %v811_v49 = vor.u32 %v810_v43, %v807_v39  ;;  %v836_v60 = vshll.u32 %v765_v57, 16  ;;  %v847_v63 = vshrl.u32 %v767_v58, 16  ;;  %v2020_v5 = vld [vmem:[%s2462_s18 + $0xa0] sm:$0xf]  ;;  %v2175_v6 = vld [vmem:[%s2462_s18 + $0xa4] sm:$0xf0] }
  0x52   : > { %v825_v52 = vor.u32 %v824_v47, %v821_v44  ;;  %v816_v54 = vrot.slane %v814_v50, 5  ;;  %v830_v56 = vrot.slane %v828_v51, 5  ;;  %v850_v0 = vshll.u32 %v767_v58, 16  ;;  %v2049_v7 = vld [vmem:[%s2462_s18 + $0xe8] sm:$0xf] }
  0x53   : > { %v812_v53 = vrot.slane %v811_v49, 4  ;;  %v2179_v8 = vld [vmem:[%s2462_s18 + $0xec] sm:$0xf0]  ;;  %v835_v9 = vrot.slane %v833_v59, 4  ;;  %v838_v10 = vrot.slane %v836_v60, 5  ;;  %v849_v11 = vrot.slane %v847_v63, 4 }
  0x54   : > { %v826_v55 = vrot.slane %v825_v52, 4  ;;  %v852_v12 = vrot.slane %v850_v0, 5  ;;  %v766_v13 = vld [vmem:[%s2462_s18 + $0x24] sm:$0x1]  ;;  %v768_v14 = vld [vmem:[%s2462_s18 + $0x2c] sm:$0x1]  ;;  %v1987_v15 = vor.u32 %v2171_v2, %v1986_v1  ;;  %v2021_v17 = vor.u32 %v2175_v6, %v2020_v5 }
  0x55   : > { %v817_v61 = vsel %vm2497_vm4, %v812_v53, %v816_v54  ;;  %v2050_v19 = vor.u32 %v2179_v8, %v2049_v7  ;;  %v839_v20 = vor.u32 %v838_v10, %v835_v9  ;;  %v842_v21 = vshll.u32 %v766_v13, 16  ;;  %v769_v24 = vld [vmem:[%s2462_s18 + $0x30] sm:$0xf]  ;;  %v771_v25 = vld [vmem:[%s2462_s18 + $0x38] sm:$0xf] }
  0x56   : > { %1996 = vmatmul.msk.bf16.vlgmr.msrb.gmra.mxu1 %vm596_vm1, %v1983_v41  ;;  %2001 = vmatmul.msk.bf16.vlgmr.msrb.gmra.mxu2 %vm596_vm1, %v906_v48  ;;  %v831_v62 = vsel %vm2497_vm4, %v826_v55, %v830_v56  ;;  %v900_v3 = vunpack.c.l.b16 %v817_v61  ;;  %v853_v22 = vor.u32 %v852_v12, %v849_v11  ;;  %v856_v23 = vshll.u32 %v768_v14, 16  ;;  %v770_v40 = vld [vmem:[%s2462_s18 + $0x34] sm:$0x1]  ;;  %v772_v41 = vld [vmem:[%s2462_s18 + $0x3c] sm:$0x1] }
  0x57   : > { %2030 = vmatmul.msk.bf16.vlgmr.msrb.gmra.mxu3 %vm596_vm1, %v2017_v45  ;;  %2059 = vmatmul.msk.bf16.vlgmr.msrb.gmra.mxu0 %vm596_vm1, %v2046_v46  ;;  %v901_v4 = vunpack.c.l.b16 %v831_v62  ;;  %v840_v26 = vrot.slane %v839_v20, 4  ;;  %v844_v27 = vrot.slane %v842_v21, 5  ;;  %v861_v30 = vshrl.u32 %v769_v24, 16  ;;  %v1990_v42 = vld [vmem:[%s2462_s18 + $0x68] sm:$0xf] }
  0x58   : > { %v854_v28 = vrot.slane %v853_v22, 4  ;;  %v858_v29 = vrot.slane %v856_v23, 5  ;;  %v864_v31 = vshll.u32 %v769_v24, 16  ;;  %v875_v32 = vshrl.u32 %v771_v25, 16  ;;  %v2172_v43 = vld [vmem:[%s2462_s18 + $0x6c] sm:$0xf0] }
  0x59   : > { %v907_v16 = vpack.c.b16 %v901_v4, %v900_v3  ;;  %v878_v33 = vshll.u32 %v771_v25, 16  ;;  %v845_v34 = vsel %vm2497_vm4, %v840_v26, %v844_v27  ;;  %v863_v36 = vrot.slane %v861_v30, 4  ;;  %v2024_v46 = vld [vmem:[%s2462_s18 + $0xb0] sm:$0xf]  ;;  %v2176_v47 = vld [vmem:[%s2462_s18 + $0xb4] sm:$0xf0] }
  0x5a   : > { %v859_v35 = vsel %vm2497_vm4, %v854_v28, %v858_v29  ;;  %v866_v37 = vrot.slane %v864_v31, 5  ;;  %v877_v38 = vrot.slane %v875_v32, 4  ;;  %v902_v44 = vunpack.c.l.b16 %v845_v34  ;;  %v2053_v48 = vld [vmem:[%s2462_s18 + $0xf8] sm:$0xf]  ;;  %v2180_v49 = vld [vmem:[%s2462_s18 + $0xfc] sm:$0xf0] }
  0x5b   : > { %v880_v39 = vrot.slane %v878_v33, 5  ;;  %v903_v45 = vunpack.c.l.b16 %v859_v35  ;;  %v870_v51 = vshll.u32 %v770_v40, 16  ;;  %v884_v53 = vshll.u32 %v772_v41, 16  ;;  %v2063_v62 = vld [vmem:[%s2462_s18 + $0x90] sm:$0xf] }
  0x5c   : > { %v867_v50 = vor.u32 %v866_v37, %v863_v36  ;;  %v1991_v54 = vor.u32 %v2172_v43, %v1990_v42  ;;  %v2025_v56 = vor.u32 %v2176_v47, %v2024_v46  ;;  %v2054_v57 = vor.u32 %v2180_v49, %v2053_v48  ;;  %v2065_v63 = vld [vmem:[%s2462_s18 + $0x98] sm:$0xf]  ;;  %v2142_v0 = vld [vmem:[%s2462_s18 + $0x8] sm:$0xf]  ;;  %v2144_v1 = vld [vmem:[%s2462_s18 + $0x10] sm:$0xf] }
  0x5d   : > { %v881_v52 = vor.u32 %v880_v39, %v877_v38  ;;  %v908_v55 = vpack.c.b16 %v903_v45, %v902_v44  ;;  %v872_v59 = vrot.slane %v870_v51, 5  ;;  %v886_v61 = vrot.slane %v884_v53, 5  ;;  %v1994_v12 = vld [vmem:[%s2462_s18 + $0x78] sm:$0xf]  ;;  %v2173_v13 = vld [vmem:[%s2462_s18 + $0x7c] sm:$0xf0] }
  0x5e   : > { %v868_v58 = vrot.slane %v867_v50, 4  ;;  %v1185_v4 = vshrl.u32 %v2063_v62, 16  ;;  %v1188_v5 = vshll.u32 %v2063_v62, 16  ;;  %v1199_v6 = vshrl.u32 %v2065_v63, 16  ;;  %v2066_v24 = vld [vmem:[%s2462_s18 + $0x9c] sm:$0x1] }
  0x5f   : > { %v882_v60 = vrot.slane %v881_v52, 4  ;;  %v1202_v7 = vshll.u32 %v2065_v63, 16  ;;  %v1593_v8 = vshrl.u32 %v2142_v0, 16  ;;  %v1596_v9 = vshll.u32 %v2142_v0, 16  ;;  %v2143_v29 = vld [vmem:[%s2462_s18 + $0xc] sm:$0x1] }
  0x60   : > { %v873_v2 = vsel %vm2497_vm4, %v868_v58, %v872_v59  ;;  %v1607_v10 = vshrl.u32 %v2144_v1, 16  ;;  %v1610_v11 = vshll.u32 %v2144_v1, 16  ;;  %v1187_v20 = vrot.slane %v1185_v4, 4  ;;  %v2145_v30 = vld [vmem:[%s2462_s18 + $0x14] sm:$0x1] }
  0x61   : > { %v887_v3 = vsel %vm2497_vm4, %v882_v60, %v886_v61  ;;  %v904_v14 = vunpack.c.l.b16 %v873_v2  ;;  %v1190_v21 = vrot.slane %v1188_v5, 5  ;;  %v1201_v22 = vrot.slane %v1199_v6, 4  ;;  %v2057_v34 = vld [vmem:[%s2462_s18 + $0x108] sm:$0xf]  ;;  %v2181_v35 = vld [vmem:[%s2462_s18 + $0x10c] sm:$0xf0] }
  0x62   : > { %v1204_v23 = vrot.slane %v1202_v7, 5  ;;  %v1595_v25 = vrot.slane %v1593_v8, 4  ;;  %v1598_v26 = vrot.slane %v1596_v9, 5  ;;  %v1609_v27 = vrot.slane %v1607_v10, 4  ;;  %v2067_v45 = vld [vmem:[%s2462_s18 + $0xa0] sm:$0xf] }
  0x63   : > { %v1612_v28 = vrot.slane %v1610_v11, 5  ;;  %v1995_v31 = vor.u32 %v2173_v13, %v1994_v12  ;;  %v1191_v36 = vor.u32 %v1190_v21, %v1187_v20  ;;  %v1208_v39 = vshll.u32 %v2066_v24, 16  ;;  %v2069_v46 = vld [vmem:[%s2462_s18 + $0xa8] sm:$0xf]  ;;  %v2146_v59 = vld [vmem:[%s2462_s18 + $0x18] sm:$0xf] }
  0x64   : > { %v1205_v38 = vor.u32 %v1204_v23, %v1201_v22  ;;  %v1599_v40 = vor.u32 %v1598_v26, %v1595_v25  ;;  %v1602_v41 = vshll.u32 %v2143_v29, 16  ;;  %v1616_v43 = vshll.u32 %v2145_v30, 16  ;;  %v2148_v60 = vld [vmem:[%s2462_s18 + $0x20] sm:$0xf]  ;;  %v2068_v1 = vld [vmem:[%s2462_s18 + $0xa4] sm:$0x1] }
  0x65   : > { %v1613_v42 = vor.u32 %v1612_v28, %v1609_v27  ;;  %v2058_v44 = vor.u32 %v2181_v35, %v2057_v34  ;;  %v1192_v47 = vrot.slane %v1191_v36, 4  ;;  %v1210_v50 = vrot.slane %v1208_v39, 5  ;;  %v2070_v6 = vld [vmem:[%s2462_s18 + $0xac] sm:$0x1]  ;;  %v2095_v13 = vld [vmem:[%s2462_s18 + $0x8] sm:$0xf] }
  0x66   : > { %1997 = vmatmul.msk.bf16.gmra.mxu1 %vm596_vm1, %v1987_v15  ;;  %2002 = vmatmul.msk.bf16.gmra.mxu2 %vm596_vm1, %v907_v16  ;;  %v905_v15 = vunpack.c.l.b16 %v887_v3  ;;  %v2028_v16 = vld [vmem:[%s2462_s18 + $0xc0] sm:$0xf]  ;;  %v1206_v49 = vrot.slane %v1205_v38, 4  ;;  %v1600_v51 = vrot.slane %v1599_v40, 4  ;;  %v1604_v52 = vrot.slane %v1602_v41, 5 }
  0x67   : > { %2031 = vmatmul.msk.bf16.gmra.mxu3 %vm596_vm1, %v2021_v17  ;;  %2060 = vmatmul.msk.bf16.gmra.mxu0 %vm596_vm1, %v2050_v19  ;;  %v2177_v17 = vld [vmem:[%s2462_s18 + $0xc4] sm:$0xf0]  ;;  %v2064_v19 = vld [vmem:[%s2462_s18 + $0x94] sm:$0x1]  ;;  %v1614_v53 = vrot.slane %v1613_v42, 4  ;;  %v1230_v58 = vshll.u32 %v2069_v46, 16 }
  0x68   : > { %v909_v32 = vpack.c.b16 %v905_v15, %v904_v14  ;;  %v2029_v33 = vor.u32 %v2177_v17, %v2028_v16  ;;  %v1194_v37 = vshll.u32 %v2064_v19, 16  ;;  %v1211_v62 = vsel %vm2497_vm4, %v1206_v49, %v1210_v50  ;;  %v2182_v14 = vld [vmem:[%s2462_s18 + $0xc] sm:$0xf0]  ;;  %v2186_v19 = vld [vmem:[%s2462_s18 + $0x54] sm:$0xf0] }
  0x69   : > { %v1605_v63 = vsel %vm2497_vm4, %v1600_v51, %v1604_v52  ;;  %v1232_v5 = vrot.slane %v1230_v58, 5  ;;  %v1621_v7 = vshrl.u32 %v2146_v59, 16  ;;  %v1624_v8 = vshll.u32 %v2146_v59, 16  ;;  %v2124_v17 = vld [vmem:[%s2462_s18 + $0x50] sm:$0xf] }
  0x6a   : > { %v1196_v48 = vrot.slane %v1194_v37, 5  ;;  %v1635_v9 = vshrl.u32 %v2148_v60, 16  ;;  %v1638_v10 = vshll.u32 %v2148_v60, 16  ;;  %v1307_v12 = vunpack.c.l.b16 %v1211_v62  ;;  %v2147_v29 = vld [vmem:[%s2462_s18 + $0x1c] sm:$0x1] }
  0x6b   : > { %v1714_v15 = vunpack.c.l.b16 %v1605_v63  ;;  %v1222_v21 = vshll.u32 %v2068_v1, 16  ;;  %v1236_v23 = vshll.u32 %v2070_v6, 16  ;;  %v1623_v24 = vrot.slane %v1621_v7, 4  ;;  %v2149_v30 = vld [vmem:[%s2462_s18 + $0x24] sm:$0x1] }
  0x6c   : > { %v1197_v61 = vsel %vm2497_vm4, %v1192_v47, %v1196_v48  ;;  %v1626_v25 = vrot.slane %v1624_v8, 5  ;;  %v1637_v26 = vrot.slane %v1635_v9, 4  ;;  %v1640_v27 = vrot.slane %v1638_v10, 5  ;;  %v2071_v42 = vld [vmem:[%s2462_s18 + $0xb0] sm:$0xf] }
  0x6d   : > { %v1306_v11 = vunpack.c.l.b16 %v1197_v61  ;;  %v1224_v35 = vrot.slane %v1222_v21, 5  ;;  %v1238_v37 = vrot.slane %v1236_v23, 5  ;;  %v1630_v39 = vshll.u32 %v2147_v29, 16  ;;  %v2152_v51 = vld [vmem:[%s2462_s18 + $0x30] sm:$0xf] }
  0x6e   : > { %v1627_v38 = vor.u32 %v1626_v25, %v1623_v24  ;;  %v1641_v40 = vor.u32 %v1640_v27, %v1637_v26  ;;  %v1644_v41 = vshll.u32 %v2149_v30, 16  ;;  %v1241_v52 = vshrl.u32 %v2071_v42, 16  ;;  %v2183_v1 = vld [vmem:[%s2462_s18 + $0x1c] sm:$0xf0]  ;;  %v2072_v7 = vld [vmem:[%s2462_s18 + $0xb4] sm:$0x1] }
  0x6f   : > { %v1314_v28 = vpack.c.b16 %v1307_v12, %v1306_v11  ;;  %v1632_v48 = vrot.slane %v1630_v39, 5  ;;  %v1663_v58 = vshrl.u32 %v2152_v51, 16  ;;  %v1666_v59 = vshll.u32 %v2152_v51, 16  ;;  %v2074_v8 = vld [vmem:[%s2462_s18 + $0xbc] sm:$0x1] }
  0x70   : > { %v1628_v47 = vrot.slane %v1627_v38, 4  ;;  %v1642_v49 = vrot.slane %v1641_v40, 4  ;;  %v1646_v50 = vrot.slane %v1644_v41, 5  ;;  %v2187_v11 = vld [vmem:[%s2462_s18 + $0x64] sm:$0xf0]  ;;  %v1250_v21 = vshll.u32 %v2072_v7, 16 }
  0x71   : > { %v1264_v23 = vshll.u32 %v2074_v8, 16  ;;  %v2075_v39 = vld [vmem:[%s2462_s18 + $0xc0] sm:$0xf]  ;;  %v2077_v40 = vld [vmem:[%s2462_s18 + $0xc8] sm:$0xf] }
  0x72   : > { %v1633_v62 = vsel %vm2497_vm4, %v1628_v47, %v1632_v48  ;;  %v1647_v63 = vsel %vm2497_vm4, %v1642_v49, %v1646_v50  ;;  %v1283_v47 = vshrl.u32 %v2077_v40, 16  ;;  %v1286_v48 = vshll.u32 %v2077_v40, 16  ;;  %v2136_v40 = vld [vmem:[%s2462_s18 + $0x80] sm:$0xf] }
  0x73   : > { %v1716_v12 = vunpack.c.l.b16 %v1633_v62 }
  0x76   : > { %1998 = vmatmul.msk.bf16.gmra.mxu1 %vm596_vm1, %v1991_v54  ;;  %2003 = vmatmul.msk.bf16.gmra.mxu2 %vm596_vm1, %v908_v55  ;;  %v1618_v54 = vrot.slane %v1616_v43, 5  ;;  %v1213_v55 = vshrl.u32 %v2067_v45, 16  ;;  %v2073_v43 = vld [vmem:[%s2462_s18 + $0xb8] sm:$0xf] }
  0x77   : > { %2032 = vmatmul.msk.bf16.gmra.mxu3 %vm596_vm1, %v2025_v56  ;;  %2061 = vmatmul.msk.bf16.gmra.mxu0 %vm596_vm1, %v2054_v57  ;;  %v1216_v56 = vshll.u32 %v2067_v45, 16  ;;  %v1227_v57 = vshrl.u32 %v2069_v46, 16  ;;  %v2150_v46 = vld [vmem:[%s2462_s18 + $0x28] sm:$0xf] }
  0x78   : > { %v1619_v0 = vsel %vm2497_vm4, %v1614_v53, %v1618_v54  ;;  %v1215_v2 = vrot.slane %v1213_v55, 4  ;;  %v1244_v53 = vshll.u32 %v2071_v42, 16  ;;  %v1255_v54 = vshrl.u32 %v2073_v43, 16 }
  0x79   : > { %v1218_v3 = vrot.slane %v1216_v56, 5  ;;  %v1229_v4 = vrot.slane %v1227_v57, 4  ;;  %v1715_v16 = vunpack.c.l.b16 %v1619_v0  ;;  %v1258_v55 = vshll.u32 %v2073_v43, 16  ;;  %v2099_v0 = vld [vmem:[%s2462_s18 + $0x18] sm:$0xf] }
  0x7a   : > { %v1649_v56 = vshrl.u32 %v2150_v46, 16  ;;  %v1652_v57 = vshll.u32 %v2150_v46, 16  ;;  %v2100_v24 = vor.u32 %v2183_v1, %v2099_v0  ;;  %v2154_v43 = vld [vmem:[%s2462_s18 + $0x38] sm:$0xf]  ;;  %v1272_v46 = vshll.u32 %v2075_v39, 16 }
  0x7b   : > { %v1219_v20 = vor.u32 %v1218_v3, %v1215_v2  ;;  %v1233_v22 = vor.u32 %v1232_v5, %v1229_v4  ;;  %v2128_v2 = vld [vmem:[%s2462_s18 + $0x60] sm:$0xf]  ;;  %v1243_v3 = vrot.slane %v1241_v52, 4  ;;  %v1246_v4 = vrot.slane %v1244_v53, 5 }
  0x7c   : > { %v1257_v5 = vrot.slane %v1255_v54, 4  ;;  %v1260_v6 = vrot.slane %v1258_v55, 5  ;;  %v1651_v9 = vrot.slane %v1649_v56, 4  ;;  %v1654_v10 = vrot.slane %v1652_v57, 5  ;;  %v2103_v57 = vld [vmem:[%s2462_s18 + $0x28] sm:$0xf] }
  0x7d   : > { %v1220_v34 = vrot.slane %v1219_v20, 4  ;;  %v1234_v36 = vrot.slane %v1233_v22, 4  ;;  %v1247_v20 = vor.u32 %v1246_v4, %v1243_v3  ;;  %v2129_v25 = vor.u32 %v2187_v11, %v2128_v2  ;;  %v2076_v3 = vld [vmem:[%s2462_s18 + $0xc4] sm:$0x1]  ;;  %v2078_v4 = vld [vmem:[%s2462_s18 + $0xcc] sm:$0x1] }
  0x7e   : > { %v1261_v22 = vor.u32 %v1260_v6, %v1257_v5  ;;  %v1655_v26 = vor.u32 %v1654_v10, %v1651_v9  ;;  %v1677_v51 = vshrl.u32 %v2154_v43, 16  ;;  %v1680_v52 = vshll.u32 %v2154_v43, 16 }
  0x7f   : > { %v1239_v45 = vsel %vm2497_vm4, %v1234_v36, %v1238_v37  ;;  %v1274_v62 = vrot.slane %v1272_v46, 5  ;;  %v1288_v0 = vrot.slane %v1286_v48, 5 }
  0x80   : > { %v1309_v61 = vunpack.c.l.b16 %v1239_v45  ;;  %v1269_v45 = vshrl.u32 %v2075_v39, 16  ;;  %v1679_v5 = vrot.slane %v1677_v51, 4  ;;  %v1682_v6 = vrot.slane %v1680_v52, 5  ;;  %v2185_v39 = vld [vmem:[%s2462_s18 + $0x3c] sm:$0xf0] }
  0x86   : > { %1999 = vmatmul.msk.bf16.gmra.mxu1 %vm596_vm1, %v1995_v31  ;;  %2004 = vmatmul.msk.bf16.gmra.mxu2 %vm596_vm1, %v909_v32  ;;  %v2096_v31 = vor.u32 %v2182_v14, %v2095_v13  ;;  %v2125_v32 = vor.u32 %v2186_v19, %v2124_v17  ;;  %v1717_v13 = vunpack.c.l.b16 %v1647_v63  ;;  %v2151_v14 = vld [vmem:[%s2462_s18 + $0x2c] sm:$0x1]  ;;  %v2153_v19 = vld [vmem:[%s2462_s18 + $0x34] sm:$0x1]  ;;  %v1285_v63 = vrot.slane %v1283_v47, 4 }
  0x87   : > { %2033 = vmatmul.msk.bf16.gmra.mxu3 %vm596_vm1, %v2029_v33  ;;  %2062 = vmatmul.msk.bf16.gmra.mxu0 %vm596_vm1, %v2058_v44  ;;  %v1722_v33 = vpack.c.b16 %v1715_v16, %v1714_v15  ;;  %v1225_v44 = vsel %vm2497_vm4, %v1220_v34, %v1224_v35  ;;  %v1665_v15 = vrot.slane %v1663_v58, 4  ;;  %v1668_v16 = vrot.slane %v1666_v59, 5  ;;  %v2184_v58 = vld [vmem:[%s2462_s18 + $0x2c] sm:$0xf0] }
  0x88   : > { %v1308_v60 = vunpack.c.l.b16 %v1225_v44  ;;  %v1658_v27 = vshll.u32 %v2151_v14, 16  ;;  %v1672_v30 = vshll.u32 %v2153_v19, 16  ;;  %v1266_v34 = vrot.slane %v1264_v23, 5  ;;  %v2156_v44 = vld [vmem:[%s2462_s18 + $0x40] sm:$0xf] }
  0x89   : > { %v1669_v29 = vor.u32 %v1668_v16, %v1665_v15  ;;  %v1656_v35 = vrot.slane %v1655_v26, 4  ;;  %v1691_v53 = vshrl.u32 %v2156_v44, 16  ;;  %v1694_v54 = vshll.u32 %v2156_v44, 16  ;;  %v2132_v59 = vld [vmem:[%s2462_s18 + $0x70] sm:$0xf] }
  0x8a   : > { %v1315_v17 = vpack.c.b16 %v1309_v61, %v1308_v60  ;;  %v1660_v36 = vrot.slane %v1658_v27, 5  ;;  %v1674_v38 = vrot.slane %v1672_v30, 5  ;;  %v2188_v60 = vld [vmem:[%s2462_s18 + $0x74] sm:$0xf0]  ;;  %v1271_v61 = vrot.slane %v1269_v45, 4 }
  0x8b   : > { %v1670_v37 = vrot.slane %v1669_v29, 4  ;;  %v1693_v7 = vrot.slane %v1691_v53, 4  ;;  %v1696_v8 = vrot.slane %v1694_v54, 5  ;;  %v2104_v10 = vor.u32 %v2184_v58, %v2103_v57 }
  0x8c   : > { %v1661_v49 = vsel %vm2497_vm4, %v1656_v35, %v1660_v36  ;;  %v2133_v11 = vor.u32 %v2188_v60, %v2132_v59  ;;  %v1275_v14 = vor.u32 %v1274_v62, %v1271_v61  ;;  %v1278_v15 = vshll.u32 %v2076_v3, 16 }
  0x8d   : > { %v1675_v50 = vsel %vm2497_vm4, %v1670_v37, %v1674_v38  ;;  %v1718_v1 = vunpack.c.l.b16 %v1661_v49  ;;  %v1289_v16 = vor.u32 %v1288_v0, %v1285_v63  ;;  %v2107_v38 = vld [vmem:[%s2462_s18 + $0x38] sm:$0xf] }
  0x8e   : > { %v1719_v2 = vunpack.c.l.b16 %v1675_v50  ;;  %v2108_v46 = vor.u32 %v2185_v39, %v2107_v38 }
  0x8f   : > { %v1290_v26 = vrot.slane %v1289_v16, 4 }
  0x90   : > { %v1724_v19 = vpack.c.b16 %v1719_v2, %v1718_v1 }
  0x96   : > { %2080 = vmatmul.msk.bf16.vlgmr.msra.gmra.mxu1 %vm596_vm1, %v1314_v28  ;;  %2109 = vmatmul.msk.bf16.vlgmr.msra.gmra.mxu2 %vm596_vm1, %v2096_v31  ;;  %v1723_v28 = vpack.c.b16 %v1717_v13, %v1716_v12  ;;  %v1248_v31 = vrot.slane %v1247_v20, 4  ;;  %v2155_v12 = vld [vmem:[%s2462_s18 + $0x3c] sm:$0x1]  ;;  %v2157_v13 = vld [vmem:[%s2462_s18 + $0x44] sm:$0x1]  ;;  %v1683_v20 = vor.u32 %v1682_v6, %v1679_v5 }
  0x97   : > { %2138 = vmatmul.msk.bf16.vlgmr.msra.gmra.mxu3 %vm596_vm1, %v2125_v32  ;;  %2159 = vmatmul.msk.bf16.vlgmr.msra.gmra.mxu0 %vm596_vm1, %v1722_v33  ;;  %v1252_v32 = vrot.slane %v1250_v21, 5  ;;  %v1262_v33 = vrot.slane %v1261_v22, 4  ;;  %v1686_v21 = vshll.u32 %v2155_v12, 16  ;;  %v1697_v22 = vor.u32 %v1696_v8, %v1693_v7 }
  0x98   : > { %v1700_v23 = vshll.u32 %v2157_v13, 16 }
  0x99   : > { %v1253_v41 = vsel %vm2497_vm4, %v1248_v31, %v1252_v32  ;;  %v1267_v42 = vsel %vm2497_vm4, %v1262_v33, %v1266_v34  ;;  %v1688_v29 = vrot.slane %v1686_v21, 5  ;;  %v1698_v30 = vrot.slane %v1697_v22, 4 }
  0x9a   : > { %v1310_v55 = vunpack.c.l.b16 %v1253_v41  ;;  %v1311_v56 = vunpack.c.l.b16 %v1267_v42  ;;  %v1702_v31 = vrot.slane %v1700_v23, 5  ;;  %v2189_v41 = vld [vmem:[%s2462_s18 + $0x84] sm:$0xf0] }
  0x9b   : > { %v2137_v47 = vor.u32 %v2189_v41, %v2136_v40 }
  0x9c   : > { %v1316_v9 = vpack.c.b16 %v1311_v56, %v1310_v55  ;;  %v1703_v35 = vsel %vm2497_vm4, %v1698_v30, %v1702_v31 }
  0x9d   : > { %v1721_v43 = vunpack.c.l.b16 %v1703_v35 }
  0xa6   : > { %2081 = vmatmul.msk.bf16.gmra.mxu1 %vm596_vm1, %v1315_v17  ;;  %2110 = vmatmul.msk.bf16.gmra.mxu2 %vm596_vm1, %v2100_v24  ;;  %v1292_v17 = vshll.u32 %v2078_v4, 16  ;;  %v1276_v24 = vrot.slane %v1275_v14, 4 }
  0xa7   : > { %2139 = vmatmul.msk.bf16.gmra.mxu3 %vm596_vm1, %v2129_v25  ;;  %2160 = vmatmul.msk.bf16.gmra.mxu0 %vm596_vm1, %v1723_v28  ;;  %v1280_v25 = vrot.slane %v1278_v15, 5  ;;  %v1684_v28 = vrot.slane %v1683_v20, 4 }
  0xa8   : > { %v1294_v27 = vrot.slane %v1292_v17, 5 }
  0xa9   : > { %v1281_v32 = vsel %vm2497_vm4, %v1276_v24, %v1280_v25  ;;  %v1689_v34 = vsel %vm2497_vm4, %v1684_v28, %v1688_v29 }
  0xaa   : > { %v1295_v33 = vsel %vm2497_vm4, %v1290_v26, %v1294_v27  ;;  %v1312_v36 = vunpack.c.l.b16 %v1281_v32  ;;  %v1720_v42 = vunpack.c.l.b16 %v1689_v34 }
  0xab   : > { %v1313_v37 = vunpack.c.l.b16 %v1295_v33 }
  0xac   : > { %v1725_v48 = vpack.c.b16 %v1721_v43, %v1720_v42 }
  0xad   : > { %v1317_v44 = vpack.c.b16 %v1313_v37, %v1312_v36 }
  0xb6   : > { %2082 = vmatmul.msk.bf16.gmra.mxu1 %vm596_vm1, %v1316_v9  ;;  %2111 = vmatmul.msk.bf16.gmra.mxu2 %vm596_vm1, %v2104_v10 }
  0xb7   : > { %2140 = vmatmul.msk.bf16.gmra.mxu3 %vm596_vm1, %v2133_v11  ;;  %2161 = vmatmul.msk.bf16.gmra.mxu0 %vm596_vm1, %v1724_v19 }
  0xc3   : > { %v627_v45 = vpop.f32.mrf.mxu1 }
  0xc4   : > { %v622_v49 = vpop.f32.mrf.mxu0 }
  0xc6   : > { %2083 = vmatmul.msk.bf16.gmra.mxu1 %vm596_vm1, %v1317_v44  ;;  %2112 = vmatmul.msk.bf16.gmra.mxu2 %vm596_vm1, %v2108_v46 }
  0xc7   : > { %2141 = vmatmul.msk.bf16.gmra.mxu3 %vm596_vm1, %v2137_v47  ;;  %2162 = vmatmul.msk.bf16.gmra.mxu0 %vm596_vm1, %v1725_v48 }
  0xc9   : > { %v632_v18 = vpop.f32.mrf.mxu2 }
  0xca   : > { %v637_v50 = vpop.f32.mrf.mxu3 }
  0xcb   : > { %v2666_v51 = vpop.f32.mrf.mxu1 }
  0xcc   : > { %v624_v52 = vpop.f32.mrf.mxu0 }
  0xd1   : > { %v2668_v53 = vpop.f32.mrf.mxu2 }
  0xd2   : > { %v2670_v54 = vpop.f32.mrf.mxu3 }
  0xd3   : > { %v721_v55 = vpop.f32.mrf.mxu1 }
  0xd4   : > { %v741_v56 = vadd.f32 %v721_v55, %v622_v49  ;;  %v1132_v57 = vpop.f32.mrf.mxu0 }
  0xd9   : > { %v934_v58 = vpop.f32.mrf.mxu2 }
  0xda   : > { %v1033_v59 = vpop.f32.mrf.mxu3  ;;  %v954_v60 = vadd.f32 %v934_v58, %v741_v56 }
  0xdb   : > { %v723_v61 = vpop.f32.mrf.mxu1 }
  0xdc   : > { %v1053_v62 = vadd.f32 %v1033_v59, %v954_v60  ;;  %v1134_v63 = vpop.f32.mrf.mxu0  ;;  %v742_v41 = vadd.f32 %v723_v61, %v624_v52  ;;  %v2698_v52 = vld [vmem:[%s2749_s2] ss:$0 sm:$0xff] }
  0xde   : > { %v1152_v0 = vadd.f32 %v1132_v57, %v1053_v62 }
  0xe1   : > { %v936_v1 = vpop.f32.mrf.mxu2 }
  0xe2   : > { %v1035_v2 = vpop.f32.mrf.mxu3  ;;  %v955_v43 = vadd.f32 %v936_v1, %v742_v41 }
  0xe3   : > { %v726_v3 = vpop.f32.mrf.mxu1 }
  0xe4   : > { %v743_v4 = vadd.f32 %v726_v3, %v627_v45  ;;  %v1137_v5 = vpop.f32.mrf.mxu0  ;;  %v1054_v47 = vadd.f32 %v1035_v2, %v955_v43 }
  0xe6   : > { %v1153_v55 = vadd.f32 %v1134_v63, %v1054_v47 }
  0xe9   : > { %v939_v6 = vpop.f32.mrf.mxu2 }
  0xea   : > { %v1038_v7 = vpop.f32.mrf.mxu3  ;;  %v956_v8 = vadd.f32 %v939_v6, %v743_v4 }
  0xeb   : > { %v728_v9 = vpop.f32.mrf.mxu1 }
  0xec   : > { %v1055_v10 = vadd.f32 %v1038_v7, %v956_v8  ;;  %v2672_v11 = vpop.f32.mrf.mxu0  ;;  %v744_v62 = vadd.f32 %v728_v9, %v2666_v51 }
  0xee   : > { %v1154_v12 = vadd.f32 %v1137_v5, %v1055_v10 }
  0xf1   : > { %v941_v13 = vpop.f32.mrf.mxu2 }
  0xf2   : > { %v1040_v14 = vpop.f32.mrf.mxu3  ;;  %v957_v2 = vadd.f32 %v941_v13, %v744_v62 }
  0xf3   : > { %v731_v15 = vpop.f32.mrf.mxu1 }
  0xf4   : > { %v745_v16 = vadd.f32 %v731_v15, %v632_v18  ;;  %v1142_v17 = vpop.f32.mrf.mxu0  ;;  %v1056_v8 = vadd.f32 %v1040_v14, %v957_v2 }
  0xf9   : > { %v944_v19 = vpop.f32.mrf.mxu2 }
  0xfa   : > { %v1043_v20 = vpop.f32.mrf.mxu3  ;;  %v958_v21 = vadd.f32 %v944_v19, %v745_v16  ;;  %v1155_v19 = vadd.f32 %v2672_v11, %v1056_v8 }
  0xfb   : > { %v2674_v22 = vpop.f32.mrf.mxu1 }
  0xfc   : > { %v1057_v23 = vadd.f32 %v1043_v20, %v958_v21  ;;  %v2676_v24 = vpop.f32.mrf.mxu0 }
  0xfe   : > { %v2678_v25 = vadd.f32 %v1142_v17, %v1057_v23 }
 0x101   : > { %v2680_v26 = vpop.f32.mrf.mxu2 }
 0x102   : > { %v2682_v27 = vpop.f32.mrf.mxu3 }
 0x103   : > { %v736_v28 = vpop.f32.mrf.mxu1 }
 0x104   : > { %v747_v29 = vadd.f32 %v736_v28, %v637_v50  ;;  %v1147_v30 = vpop.f32.mrf.mxu0 }
 0x109   : > { %v949_v31 = vpop.f32.mrf.mxu2 }
 0x10a   : > { %v1048_v32 = vpop.f32.mrf.mxu3  ;;  %v960_v33 = vadd.f32 %v949_v31, %v747_v29  ;;  %v746_v29 = vadd.f32 %v2674_v22, %v2668_v53 }
 0x10b   : > { %v2684_v34 = vpop.f32.mrf.mxu1 }
 0x10c   : > { %v1059_v35 = vadd.f32 %v1048_v32, %v960_v33  ;;  %v2686_v36 = vpop.f32.mrf.mxu0  ;;  %v959_v31 = vadd.f32 %v2680_v26, %v746_v29 }
 0x10e   : > { %v2688_v37 = vadd.f32 %v1147_v30, %v1059_v35  ;;  %v1058_v43 = vadd.f32 %v2682_v27, %v959_v31 }
 0x110   : > { %v1157_v26 = vadd.f32 %v2676_v24, %v1058_v43 }
 0x111   : > { %v2690_v38 = vpop.f32.mrf.mxu2 }
 0x112   : > { %v2692_v39 = vpop.f32.mrf.mxu3 }
 0x113   : > { %v1342_v40 = vpop.f32.mrf.mxu1 }
 0x114   : > { %v1750_v42 = vpop.f32.mrf.mxu0  ;;  %v1362_v44 = vadd.f32 %v1342_v40, %v1152_v0 }
 0x119   : > { %v1441_v45 = vpop.f32.mrf.mxu2 }
 0x11a   : > { %v1540_v46 = vpop.f32.mrf.mxu3  ;;  %v1461_v48 = vadd.f32 %v1441_v45, %v1362_v44 }
 0x11b   : > { %v1344_v49 = vpop.f32.mrf.mxu1 }
 0x11c   : > { %v1752_v18 = vpop.f32.mrf.mxu0  ;;  %v1560_v50 = vadd.f32 %v1540_v46, %v1461_v48  ;;  %v1363_v56 = vadd.f32 %v1344_v49, %v1153_v55 }
 0x11e   : > { %v1770_v59 = vadd.f32 %v1750_v42, %v1560_v50 }
 0x120   : > { %v1798_v63 = vadd.f32 %v2698_v52, %v1770_v59 }
 0x121   : > { %v1443_v57 = vpop.f32.mrf.mxu2 }
 0x122   : > { %v1542_v58 = vpop.f32.mrf.mxu3  ;;  %v1462_v60 = vadd.f32 %v1443_v57, %v1363_v56  ;;  %v1806_v10 = vmax.f32 %v1798_v63, 0.0  ;;  %v748_v57 = vadd.f32 %v2684_v34, %v2670_v54 }
 0x123   : > { %v1347_v61 = vpop.f32.mrf.mxu1 }
 0x124   : > { %v1561_v0 = vadd.f32 %v1542_v58, %v1462_v60  ;;  %v1755_v1 = vpop.f32.mrf.mxu0  ;;  %v1364_v5 = vadd.f32 %v1347_v61, %v1154_v12  ;;  %v961_v58 = vadd.f32 %v2690_v38, %v748_v57 }
 0x126   : > { %v1771_v3 = vadd.f32 %v1752_v18, %v1561_v0 }
 0x128   : > { %v1799_v4 = vadd.f32 %v2698_v52, %v1771_v3 }
 0x129   : > { %v1446_v6 = vpop.f32.mrf.mxu2 }
 0x12a   : > { %v1545_v7 = vpop.f32.mrf.mxu3  ;;  %v1807_v15 = vmax.f32 %v1799_v4, 0.0  ;;  %v1463_v16 = vadd.f32 %v1446_v6, %v1364_v5 }
 0x12b   : > { %v1349_v17 = vpop.f32.mrf.mxu1 }
 0x12c   : > { %v2193_v51 = vpack.c.bf16 %v1807_v15, %v1806_v10  ;;  %v1757_v9 = vpop.f32.mrf.mxu0  ;;  %v1562_v13 = vadd.f32 %v1545_v7, %v1463_v16  ;;  %v1365_v12 = vadd.f32 %v1349_v17, %v1155_v19 }
 0x12e   : > { %2194 = vst [vmem:[%s2707_s6] sm:$0xff] %v2193_v51   ;;  %v1772_v14 = vadd.f32 %v1755_v1, %v1562_v13  ;;  %v1060_v1 = vadd.f32 %v2692_v39, %v961_v58 }
 0x130   : > { %v1800_v32 = vadd.f32 %v2698_v52, %v1772_v14  ;;  %v1159_v5 = vadd.f32 %v2686_v36, %v1060_v1 }
 0x131   : > { %v1448_v20 = vpop.f32.mrf.mxu2 }
 0x132   : > { %v1547_v21 = vpop.f32.mrf.mxu3  ;;  %v1464_v23 = vadd.f32 %v1448_v20, %v1365_v12  ;;  %v1808_v44 = vmax.f32 %v1800_v32, 0.0 }
 0x133   : > { %v1352_v28 = vpop.f32.mrf.mxu1 }
 0x134   : > { %v1563_v30 = vadd.f32 %v1547_v21, %v1464_v23  ;;  %v1760_v35 = vpop.f32.mrf.mxu0  ;;  %v1366_v11 = vadd.f32 %v1352_v28, %v2678_v25 }
 0x136   : > { %v1773_v33 = vadd.f32 %v1757_v9, %v1563_v30 }
 0x138   : > { %v1801_v40 = vadd.f32 %v2698_v52, %v1773_v33 }
 0x139   : > { %v1451_v41 = vpop.f32.mrf.mxu2 }
 0x13a   : > { %v1550_v42 = vpop.f32.mrf.mxu3  ;;  %v1809_v45 = vmax.f32 %v1801_v40, 0.0  ;;  %v1465_v46 = vadd.f32 %v1451_v41, %v1366_v11 }
 0x13b   : > { %v1354_v53 = vpop.f32.mrf.mxu1 }
 0x13c   : > { %v2198_v22 = vpack.c.bf16 %v1809_v45, %v1808_v44  ;;  %v1564_v47 = vadd.f32 %v1550_v42, %v1465_v46  ;;  %v1367_v48 = vadd.f32 %v1354_v53, %v1157_v26  ;;  %v1762_v49 = vpop.f32.mrf.mxu0 }
 0x13e   : > { %2210 = vst [vmem:[%s2707_s6 + $0x8] sm:$0xff] %v2198_v22   ;;  %v1774_v55 = vadd.f32 %v1760_v35, %v1564_v47 }
 0x140   : > { %v1802_v59 = vadd.f32 %v2698_v52, %v1774_v55 }
 0x141   : > { %v1453_v18 = vpop.f32.mrf.mxu2 }
 0x142   : > { %v1552_v50 = vpop.f32.mrf.mxu3  ;;  %v1466_v56 = vadd.f32 %v1453_v18, %v1367_v48  ;;  %v1810_v2 = vmax.f32 %v1802_v59, 0.0 }
 0x143   : > { %v1357_v25 = vpop.f32.mrf.mxu1 }
 0x144   : > { %v1565_v27 = vadd.f32 %v1552_v50, %v1466_v56  ;;  %v1368_v24 = vadd.f32 %v1357_v25, %v2688_v37  ;;  %v1765_v4 = vpop.f32.mrf.mxu0 }
 0x146   : > { %v1775_v60 = vadd.f32 %v1762_v49, %v1565_v27 }
 0x148   : > { %v1803_v61 = vadd.f32 %v2698_v52, %v1775_v60 }
 0x149   : > { %v1456_v62 = vpop.f32.mrf.mxu2 }
 0x14a   : > { %v1555_v0 = vpop.f32.mrf.mxu3  ;;  %v1811_v63 = vmax.f32 %v1803_v61, 0.0  ;;  %v1467_v3 = vadd.f32 %v1456_v62, %v1368_v24 }
 0x14b   : > { %v1359_v34 = vpop.f32.mrf.mxu1 }
 0x14c   : > { %v2203_v54 = vpack.c.bf16 %v1811_v63, %v1810_v2  ;;  %v1566_v38 = vadd.f32 %v1555_v0, %v1467_v3  ;;  %v1369_v6 = vadd.f32 %v1359_v34, %v1159_v5  ;;  %v1767_v16 = vpop.f32.mrf.mxu0 }
 0x14e   : > { %2211 = vst [vmem:[%s2707_s6 + $0x10] sm:$0xff] %v2203_v54   ;;  %v1776_v8 = vadd.f32 %v1765_v4, %v1566_v38 }
 0x150   : > { %v1804_v39 = vadd.f32 %v2698_v52, %v1776_v8 }
 0x151   : > { %v1458_v7 = vpop.f32.mrf.mxu2 }
 0x152   : > { %v1468_v10 = vadd.f32 %v1458_v7, %v1369_v6  ;;  %v1557_v37 = vpop.f32.mrf.mxu3  ;;  %v1812_v9 = vmax.f32 %v1804_v39, 0.0 }
 0x154   : > { %v1567_v15 = vadd.f32 %v1557_v37, %v1468_v10 }
 0x156   : > { %v1777_v17 = vadd.f32 %v1767_v16, %v1567_v15 }
 0x158   : > { %v1805_v51 = vadd.f32 %v2698_v52, %v1777_v17 }
 0x15a   : > { %v1813_v13 = vmax.f32 %v1805_v51, 0.0 }
 0x15c   : > { %v2208_v19 = vpack.c.bf16 %v1813_v13, %v1812_v9 }
 0x15e   : > { %2212 = vst [vmem:[%s2707_s6 + $0x18] sm:$0xff] %v2208_v19  }
 0x15f PF: > { %s13_s16 = sadd.s32 1, %s2298_s16   ;;  %s2753_s12 = smov %s2286_s13 }
 0x160   : > { %p10_p10 = scmp.ge.s32.totalorder %s13_s16, 4   ;;  %s2754_s13 = smov %s2355_s20 }
 0x161   : > { %s2755_s14 = smov %s2294_s15  ;;  %s2756_s15 = smov %s2758_s17 }
 0x162   :  { %12 = sbr.rel (!%p10_p10) target bundleno = 3 (0x3), region = 127 }

// kernel: basic_block_forward.3
= control target key start
LH: loop header
LB: loop body
LE: loop exit
PB: predicated region body
PF: predicated region fallthrough
CT: control target
= control target key end

     0   :  { %s3271_s21 = smov 0   ;;  %s3273_s22 = smov 0   ;;  %s3879_s0 = inlined_call_operand.vmem [shape: bf16[1,2,10,10,128], index: 0, kind: input, shape index: {}]   ;;  %s3880_s1 = inlined_call_operand.vmem [shape: bf16[9,128,128], index: 1, kind: input, shape index: {}]   ;;  %s3881_s2 = inlined_call_operand.vmem [shape: f32[1,128], index: 2, kind: input, shape index: {}]   ;;  %s3882_s3 = inlined_call_operand.vmem [shape: bf16[2,64,4], index: 3, kind: input, shape index: {}]   ;;  %s3883_s4 = inlined_call_operand.vmem [shape: bf16[4,128], index: 4, kind: input, shape index: {}]   ;;  %s3884_s5 = inlined_call_operand.vmem [shape: f32[1,128], index: 5, kind: input, shape index: {}]   ;;  %s3885_s6 = inlined_call_operand.vmem [shape: f32[2,64,128], index: 6, kind: output, shape index: {}]  }
   0x1   :  { %s3275_s23 = smov 0  }
   0x2 LB: > { %s25_s24 = sadd.s32 1, %s3230_s22  ;;  %p2483_p0 = scmp.ge.s32.totalorder %s3234_s23, 1  ;;  %s3234_s23 = sphi %s3275_s23, %s16_s23   ;;  %s3230_s22 = sphi %s3273_s22, %s3891_s22   ;;  %s3226_s21 = sphi %s3271_s21, %s3890_s21  }
   0x3   : > { %p26_p1 = scmp.ge.s32.totalorder %s25_s24, 2  ;;  %p270_p2 = scmp.lt.s32.totalorder %s3234_s23, 3 }
   0x5   : > { %s3893_s24 = smov (%p26_p1, %s25_s24), 0  ;;  %p271_p3 = pnand %p2483_p0, %p270_p2 }
   0x6   : > { %p322_p4 = scmp.lt.s32.totalorder (!%p271_p3), %s3226_s21, 1 }
   0x7   : > { %274 = sbr.rel (%p271_p3) target bundleno = 343 (0x157), region = 44 }
   0xc   : > { %v3092_v0 = vld [vmem:[%s3880_s1 + $0x38] sm:$0xff]  ;;  %v3091_v2 = vld [vmem:[%s3880_s1 + $0x30] sm:$0xff]  ;;  %s3895_s21 = smov (!%p322_p4, %s3226_s21), 1  ;;  %v3090_v4 = vld [vmem:[%s3880_s1 + $0x28] sm:$0xff]  ;;  %vm528_vm0 = vsmask.f32 3328 }
   0xd   : > { %v3100_v1 = vld [vmem:[%s3880_s1 + $0x78] sm:$0xff]  ;;  %3169 = vmatpush.bf16.msra.mxu2 %v3092_v0  ;;  %v3099_v3 = vld [vmem:[%s3880_s1 + $0x70] sm:$0xff]  ;;  %467 = vmatpush.bf16.msra.mxu0 %v3092_v0  ;;  %s3185_s9 = smul.u32 80, %s3895_s21  ;;  %v3098_v5 = vld [vmem:[%s3880_s1 + $0x68] sm:$0xff]  ;;  %vm529_vm1 = vsmask.f32 7440 }
   0xe   : > { %3177 = vmatpush.bf16.msra.mxu3 %v3100_v1  ;;  %732 = vmatpush.bf16.msra.mxu1 %v3100_v1  ;;  %v3089_v8 = vld [vmem:[%s3880_s1 + $0x20] sm:$0xff]  ;;  %v3088_v29 = vld [vmem:[%s3880_s1 + $0x18] sm:$0xff]  ;;  %v3087_v40 = vld [vmem:[%s3880_s1 + $0x10] sm:$0xff]  ;;  %vm809_vm3 = vcmask 1042432   ;;  %vm810_vm4 = vcmask 1046532   ;;  %vm2262_vm6 = vcmask 1041408  }
   0xf   : > { %s3313_s16 = scalar_lea.vmem %s3879_s0, %s3185_s9  ;;  %v3097_v13 = vld [vmem:[%s3880_s1 + $0x60] sm:$0xff]  ;;  %v3096_v30 = vld [vmem:[%s3880_s1 + $0x58] sm:$0xff]  ;;  %v3095_v44 = vld [vmem:[%s3880_s1 + $0x50] sm:$0xff]  ;;  %s3079_s18 = sshll.u32 %s3895_s21, 5  ;;  %vm2249_vm7 = vcmask 31744  }
  0x10   : > { %v520_v6 = vld [vmem:[%s3313_s16 + $0x20] sm:$0xf]  ;;  %v522_v7 = vld [vmem:[%s3313_s16 + $0x28] sm:$0xf]  ;;  %v521_v9 = vld [vmem:[%s3313_s16 + $0x24] sm:$0x1]  ;;  %s3696_s25 = scalar_lea.vmem %s3882_s3, %s3079_s18 }
  0x11   : > { %3170 = vmatpush.bf16.msra.mxu2 %v3091_v2  ;;  %468 = vmatpush.bf16.msra.mxu0 %v3091_v2  ;;  %v588_v10 = vshrl.u32 %v520_v6, 16  ;;  %v591_v11 = vshll.u32 %v520_v6, 16  ;;  %v602_v12 = vshrl.u32 %v522_v7, 16  ;;  %v523_v14 = vld [vmem:[%s3313_s16 + $0x2c] sm:$0x1]  ;;  %v605_v15 = vshll.u32 %v522_v7, 16  ;;  %vm3342_vm2 = vmor %vm528_vm0, %vm529_vm1 }
  0x12   : > { %3178 = vmatpush.bf16.msra.mxu3 %v3099_v3  ;;  %733 = vmatpush.bf16.msra.mxu1 %v3099_v3  ;;  %v512_v16 = vld [vmem:[%s3313_s16] sm:$0xf]  ;;  %v513_v20 = vld [vmem:[%s3313_s16 + $0x4] sm:$0x1]  ;;  %v597_v21 = vshll.u32 %v521_v9, 16  ;;  %v611_v26 = vshll.u32 %v523_v14, 16  ;;  %vm3470_vm5 = vmor %vm809_vm3, %vm810_vm4 }
  0x13   : > { %v590_v17 = vrot.slane %v588_v10, 4  ;;  %v593_v18 = vrot.slane %v591_v11, 5  ;;  %v604_v19 = vrot.slane %v602_v12, 4  ;;  %v607_v22 = vrot.slane %v605_v15, 5  ;;  %v514_v23 = vld [vmem:[%s3313_s16 + $0x8] sm:$0xf] }
  0x14   : > { %v515_v24 = vld [vmem:[%s3313_s16 + $0xc] sm:$0x1]  ;;  %v532_v27 = vshrl.u32 %v512_v16, 16  ;;  %v535_v28 = vshll.u32 %v512_v16, 16  ;;  %v541_v32 = vshll.u32 %v513_v20, 16  ;;  %v546_v33 = vshrl.u32 %v514_v23, 16 }
  0x15   : > { %3171 = vmatpush.bf16.msra.mxu2 %v3090_v4  ;;  %469 = vmatpush.bf16.msra.mxu0 %v3090_v4  ;;  %v594_v25 = vor.u32 %v593_v18, %v590_v17  ;;  %v608_v31 = vor.u32 %v607_v22, %v604_v19  ;;  %v549_v34 = vshll.u32 %v514_v23, 16  ;;  %v555_v37 = vshll.u32 %v515_v24, 16  ;;  %v524_v50 = vld [vmem:[%s3313_s16 + $0x30] sm:$0xf]  ;;  %v526_v53 = vld [vmem:[%s3313_s16 + $0x38] sm:$0xf] }
  0x16   : > { %3179 = vmatpush.bf16.msra.mxu3 %v3098_v5  ;;  %734 = vmatpush.bf16.msra.mxu1 %v3098_v5  ;;  %v534_v35 = vrot.slane %v532_v27, 4  ;;  %v537_v36 = vrot.slane %v535_v28, 5  ;;  %v548_v38 = vrot.slane %v546_v33, 4  ;;  %v599_v42 = vrot.slane %v597_v21, 5  ;;  %v3086_v58 = vld [vmem:[%s3880_s1 + $0x8] sm:$0xff]  ;;  %v3085_v3 = vld [vmem:[%s3880_s1] sm:$0xff] }
  0x17   : > { %v551_v39 = vrot.slane %v549_v34, 5  ;;  %v595_v41 = vrot.slane %v594_v25, 4  ;;  %v609_v46 = vrot.slane %v608_v31, 4  ;;  %v613_v47 = vrot.slane %v611_v26, 5  ;;  %v3094_v59 = vld [vmem:[%s3880_s1 + $0x48] sm:$0xff]  ;;  %v3093_v15 = vld [vmem:[%s3880_s1 + $0x40] sm:$0xff] }
  0x18   : > { %v538_v43 = vor.u32 %v537_v36, %v534_v35  ;;  %v543_v48 = vrot.slane %v541_v32, 5  ;;  %v557_v52 = vrot.slane %v555_v37, 5  ;;  %v616_v56 = vshrl.u32 %v524_v50, 16  ;;  %v516_v0 = vld [vmem:[%s3313_s16 + $0x10] sm:$0xf]  ;;  %v3108_v21 = vld [vmem:[%s3880_s1 + $0xb8] sm:$0xff] }
  0x19   : > { %3172 = vmatpush.bf16.msra.mxu2 %v3089_v8  ;;  %470 = vmatpush.bf16.msra.mxu0 %v3089_v8  ;;  %v552_v49 = vor.u32 %v551_v39, %v548_v38  ;;  %v600_v55 = vsel %vm3342_vm2, %v595_v41, %v599_v42  ;;  %v619_v57 = vshll.u32 %v524_v50, 16  ;;  %v614_v60 = vsel %vm3342_vm2, %v609_v46, %v613_v47  ;;  %v518_v2 = vld [vmem:[%s3313_s16 + $0x18] sm:$0xf]  ;;  %v2499_v4 = vld [vmem:[%s3313_s16 + $0x20] sm:$0xf]  ;;  %v3107_v46 = vld [vmem:[%s3880_s1 + $0xb0] sm:$0xff] }
  0x1a   : > { %3180 = vmatpush.bf16.msra.mxu3 %v3097_v13  ;;  %735 = vmatpush.bf16.msra.mxu1 %v3097_v13  ;;  %v539_v51 = vrot.slane %v538_v43, 4  ;;  %v630_v62 = vshrl.u32 %v526_v53, 16  ;;  %v633_v63 = vshll.u32 %v526_v53, 16  ;;  %v3083_v5 = vld [vmem:[%s3313_s16 + $0x24] sm:$0xf0]  ;;  %v672_v6 = vunpack.c.l.b16 %v600_v55  ;;  %v3120_v27 = vld [vmem:[%s3880_s1 + $0xf8] sm:$0xff] }
  0x1b   : > { %v553_v54 = vrot.slane %v552_v49, 4  ;;  %v560_v7 = vshrl.u32 %v516_v0, 16  ;;  %v563_v8 = vshll.u32 %v516_v0, 16  ;;  %v673_v9 = vunpack.c.l.b16 %v614_v60  ;;  %v2491_v10 = vld [vmem:[%s3313_s16] sm:$0xf]  ;;  %v3128_v39 = vld [vmem:[%s3880_s1 + $0x138] sm:$0xff] }
  0x1c   : > { %v544_v61 = vsel %vm3342_vm2, %v539_v51, %v543_v48  ;;  %v3081_v11 = vld [vmem:[%s3313_s16 + $0x4] sm:$0xf0]  ;;  %v618_v13 = vrot.slane %v616_v56, 4  ;;  %v621_v14 = vrot.slane %v619_v57, 5  ;;  %v525_v17 = vld [vmem:[%s3313_s16 + $0x34] sm:$0x1]  ;;  %v2500_v26 = vor.u32 %v3083_v5, %v2499_v4 }
  0x1d   : > { %3173 = vmatpush.bf16.msra.mxu2 %v3088_v29  ;;  %471 = vmatpush.bf16.msra.mxu0 %v3088_v29  ;;  %v558_v1 = vsel %vm3342_vm2, %v553_v54, %v557_v52  ;;  %v668_v12 = vunpack.c.l.b16 %v544_v61  ;;  %v632_v18 = vrot.slane %v630_v62, 4  ;;  %v635_v19 = vrot.slane %v633_v63, 5  ;;  %v527_v22 = vld [vmem:[%s3313_s16 + $0x3c] sm:$0x1]  ;;  %v517_v28 = vld [vmem:[%s3313_s16 + $0x14] sm:$0x1] }
  0x1e   : > { %3181 = vmatpush.bf16.msra.mxu3 %v3096_v30  ;;  %736 = vmatpush.bf16.msra.mxu1 %v3096_v30  ;;  %v669_v16 = vunpack.c.l.b16 %v558_v1  ;;  %v574_v20 = vshrl.u32 %v518_v2, 16  ;;  %v562_v23 = vrot.slane %v560_v7, 4  ;;  %v565_v24 = vrot.slane %v563_v8, 5  ;;  %v519_v29 = vld [vmem:[%s3313_s16 + $0x1c] sm:$0x1]  ;;  %v3119_v47 = vld [vmem:[%s3880_s1 + $0xf0] sm:$0xff] }
  0x1f   : > { %v577_v25 = vshll.u32 %v518_v2, 16  ;;  %v678_v31 = vpack.c.b16 %v673_v9, %v672_v6  ;;  %v2492_v32 = vor.u32 %v3081_v11, %v2491_v10  ;;  %v625_v33 = vshll.u32 %v525_v17, 16  ;;  %v3127_v48 = vld [vmem:[%s3880_s1 + $0x130] sm:$0xff]  ;;  %v3118_v60 = vld [vmem:[%s3880_s1 + $0xe8] sm:$0xff]  ;;  %v3105_v8 = vld [vmem:[%s3880_s1 + $0xa0] sm:$0xff]  ;;  %s3080_s29 = sshll.u32 %s3895_s21, 6 }
  0x20   : > { %v576_v30 = vrot.slane %v574_v20, 4  ;;  %v676_v35 = vpack.c.b16 %v669_v16, %v668_v12  ;;  %v622_v36 = vor.u32 %v621_v14, %v618_v13  ;;  %v636_v37 = vor.u32 %v635_v19, %v632_v18  ;;  %v3135_v49 = vld [vmem:[%s3880_s1 + $0x170] sm:$0xff]  ;;  %v3126_v2 = vld [vmem:[%s3880_s1 + $0x128] sm:$0xff]  ;;  %v3117_v9 = vld [vmem:[%s3880_s1 + $0xe0] sm:$0xff]  ;;  %s3825_s8 = scalar_lea.vmem %s3885_s6, %s3080_s29 }
  0x21   : > { %3174 = vmatpush.bf16.msra.mxu2 %v3087_v40  ;;  %472 = vmatpush.bf16.msra.mxu0 %v3087_v40  ;;  %v579_v34 = vrot.slane %v577_v25, 5  ;;  %v639_v38 = vshll.u32 %v527_v22, 16  ;;  %v3136_v40 = vld [vmem:[%s3880_s1 + $0x178] sm:$0xff]  ;;  %v566_v41 = vor.u32 %v565_v24, %v562_v23  ;;  %v569_v42 = vshll.u32 %v517_v28, 16  ;;  %v2715_v61 = vld [vmem:[%s3313_s16 + $0x10] sm:$0xf] }
  0x22   : > { %3182 = vmatpush.bf16.msra.mxu3 %v3095_v44  ;;  %737 = vmatpush.bf16.msra.mxu1 %v3095_v44  ;;  %v583_v44 = vshll.u32 %v519_v29, 16  ;;  %v623_v50 = vrot.slane %v622_v36, 4  ;;  %v627_v51 = vrot.slane %v625_v33, 5  ;;  %v637_v52 = vrot.slane %v636_v37, 4  ;;  %v3125_v10 = vld [vmem:[%s3880_s1 + $0x120] sm:$0xff]  ;;  %v3104_v16 = vld [vmem:[%s3880_s1 + $0x98] sm:$0xff] }
  0x23   : > { %v580_v43 = vor.u32 %v579_v34, %v576_v30  ;;  %v641_v53 = vrot.slane %v639_v38, 5  ;;  %v567_v54 = vrot.slane %v566_v41, 4  ;;  %v571_v55 = vrot.slane %v569_v42, 5  ;;  %v2503_v11 = vld [vmem:[%s3313_s16 + $0x30] sm:$0xf]  ;;  %v3116_v23 = vld [vmem:[%s3880_s1 + $0xd8] sm:$0xff] }
  0x24   : > { %v585_v57 = vrot.slane %v583_v44, 5  ;;  %v628_v62 = vsel %vm3342_vm2, %v623_v50, %v627_v51  ;;  %v1160_v6 = vshrl.u32 %v2715_v61, 16  ;;  %v1163_v7 = vshll.u32 %v2715_v61, 16  ;;  %v3084_v12 = vld [vmem:[%s3313_s16 + $0x34] sm:$0xf0]  ;;  %v3133_v24 = vld [vmem:[%s3880_s1 + $0x160] sm:$0xff] }
  0x25   : > { %3175 = vmatpush.bf16.msra.mxu2 %v3086_v58  ;;  %473 = vmatpush.bf16.msra.mxu0 %v3086_v58  ;;  %v581_v56 = vrot.slane %v580_v43, 4  ;;  %v2713_v58 = vld [vmem:[%s3313_s16 + $0x8] sm:$0xf]  ;;  %v642_v63 = vsel %vm3342_vm2, %v637_v52, %v641_v53  ;;  %v572_v4 = vsel %vm3342_vm2, %v567_v54, %v571_v55  ;;  %v674_v13 = vunpack.c.l.b16 %v628_v62  ;;  %v3082_v17 = vld [vmem:[%s3313_s16 + $0x14] sm:$0xf0]  ;;  %v3131_v61 = vld [vmem:[%s3880_s1 + $0x150] sm:$0xff] }
  0x26   : > { %3183 = vmatpush.bf16.msra.mxu3 %v3094_v59  ;;  %738 = vmatpush.bf16.msra.mxu1 %v3094_v59  ;;  %v3106_v59 = vld [vmem:[%s3880_s1 + $0xa8] sm:$0xff]  ;;  %v1146_v0 = vshrl.u32 %v2713_v58, 16  ;;  %v1149_v1 = vshll.u32 %v2713_v58, 16  ;;  %v675_v14 = vunpack.c.l.b16 %v642_v63  ;;  %v670_v18 = vunpack.c.l.b16 %v572_v4  ;;  %v777_v25 = vld [vmem:[%s3313_s16] sm:$0xe] }
  0x27   : > { %v586_v5 = vsel %vm3342_vm2, %v581_v56, %v585_v57  ;;  %v2714_v20 = vld [vmem:[%s3313_s16 + $0xc] sm:$0x1]  ;;  %v2716_v28 = vld [vmem:[%s3313_s16 + $0x14] sm:$0x1]  ;;  %v2504_v29 = vor.u32 %v3084_v12, %v2503_v11  ;;  %v778_v33 = vld [vmem:[%s3313_s16 + $0x4] sm:$0x1] }
  0x28   : > { %v671_v19 = vunpack.c.l.b16 %v586_v5  ;;  %v1151_v22 = vrot.slane %v1149_v1, 5  ;;  %v679_v30 = vpack.c.b16 %v675_v14, %v674_v13  ;;  %v779_v34 = vld [vmem:[%s3313_s16 + $0x8] sm:$0xe]  ;;  %v780_v38 = vld [vmem:[%s3313_s16 + $0xc] sm:$0x1]  ;;  %v1169_v43 = vshll.u32 %v2716_v28, 16 }
  0x29   : > { %3176 = vmatpush.bf16.msra.mxu2 %v3085_v3  ;;  %474 = vmatpush.bf16.msra.mxu0 %v3085_v3  ;;  %v3134_v3 = vld [vmem:[%s3880_s1 + $0x168] sm:$0xff]  ;;  %v2779_v44 = vld [vmem:[%s3313_s16 + $0x10] sm:$0xe]  ;;  %v814_v50 = vrot.slane %v778_v33, 5  ;;  %v2586_v51 = vrot.slane %v779_v34, 9  ;;  %v818_v52 = vrot.slane %v780_v38, 5 }
  0x2a   : > { %3184 = vmatpush.bf16.msra.mxu3 %v3093_v15  ;;  %739 = vmatpush.bf16.msra.mxu1 %v3093_v15  ;;  %v2495_v15 = vld [vmem:[%s3313_s16 + $0x10] sm:$0xf]  ;;  %v677_v37 = vpack.c.b16 %v671_v19, %v670_v18  ;;  %v2778_v41 = vld [vmem:[%s3313_s16 + $0xc] sm:$0x1]  ;;  %v2794_v58 = vrot.slane %v2779_v44, 9  ;;  %v1171_v63 = vrot.slane %v1169_v43, 5 }
  0x2b   : > { %v2496_v36 = vor.u32 %v3082_v17, %v2495_v15  ;;  %v1425_v57 = vrot.slane %v2778_v41, 5  ;;  %v3102_v1 = vld [vmem:[%s3880_s1 + $0x88] sm:$0xff]  ;;  %v819_v5 = vsel %vm3470_vm5, %v2586_v51, %v818_v52  ;;  %v3113_v17 = vld [vmem:[%s3880_s1 + $0xc0] sm:$0xff]  ;;  %v781_v38 = vld [vmem:[%s3313_s16 + $0x10] sm:$0xe] }
  0x2c   : > { %485 = vmatmul.bf16.vlgmr.msra.gmra.mxu2 %v2500_v26  ;;  %475 = vmatmul.bf16.vlgmr.msra.gmra.mxu0 %v2492_v32  ;;  %v1162_v26 = vrot.slane %v1160_v6, 4  ;;  %v3132_v32 = vld [vmem:[%s3880_s1 + $0x158] sm:$0xff]  ;;  %v3130_v11 = vld [vmem:[%s3880_s1 + $0x148] sm:$0xff]  ;;  %v3121_v19 = vld [vmem:[%s3880_s1 + $0x100] sm:$0xff]  ;;  %v2587_v52 = vrot.slane %v781_v38, 9 }
  0x2d   : > { %933 = vmatpush.bf16.msrb.mxu2 %v3108_v21  ;;  %750 = vmatmul.bf16.vlgmr.msra.gmra.mxu3 %v678_v31  ;;  %v1148_v21 = vrot.slane %v1146_v0, 4  ;;  %v3124_v31 = vld [vmem:[%s3880_s1 + $0x118] sm:$0xff]  ;;  %v2667_v18 = vld [vmem:[%s3313_s16 + $0x8] sm:$0xf]  ;;  %v3147_v41 = vld [vmem:[%s3880_s1 + $0x1b0] sm:$0xff] }
  0x2e   : > { %1084 = vmatpush.bf16.msrb.mxu3 %v3120_v27  ;;  %740 = vmatmul.bf16.vlgmr.msra.gmra.mxu1 %v676_v35  ;;  %v1165_v27 = vrot.slane %v1163_v7, 5  ;;  %v1155_v35 = vshll.u32 %v2714_v20, 16  ;;  %v2717_v0 = vld [vmem:[%s3313_s16 + $0x18] sm:$0xf]  ;;  %v782_v43 = vld [vmem:[%s3313_s16 + $0x14] sm:$0x1] }
  0x2f   : > { %1346 = vmatpush.bf16.msrb.mxu0 %v3128_v39  ;;  %1544 = vmatpush.bf16.msrb.mxu1 %v3136_v40  ;;  %v1152_v39 = vor.u32 %v1151_v22, %v1148_v21  ;;  %v2777_v40 = vld [vmem:[%s3313_s16 + $0x8] sm:$0xe]  ;;  %v1177_v13 = vshll.u32 %v2717_v0, 16  ;;  %v870_v21 = vunpack.c.l.b16 %v819_v5  ;;  %v3109_v22 = vld [vmem:[%s3313_s16 + $0xc] sm:$0xf0] }
  0x30   : > { %v1166_v42 = vor.u32 %v1165_v27, %v1162_v26  ;;  %v1157_v53 = vrot.slane %v1155_v35, 5  ;;  %v2793_v54 = vrot.slane %v2777_v40, 9  ;;  %v3129_v27 = vld [vmem:[%s3880_s1 + $0x140] sm:$0xff]  ;;  %v2668_v40 = vor.u32 %v3109_v22, %v2667_v18  ;;  %v3155_v51 = vld [vmem:[%s3880_s1 + $0x1f0] sm:$0xff] }
  0x31   : > { %934 = vmatpush.bf16.msrb.mxu2 %v3107_v46  ;;  %v2780_v46 = vld [vmem:[%s3313_s16 + $0x14] sm:$0x1]  ;;  %v1153_v56 = vrot.slane %v1152_v39, 4  ;;  %v1179_v34 = vrot.slane %v1177_v13, 5 }
  0x32   : > { %1085 = vmatpush.bf16.msrb.mxu3 %v3119_v47  ;;  %v3103_v47 = vld [vmem:[%s3880_s1 + $0x90] sm:$0xff]  ;;  %v1167_v62 = vrot.slane %v1166_v42, 4  ;;  %v1426_v7 = vsel %vm3470_vm5, %v2793_v54, %v1425_v57  ;;  %v2782_v57 = vld [vmem:[%s3313_s16 + $0x1c] sm:$0x1] }
  0x33   : > { %1347 = vmatpush.bf16.msrb.mxu0 %v3127_v48  ;;  %1545 = vmatpush.bf16.msrb.mxu1 %v3135_v49  ;;  %v3115_v48 = vld [vmem:[%s3880_s1 + $0xd0] sm:$0xff]  ;;  %v2585_v49 = vrot.slane %v777_v25, 9  ;;  %v1158_v6 = vsel %vm3342_vm2, %v1153_v56, %v1157_v53  ;;  %v1480_v28 = vunpack.c.l.b16 %v1426_v7  ;;  %v2781_v56 = vld [vmem:[%s3313_s16 + $0x18] sm:$0xe]  ;;  %v1433_v5 = vrot.slane %v2782_v57, 5 }
  0x34   : > { %v1172_v12 = vsel %vm3342_vm2, %v1167_v62, %v1171_v63  ;;  %v1282_v25 = vunpack.c.l.b16 %v1158_v6  ;;  %v3146_v6 = vld [vmem:[%s3880_s1 + $0x1a8] sm:$0xff] }
  0x35   : > { %935 = vmatpush.bf16.msrb.mxu2 %v3106_v59  ;;  %v1429_v59 = vrot.slane %v2780_v46, 5  ;;  %v815_v4 = vsel %vm3470_vm5, %v2585_v49, %v814_v50  ;;  %v1283_v26 = vunpack.c.l.b16 %v1172_v12  ;;  %v3162_v12 = vld [vmem:[%s3880_s1 + $0x228] sm:$0xff] }
  0x36   : > { %1086 = vmatpush.bf16.msrb.mxu3 %v3118_v60  ;;  %v3123_v60 = vld [vmem:[%s3880_s1 + $0x110] sm:$0xff]  ;;  %v869_v20 = vunpack.c.l.b16 %v815_v4  ;;  %v2795_v4 = vrot.slane %v2781_v56, 9 }
  0x37   : > { %1348 = vmatpush.bf16.msrb.mxu0 %v3126_v2  ;;  %1546 = vmatpush.bf16.msrb.mxu1 %v3134_v3  ;;  %v3114_v2 = vld [vmem:[%s3880_s1 + $0xc8] sm:$0xff]  ;;  %v2719_v3 = vld [vmem:[%s3313_s16 + $0x20] sm:$0xf]  ;;  %v1290_v44 = vpack.c.b16 %v1283_v26, %v1282_v25 }
  0x38   : > { %v1188_v14 = vshrl.u32 %v2719_v3, 16  ;;  %v1191_v15 = vshll.u32 %v2719_v3, 16  ;;  %v877_v39 = vpack.c.b16 %v870_v21, %v869_v20 }
  0x39   : > { %936 = vmatpush.bf16.msrb.mxu2 %v3105_v8  ;;  %v1430_v8 = vsel %vm3470_vm5, %v2794_v58, %v1429_v59  ;;  %v822_v58 = vrot.slane %v782_v43, 5  ;;  %v3163_v59 = vld [vmem:[%s3880_s1 + $0x230] sm:$0xff]  ;;  %v3144_v43 = vld [vmem:[%s3880_s1 + $0x198] sm:$0xff] }
  0x3a   : > { %1087 = vmatpush.bf16.msrb.mxu3 %v3117_v9  ;;  %v1174_v9 = vshrl.u32 %v2717_v0, 16  ;;  %v1190_v35 = vrot.slane %v1188_v14, 4  ;;  %v2721_v0 = vld [vmem:[%s3313_s16 + $0x28] sm:$0xf] }
  0x3b   : > { %1349 = vmatpush.bf16.msrb.mxu0 %v3125_v10  ;;  %1547 = vmatpush.bf16.msrb.mxu1 %v3133_v24  ;;  %v3122_v10 = vld [vmem:[%s3880_s1 + $0x108] sm:$0xff]  ;;  %v3156_v24 = vld [vmem:[%s3880_s1 + $0x1f8] sm:$0xff]  ;;  %v1202_v13 = vshrl.u32 %v2721_v0, 16  ;;  %v1205_v14 = vshll.u32 %v2721_v0, 16 }
  0x3c   : > { %490 = vmatmul.bf16.gmra.mxu2 %v2504_v29  ;;  %480 = vmatmul.bf16.gmra.mxu0 %v2496_v36  ;;  %v1481_v29 = vunpack.c.l.b16 %v1430_v8  ;;  %v1176_v33 = vrot.slane %v1174_v9, 4  ;;  %v1193_v36 = vrot.slane %v1191_v15, 5  ;;  %v3154_v9 = vld [vmem:[%s3880_s1 + $0x1e8] sm:$0xff] }
  0x3d   : > { %937 = vmatpush.bf16.msrb.mxu2 %v3104_v16  ;;  %755 = vmatmul.bf16.gmra.mxu3 %v679_v30  ;;  %v3101_v16 = vld [vmem:[%s3880_s1 + $0x80] sm:$0xff]  ;;  %v1204_v25 = vrot.slane %v1202_v13, 4  ;;  %v1207_v26 = vrot.slane %v1205_v14, 5  ;;  %v3142_v13 = vld [vmem:[%s3880_s1 + $0x188] sm:$0xff] }
  0x3e   : > { %1088 = vmatpush.bf16.msrb.mxu3 %v3116_v23  ;;  %745 = vmatmul.bf16.gmra.mxu1 %v677_v37  ;;  %v3148_v23 = vld [vmem:[%s3880_s1 + $0x1b8] sm:$0xff]  ;;  %v2228_v30 = vld [vmem:[%s3883_s4] sm:$0x3]  ;;  %v1488_v46 = vpack.c.b16 %v1481_v29, %v1480_v28  ;;  %v1180_v53 = vor.u32 %v1179_v34, %v1176_v33  ;;  %v1194_v54 = vor.u32 %v1193_v36, %v1190_v35  ;;  %v2722_v33 = vld [vmem:[%s3313_s16 + $0x2c] sm:$0x1] }
  0x3f   : > { %1350 = vmatpush.bf16.msrb.mxu0 %v3124_v31  ;;  %1548 = vmatpush.bf16.msrb.mxu1 %v3132_v32  ;;  %v2718_v31 = vld [vmem:[%s3313_s16 + $0x1c] sm:$0x1]  ;;  %v2720_v32 = vld [vmem:[%s3313_s16 + $0x24] sm:$0x1]  ;;  %v2264_v42 = vsel %vm2262_vm6, %v2228_v30, 0 }
  0x40   : > { %v3164_v37 = vld [vmem:[%s3880_s1 + $0x238] sm:$0xff]  ;;  %v1183_v49 = vshll.u32 %v2718_v31, 16  ;;  %v1197_v50 = vshll.u32 %v2720_v32, 16  ;;  %v1181_v7 = vrot.slane %v1180_v53, 4  ;;  %v1195_v8 = vrot.slane %v1194_v54, 4  ;;  %v3161_v29 = vld [vmem:[%s3880_s1 + $0x220] sm:$0xff] }
  0x41   : > { %938 = vmatpush.bf16.msrb.mxu2 %v3103_v47  ;;  %v783_v47 = vld [vmem:[%s3313_s16 + $0x18] sm:$0xe]  ;;  %v2724_v34 = vld [vmem:[%s3313_s16 + $0x34] sm:$0x1]  ;;  %v3110_v35 = vld [vmem:[%s3313_s16 + $0x1c] sm:$0xf0] }
  0x42   : > { %1089 = vmatpush.bf16.msrb.mxu3 %v3115_v48  ;;  %v784_v48 = vld [vmem:[%s3313_s16 + $0x1c] sm:$0x1]  ;;  %v2588_v62 = vrot.slane %v783_v47, 9  ;;  %v1199_v3 = vrot.slane %v1197_v50, 5  ;;  %v2671_v32 = vld [vmem:[%s3313_s16 + $0x18] sm:$0xf]  ;;  %v1208_v47 = vor.u32 %v1207_v26, %v1204_v25 }
  0x43   : > { %1351 = vmatpush.bf16.msrb.mxu0 %v3123_v60  ;;  %1549 = vmatpush.bf16.msrb.mxu1 %v3131_v61  ;;  %v2783_v60 = vld [vmem:[%s3313_s16 + $0x20] sm:$0xe]  ;;  %v2784_v61 = vld [vmem:[%s3313_s16 + $0x24] sm:$0x1]  ;;  %v826_v63 = vrot.slane %v784_v48, 5  ;;  %v1211_v48 = vshll.u32 %v2722_v33, 16  ;;  %v2672_v53 = vor.u32 %v3110_v35, %v2671_v32 }
  0x44   : > { %v1200_v21 = vsel %vm3342_vm2, %v1195_v8, %v1199_v3  ;;  %v1225_v50 = vshll.u32 %v2724_v34, 16  ;;  %v2785_v54 = vld [vmem:[%s3313_s16 + $0x28] sm:$0xe]  ;;  %v1209_v3 = vrot.slane %v1208_v47, 4  ;;  %v2727_v14 = vld [vmem:[%s3313_s16 + $0x40] sm:$0xf] }
  0x45   : > { %939 = vmatpush.bf16.msrb.mxu2 %v3102_v1  ;;  %v2723_v1 = vld [vmem:[%s3313_s16 + $0x30] sm:$0xf]  ;;  %v827_v18 = vsel %vm3470_vm5, %v2588_v62, %v826_v63  ;;  %v1244_v25 = vshrl.u32 %v2727_v14, 16  ;;  %v1247_v26 = vshll.u32 %v2727_v14, 16  ;;  %v2675_v32 = vld [vmem:[%s3313_s16 + $0x28] sm:$0xf] }
  0x46   : > { %1090 = vmatpush.bf16.msrb.mxu3 %v3114_v2  ;;  %v1185_v2 = vrot.slane %v1183_v49, 5  ;;  %v1216_v15 = vshrl.u32 %v2723_v1, 16  ;;  %v872_v31 = vunpack.c.l.b16 %v827_v18  ;;  %v3158_v18 = vld [vmem:[%s3880_s1 + $0x208] sm:$0xff] }
  0x47   : > { %1352 = vmatpush.bf16.msrb.mxu0 %v3122_v10  ;;  %1550 = vmatpush.bf16.msrb.mxu1 %v3130_v11  ;;  %v2796_v10 = vrot.slane %v2783_v60, 9  ;;  %v1437_v11 = vrot.slane %v2784_v61, 5  ;;  %v2788_v60 = vld [vmem:[%s3313_s16 + $0x34] sm:$0x1] }
  0x48   : > { %v1186_v20 = vsel %vm3342_vm2, %v1181_v7, %v1185_v2  ;;  %v3151_v2 = vld [vmem:[%s3880_s1 + $0x1d0] sm:$0xff]  ;;  %v2797_v7 = vrot.slane %v2785_v54, 9 }
  0x49   : > { %940 = vmatpush.bf16.msrb.mxu2 %v3101_v16  ;;  %v1219_v16 = vshll.u32 %v2723_v1, 16  ;;  %v1438_v22 = vsel %vm3470_vm5, %v2796_v10, %v1437_v11  ;;  %v1284_v36 = vunpack.c.l.b16 %v1186_v20  ;;  %v3143_v1 = vld [vmem:[%s3880_s1 + $0x190] sm:$0xff]  ;;  %v1445_v10 = vrot.slane %v2788_v60, 5  ;;  %v2725_v11 = vld [vmem:[%s3313_s16 + $0x38] sm:$0xf] }
  0x4a   : > { %1091 = vmatpush.bf16.msrb.mxu3 %v3113_v17  ;;  %v823_v17 = vsel %vm3470_vm5, %v2587_v52, %v822_v58  ;;  %v2786_v58 = vld [vmem:[%s3313_s16 + $0x2c] sm:$0x1]  ;;  %v2789_v60 = vld [vmem:[%s3313_s16 + $0x38] sm:$0xe] }
  0x4b   : > { %1353 = vmatpush.bf16.msrb.mxu0 %v3121_v19  ;;  %1551 = vmatpush.bf16.msrb.mxu1 %v3129_v27  ;;  %v1434_v19 = vsel %vm3470_vm5, %v2795_v4, %v1433_v5  ;;  %v1218_v27 = vrot.slane %v1216_v15, 4  ;;  %v1221_v28 = vrot.slane %v1219_v16, 5  ;;  %v871_v30 = vunpack.c.l.b16 %v823_v17  ;;  %v3150_v15 = vld [vmem:[%s3880_s1 + $0x1c8] sm:$0xff] }
  0x4c   : > { %941 = vmatmul.bf16.vlgmr.msrb.gmra.mxu2 %v877_v39  ;;  %v1482_v38 = vunpack.c.l.b16 %v1434_v19  ;;  %v1483_v39 = vunpack.c.l.b16 %v1438_v22  ;;  %v1213_v4 = vrot.slane %v1211_v48, 5  ;;  %v1441_v8 = vrot.slane %v2786_v58, 5 }
  0x4d   : > { %1695 = vmatpush.bf16.msra.mxu2 %v3148_v23  ;;  %1092 = vmatmul.bf16.vlgmr.msrb.gmra.mxu3 %v2668_v40  ;;  %v3145_v23 = vld [vmem:[%s3880_s1 + $0x1a0] sm:$0xff]  ;;  %v1222_v49 = vor.u32 %v1221_v28, %v1218_v27  ;;  %v878_v52 = vpack.c.b16 %v872_v31, %v871_v30 }
  0x4e   : > { %1957 = vmatpush.bf16.msra.mxu3 %v3156_v24  ;;  %1354 = vmatmul.bf16.vlgmr.msrb.gmra.mxu0 %v1290_v44  ;;  %v3153_v24 = vld [vmem:[%s3880_s1 + $0x1e0] sm:$0xff]  ;;  %v3152_v44 = vld [vmem:[%s3880_s1 + $0x1d8] sm:$0xff]  ;;  %v1489_v57 = vpack.c.b16 %v1483_v39, %v1482_v38  ;;  %v1214_v19 = vsel %vm3342_vm2, %v1209_v3, %v1213_v4 }
  0x4f   : > { %2155 = vmatpush.bf16.msra.mxu0 %v3164_v37  ;;  %2273 = vmatpush.bf16.msra.mxu1 %v2264_v42  ;;  %v1285_v37 = vunpack.c.l.b16 %v1200_v21  ;;  %v785_v40 = vld [vmem:[%s3313_s16 + $0x20] sm:$0xe]  ;;  %v787_v42 = vld [vmem:[%s3313_s16 + $0x28] sm:$0xe]  ;;  %v1223_v5 = vrot.slane %v1222_v49, 4  ;;  %v1442_v21 = vsel %vm3470_vm5, %v2797_v7, %v1441_v8  ;;  %v1286_v33 = vunpack.c.l.b16 %v1214_v19 }
  0x50   : > { %1552 = vmatmul.bf16.vlgmr.msrb.gmra.mxu1 %v1488_v46  ;;  %v788_v46 = vld [vmem:[%s3313_s16 + $0x2c] sm:$0x1]  ;;  %v2589_v61 = vrot.slane %v785_v40, 9  ;;  %v2590_v63 = vrot.slane %v787_v42, 9  ;;  %v3141_v27 = vld [vmem:[%s3880_s1 + $0x180] sm:$0xff]  ;;  %v1484_v35 = vunpack.c.l.b16 %v1442_v21  ;;  %v1246_v40 = vrot.slane %v1244_v25, 4 }
  0x51   : > { %1696 = vmatpush.bf16.msra.mxu2 %v3147_v41  ;;  %v786_v41 = vld [vmem:[%s3313_s16 + $0x24] sm:$0x1]  ;;  %v1291_v56 = vpack.c.b16 %v1285_v37, %v1284_v36  ;;  %v834_v0 = vrot.slane %v788_v46, 5  ;;  %v3111_v37 = vld [vmem:[%s3313_s16 + $0x2c] sm:$0xf0]  ;;  %v2799_v8 = vrot.slane %v2789_v60, 9 }
  0x52   : > { %1958 = vmatpush.bf16.msra.mxu3 %v3155_v51  ;;  %v3160_v51 = vld [vmem:[%s3880_s1 + $0x218] sm:$0xff]  ;;  %v830_v62 = vrot.slane %v786_v41, 5  ;;  %v3149_v28 = vld [vmem:[%s3880_s1 + $0x1c0] sm:$0xff]  ;;  %v1249_v41 = vrot.slane %v1247_v26, 5  ;;  %v790_v46 = vld [vmem:[%s3313_s16 + $0x34] sm:$0x1]  ;;  %v2676_v48 = vor.u32 %v3111_v37, %v2675_v32 }
  0x53   : > { %2156 = vmatpush.bf16.msra.mxu0 %v3163_v59  ;;  %v2787_v59 = vld [vmem:[%s3313_s16 + $0x30] sm:$0xe]  ;;  %v835_v17 = vsel %vm3470_vm5, %v2590_v63, %v834_v0  ;;  %v3157_v31 = vld [vmem:[%s3880_s1 + $0x200] sm:$0xff]  ;;  %v2726_v42 = vld [vmem:[%s3313_s16 + $0x3c] sm:$0x1] }
  0x54   : > { %v831_v16 = vsel %vm3470_vm5, %v2589_v61, %v830_v62  ;;  %v874_v30 = vunpack.c.l.b16 %v835_v17  ;;  %v1239_v54 = vshll.u32 %v2726_v42, 16  ;;  %v2790_v61 = vld [vmem:[%s3313_s16 + $0x3c] sm:$0x1]  ;;  %v2791_v62 = vld [vmem:[%s3313_s16 + $0x40] sm:$0xe] }
  0x55   : > { %1697 = vmatpush.bf16.msra.mxu2 %v3146_v6  ;;  %v1227_v6 = vrot.slane %v1225_v50, 5  ;;  %v2792_v63 = vld [vmem:[%s3313_s16 + $0x44] sm:$0x1]  ;;  %v2923_v3 = vld [vmem:[%s3313_s16 + $0x18] sm:$0xf] }
  0x56   : > { %1959 = vmatpush.bf16.msra.mxu3 %v3154_v9  ;;  %v2798_v9 = vrot.slane %v2787_v59, 9  ;;  %v838_v59 = vrot.slane %v790_v46, 5  ;;  %v1771_v14 = vshrl.u32 %v2923_v3, 16  ;;  %v2985_v42 = vld [vmem:[%s3313_s16 + $0x10] sm:$0xe] }
  0x57   : > { %2157 = vmatpush.bf16.msra.mxu0 %v3162_v12  ;;  %v3159_v12 = vld [vmem:[%s3880_s1 + $0x210] sm:$0xff]  ;;  %v1228_v20 = vsel %vm3342_vm2, %v1223_v5, %v1227_v6  ;;  %v1241_v5 = vrot.slane %v1239_v54, 5 }
  0x58   : > { %v1446_v22 = vsel %vm3470_vm5, %v2798_v9, %v1445_v10  ;;  %v1287_v34 = vunpack.c.l.b16 %v1228_v20  ;;  %v1449_v9 = vrot.slane %v2790_v61, 5  ;;  %v2800_v10 = vrot.slane %v2791_v62, 9  ;;  %v2986_v46 = vld [vmem:[%s3313_s16 + $0x14] sm:$0x1] }
  0x59   : > { %1698 = vmatpush.bf16.msra.mxu2 %v3145_v23  ;;  %v1230_v23 = vshrl.u32 %v2725_v11, 16  ;;  %v1485_v36 = vunpack.c.l.b16 %v1446_v22  ;;  %v2036_v54 = vrot.slane %v2986_v46, 5 }
  0x5a   : > { %1960 = vmatpush.bf16.msra.mxu3 %v3153_v24  ;;  %v1233_v24 = vshll.u32 %v2725_v11, 16  ;;  %v1292_v49 = vpack.c.b16 %v1287_v34, %v1286_v33  ;;  %v1453_v11 = vrot.slane %v2792_v63, 5  ;;  %v1450_v20 = vsel %vm3470_vm5, %v2799_v8, %v1449_v9  ;;  %v3137_v9 = vld [vmem:[%s3313_s16 + $0x14] sm:$0xf0] }
  0x5b   : > { %2158 = vmatpush.bf16.msra.mxu0 %v3161_v29  ;;  %v873_v29 = vunpack.c.l.b16 %v831_v16  ;;  %v1232_v38 = vrot.slane %v1230_v23, 4  ;;  %v1490_v50 = vpack.c.b16 %v1485_v36, %v1484_v35  ;;  %v1486_v34 = vunpack.c.l.b16 %v1450_v20 }
  0x5c   : > { %946 = vmatmul.bf16.gmra.mxu2 %v878_v52  ;;  %v1235_v39 = vrot.slane %v1233_v24, 5  ;;  %v792_v52 = vld [vmem:[%s3313_s16 + $0x3c] sm:$0x1]  ;;  %v1454_v21 = vsel %vm3470_vm5, %v2800_v10, %v1453_v11  ;;  %v1773_v24 = vrot.slane %v1771_v14, 4  ;;  %v2926_v14 = vld [vmem:[%s3313_s16 + $0x24] sm:$0x1] }
  0x5d   : > { %1699 = vmatpush.bf16.msra.mxu2 %v3144_v43  ;;  %1097 = vmatmul.bf16.gmra.mxu3 %v2672_v53  ;;  %v2728_v43 = vld [vmem:[%s3313_s16 + $0x44] sm:$0x1]  ;;  %v879_v47 = vpack.c.b16 %v874_v30, %v873_v29  ;;  %v2924_v29 = vld [vmem:[%s3313_s16 + $0x1c] sm:$0x1]  ;;  %v2679_v30 = vld [vmem:[%s3313_s16 + $0x38] sm:$0xf]  ;;  %v1487_v35 = vunpack.c.l.b16 %v1454_v21 }
  0x5e   : > { %1961 = vmatpush.bf16.msra.mxu3 %v3152_v44  ;;  %1359 = vmatmul.bf16.gmra.mxu0 %v1291_v56  ;;  %v789_v44 = vld [vmem:[%s3313_s16 + $0x30] sm:$0xe]  ;;  %v1236_v53 = vor.u32 %v1235_v39, %v1232_v38  ;;  %v1250_v56 = vor.u32 %v1249_v41, %v1246_v40  ;;  %v1780_v39 = vshll.u32 %v2924_v29, 16  ;;  %v1794_v21 = vshll.u32 %v2926_v14, 16  ;;  %v2931_v29 = vld [vmem:[%s3313_s16 + $0x38] sm:$0xf] }
  0x5f   : > { %2159 = vmatpush.bf16.msra.mxu0 %v3160_v51  ;;  %v791_v51 = vld [vmem:[%s3313_s16 + $0x38] sm:$0xe]  ;;  %v2591_v58 = vrot.slane %v789_v44, 9  ;;  %v1491_v44 = vpack.c.b16 %v1487_v35, %v1486_v34 }
  0x60   : > { %1557 = vmatmul.bf16.gmra.mxu1 %v1489_v57  ;;  %v1253_v57 = vshll.u32 %v2728_v43, 16  ;;  %v2592_v0 = vrot.slane %v791_v51, 9  ;;  %v1237_v4 = vrot.slane %v1236_v53, 4  ;;  %v1251_v6 = vrot.slane %v1250_v56, 4 }
  0x61   : > { %1700 = vmatpush.bf16.msra.mxu2 %v3143_v1  ;;  %v842_v1 = vrot.slane %v792_v52, 5  ;;  %v839_v16 = vsel %vm3470_vm5, %v2591_v58, %v838_v59  ;;  %v1782_v52 = vrot.slane %v1780_v39, 5  ;;  %v3001_v53 = vrot.slane %v2985_v42, 9  ;;  %v2925_v58 = vld [vmem:[%s3313_s16 + $0x20] sm:$0xf] }
  0x62   : > { %1962 = vmatpush.bf16.msra.mxu3 %v3151_v2  ;;  %v2921_v2 = vld [vmem:[%s3313_s16 + $0x10] sm:$0xf]  ;;  %v1255_v7 = vrot.slane %v1253_v57, 5  ;;  %v875_v26 = vunpack.c.l.b16 %v839_v16  ;;  %v2927_v59 = vld [vmem:[%s3313_s16 + $0x28] sm:$0xf] }
  0x63   : > { %2160 = vmatpush.bf16.msra.mxu0 %v3159_v12  ;;  %v1757_v12 = vshrl.u32 %v2921_v2, 16  ;;  %v843_v17 = vsel %vm3470_vm5, %v2592_v0, %v842_v1  ;;  %v2037_v62 = vsel %vm3470_vm5, %v3001_v53, %v2036_v54  ;;  %v1785_v0 = vshrl.u32 %v2925_v58, 16  ;;  %v2930_v53 = vld [vmem:[%s3313_s16 + $0x34] sm:$0x1]  ;;  %v2932_v54 = vld [vmem:[%s3313_s16 + $0x3c] sm:$0x1] }
  0x64   : > { %v1256_v19 = vsel %vm3342_vm2, %v1251_v6, %v1255_v7  ;;  %v1788_v1 = vshll.u32 %v2925_v58, 16  ;;  %v2091_v7 = vunpack.c.l.b16 %v2037_v62 }
  0x65   : > { %1701 = vmatpush.bf16.msra.mxu2 %v3142_v13  ;;  %v1760_v13 = vshll.u32 %v2921_v2, 16  ;;  %v1759_v22 = vrot.slane %v1757_v12, 4  ;;  %v1289_v33 = vunpack.c.l.b16 %v1256_v19  ;;  %v1799_v2 = vshrl.u32 %v2927_v59, 16  ;;  %v3165_v19 = vld [vmem:[%s3696_s25] sm:$0xff] }
  0x66   : > { %1963 = vmatpush.bf16.msra.mxu3 %v3150_v15  ;;  %v1774_v15 = vshll.u32 %v2923_v3, 16  ;;  %v1802_v3 = vshll.u32 %v2927_v59, 16  ;;  %v1787_v10 = vrot.slane %v1785_v0, 4  ;;  %v1790_v11 = vrot.slane %v1788_v1, 5 }
  0x67   : > { %2161 = vmatpush.bf16.msra.mxu0 %v3158_v18  ;;  %v1242_v18 = vsel %vm3342_vm2, %v1237_v4, %v1241_v5  ;;  %v1762_v23 = vrot.slane %v1760_v13, 5  ;;  %v2875_v4 = vld [vmem:[%s3313_s16 + $0x10] sm:$0xf]  ;;  %v1801_v12 = vrot.slane %v1799_v2, 4  ;;  %v3166_v2 = vld [vmem:[%s3696_s25 + $0x8] sm:$0xff] }
  0x68   : > { %v1776_v25 = vrot.slane %v1774_v15, 5  ;;  %v1288_v32 = vunpack.c.l.b16 %v1242_v18  ;;  %v1804_v13 = vrot.slane %v1802_v3, 5  ;;  %v2928_v15 = vld [vmem:[%s3313_s16 + $0x2c] sm:$0x1]  ;;  %v2876_v16 = vor.u32 %v3137_v9, %v2875_v4  ;;  %v2993_v3 = vld [vmem:[%s3313_s16 + $0x30] sm:$0xe] }
  0x69   : > { %1702 = vmatpush.bf16.msra.mxu2 %v3141_v27  ;;  %v876_v27 = vunpack.c.l.b16 %v843_v17  ;;  %v1763_v36 = vor.u32 %v1762_v23, %v1759_v22  ;;  %v1791_v20 = vor.u32 %v1790_v11, %v1787_v10  ;;  %v1808_v23 = vshll.u32 %v2928_v15, 16 }
  0x6a   : > { %1964 = vmatpush.bf16.msra.mxu3 %v3149_v28  ;;  %v2922_v28 = vld [vmem:[%s3313_s16 + $0x14] sm:$0x1]  ;;  %v1777_v38 = vor.u32 %v1776_v25, %v1773_v24  ;;  %v1293_v43 = vpack.c.b16 %v1289_v33, %v1288_v32  ;;  %v1805_v22 = vor.u32 %v1804_v13, %v1801_v12  ;;  %v2989_v24 = vld [vmem:[%s3313_s16 + $0x20] sm:$0xe]  ;;  %v2990_v25 = vld [vmem:[%s3313_s16 + $0x24] sm:$0x1] }
  0x6b   : > { %2162 = vmatpush.bf16.msra.mxu0 %v3157_v31  ;;  %v3112_v31 = vld [vmem:[%s3313_s16 + $0x3c] sm:$0xf0]  ;;  %v1766_v37 = vshll.u32 %v2922_v28, 16  ;;  %v880_v40 = vpack.c.b16 %v876_v27, %v875_v26  ;;  %v2991_v26 = vld [vmem:[%s3313_s16 + $0x28] sm:$0xe]  ;;  %v1810_v33 = vrot.slane %v1808_v23, 5 }
  0x6c   : > { %951 = vmatmul.bf16.gmra.mxu2 %v879_v47  ;;  %v2680_v41 = vor.u32 %v3112_v31, %v2679_v30  ;;  %v2987_v47 = vld [vmem:[%s3313_s16 + $0x18] sm:$0xe]  ;;  %v1778_v51 = vrot.slane %v1777_v38, 4  ;;  %v2992_v27 = vld [vmem:[%s3313_s16 + $0x2c] sm:$0x1]  ;;  %v1792_v30 = vrot.slane %v1791_v20, 4 }
  0x6d   : > { %1102 = vmatmul.bf16.gmra.mxu3 %v2676_v48  ;;  %v2988_v48 = vld [vmem:[%s3313_s16 + $0x1c] sm:$0x1]  ;;  %v3002_v56 = vrot.slane %v2987_v47, 9  ;;  %v2929_v28 = vld [vmem:[%s3313_s16 + $0x30] sm:$0xf]  ;;  %v1796_v31 = vrot.slane %v1794_v21, 5 }
  0x6e   : > { %1364 = vmatmul.bf16.gmra.mxu0 %v1292_v49  ;;  %v1764_v49 = vrot.slane %v1763_v36, 4  ;;  %v2040_v57 = vrot.slane %v2988_v48, 5  ;;  %v1783_v61 = vsel %vm3342_vm2, %v1778_v51, %v1782_v52  ;;  %v1806_v32 = vrot.slane %v1805_v22, 4 }
  0x6f   : > { %v1894_v6 = vunpack.c.l.b16 %v1783_v61  ;;  %v3003_v34 = vrot.slane %v2989_v24, 9  ;;  %v2044_v35 = vrot.slane %v2990_v25, 5  ;;  %v3004_v36 = vrot.slane %v2991_v26, 9  ;;  %v2883_v26 = vld [vmem:[%s3313_s16 + $0x30] sm:$0xf] }
  0x70   : > { %1562 = vmatmul.bf16.gmra.mxu1 %v1490_v50  ;;  %v1768_v50 = vrot.slane %v1766_v37, 5  ;;  %v2041_v63 = vsel %vm3470_vm5, %v3002_v56, %v2040_v57  ;;  %v2048_v37 = vrot.slane %v2992_v27, 5  ;;  %v1813_v38 = vshrl.u32 %v2929_v28, 16  ;;  %v2879_v56 = vld [vmem:[%s3313_s16 + $0x20] sm:$0xf] }
  0x71   : > { %v2092_v8 = vunpack.c.l.b16 %v2041_v63  ;;  %v1816_v39 = vshll.u32 %v2929_v28, 16  ;;  %v1797_v42 = vsel %vm3342_vm2, %v1792_v30, %v1796_v31  ;;  %v3138_v57 = vld [vmem:[%s3313_s16 + $0x24] sm:$0xf0]  ;;  %v1822_v61 = vshll.u32 %v2930_v53, 16  ;;  %v3139_v31 = vld [vmem:[%s3313_s16 + $0x34] sm:$0xf0] }
  0x72   : > { %v1769_v60 = vsel %vm3342_vm2, %v1764_v49, %v1768_v50  ;;  %v2049_v46 = vsel %vm3470_vm5, %v3004_v36, %v2048_v37  ;;  %v1815_v47 = vrot.slane %v1813_v38, 4  ;;  %v1895_v51 = vunpack.c.l.b16 %v1797_v42  ;;  %v2934_v36 = vld [vmem:[%s3313_s16 + $0x44] sm:$0x1]  ;;  %v2936_v37 = vld [vmem:[%s3313_s16 + $0x4c] sm:$0x1] }
  0x73   : > { %v1893_v5 = vunpack.c.l.b16 %v1769_v60  ;;  %v2099_v18 = vpack.c.b16 %v2092_v8, %v2091_v7  ;;  %v1818_v48 = vrot.slane %v1816_v39, 5  ;;  %v2094_v59 = vunpack.c.l.b16 %v2049_v46  ;;  %v2996_v7 = vld [vmem:[%s3313_s16 + $0x3c] sm:$0x1]  ;;  %v3000_v53 = vld [vmem:[%s3313_s16 + $0x4c] sm:$0x1] }
  0x74   : > { %v1836_v63 = vshll.u32 %v2932_v54, 16  ;;  %v2880_v0 = vor.u32 %v3138_v57, %v2879_v56  ;;  %v1824_v9 = vrot.slane %v1822_v61, 5  ;;  %v3005_v12 = vrot.slane %v2993_v3, 9 }
  0x75   : > { %v1901_v17 = vpack.c.b16 %v1894_v6, %v1893_v5  ;;  %v1819_v60 = vor.u32 %v1818_v48, %v1815_v47  ;;  %v2994_v5 = vld [vmem:[%s3313_s16 + $0x34] sm:$0x1]  ;;  %v2995_v6 = vld [vmem:[%s3313_s16 + $0x38] sm:$0xe]  ;;  %v2056_v15 = vrot.slane %v2996_v7, 5  ;;  %v2884_v38 = vor.u32 %v3139_v31, %v2883_v26 }
  0x76   : > { %v1838_v11 = vrot.slane %v1836_v63, 5  ;;  %v2052_v13 = vrot.slane %v2994_v5, 5  ;;  %v3006_v14 = vrot.slane %v2995_v6, 9  ;;  %v1864_v46 = vshll.u32 %v2936_v37, 16 }
  0x77   : > { %v1820_v8 = vrot.slane %v1819_v60, 4 }
  0x78   : > { %v2053_v20 = vsel %vm3470_vm5, %v3005_v12, %v2052_v13  ;;  %v2057_v21 = vsel %vm3470_vm5, %v3006_v14, %v2056_v15  ;;  %v3140_v12 = vld [vmem:[%s3313_s16 + $0x44] sm:$0xf0] }
  0x79   : > { %v2096_v30 = vunpack.c.l.b16 %v2057_v21 }
  0x7c   : > { %956 = vmatmul.bf16.gmra.mxu2 %v880_v40  ;;  %v1827_v40 = vshrl.u32 %v2931_v29, 16 }
  0x7d   : > { %1107 = vmatmul.bf16.gmra.mxu3 %v2680_v41  ;;  %v1830_v41 = vshll.u32 %v2931_v29, 16  ;;  %v2095_v29 = vunpack.c.l.b16 %v2053_v20  ;;  %v3168_v20 = vld [vmem:[%s3696_s25 + $0x18] sm:$0xff] }
  0x7e   : > { %1369 = vmatmul.bf16.gmra.mxu0 %v1293_v43  ;;  %v1811_v43 = vsel %vm3342_vm2, %v1806_v32, %v1810_v33  ;;  %v1829_v49 = vrot.slane %v1827_v40, 4 }
  0x7f   : > { %v1832_v50 = vrot.slane %v1830_v41, 5  ;;  %v1896_v52 = vunpack.c.l.b16 %v1811_v43  ;;  %v2101_v40 = vpack.c.b16 %v2096_v30, %v2095_v29  ;;  %v3167_v41 = vld [vmem:[%s3696_s25 + $0x10] sm:$0xff]  ;;  %v1850_v43 = vshll.u32 %v2934_v36, 16 }
  0x80   : > { %1567 = vmatmul.bf16.gmra.mxu1 %v1491_v44  ;;  %v2045_v44 = vsel %vm3470_vm5, %v3003_v34, %v2044_v35 }
  0x81   : > { %v2093_v58 = vunpack.c.l.b16 %v2045_v44  ;;  %v1833_v62 = vor.u32 %v1832_v50, %v1829_v49  ;;  %v1902_v1 = vpack.c.b16 %v1896_v52, %v1895_v51  ;;  %v2997_v49 = vld [vmem:[%s3313_s16 + $0x40] sm:$0xe]  ;;  %v2998_v51 = vld [vmem:[%s3313_s16 + $0x44] sm:$0x1]  ;;  %v2999_v52 = vld [vmem:[%s3313_s16 + $0x48] sm:$0xe] }
  0x82   : > { %v1852_v56 = vrot.slane %v1850_v43, 5  ;;  %v2060_v60 = vrot.slane %v2998_v51, 5  ;;  %v3008_v61 = vrot.slane %v2999_v52, 9 }
  0x83   : > { %v2100_v4 = vpack.c.b16 %v2094_v59, %v2093_v58  ;;  %v1834_v10 = vrot.slane %v1833_v62, 4  ;;  %v1866_v58 = vrot.slane %v1864_v46, 5  ;;  %v3007_v59 = vrot.slane %v2997_v49, 9 }
  0x84   : > { %v2064_v62 = vrot.slane %v3000_v53, 5 }
  0x85   : > { %v2061_v6 = vsel %vm3470_vm5, %v3007_v59, %v2060_v60 }
  0x86   : > { %v2065_v7 = vsel %vm3470_vm5, %v3008_v61, %v2064_v62  ;;  %v2097_v13 = vunpack.c.l.b16 %v2061_v6 }
  0x87   : > { %v2098_v14 = vunpack.c.l.b16 %v2065_v7 }
  0x8c   : > { %1703 = vmatmul.bf16.vlgmr.msra.gmra.mxu2 %v2876_v16  ;;  %v2933_v16 = vld [vmem:[%s3313_s16 + $0x40] sm:$0xf] }
  0x8d   : > { %1965 = vmatmul.bf16.vlgmr.msra.gmra.mxu3 %v1901_v17  ;;  %v2935_v17 = vld [vmem:[%s3313_s16 + $0x48] sm:$0xf]  ;;  %v1841_v22 = vshrl.u32 %v2933_v16, 16  ;;  %v1844_v23 = vshll.u32 %v2933_v16, 16 }
  0x8e   : > { %2163 = vmatmul.bf16.vlgmr.msra.gmra.mxu0 %v2099_v18  ;;  %v1825_v18 = vsel %vm3342_vm2, %v1820_v8, %v1824_v9  ;;  %v1855_v24 = vshrl.u32 %v2935_v17, 16  ;;  %v1858_v25 = vshll.u32 %v2935_v17, 16 }
  0x8f   : > { %v1897_v27 = vunpack.c.l.b16 %v1825_v18  ;;  %v1843_v32 = vrot.slane %v1841_v22, 4  ;;  %v1846_v33 = vrot.slane %v1844_v23, 5 }
  0x90   : > { %3073 = vmatmul.msk.bf16.vlgmr.msra.gmra.mxu1 %vm2249_vm7, %v3165_v19  ;;  %v1839_v19 = vsel %vm3342_vm2, %v1834_v10, %v1838_v11  ;;  %v1857_v34 = vrot.slane %v1855_v24, 4  ;;  %v1860_v35 = vrot.slane %v1858_v25, 5  ;;  %v2887_v11 = vld [vmem:[%s3313_s16 + $0x40] sm:$0xf] }
  0x91   : > { %v1898_v28 = vunpack.c.l.b16 %v1839_v19  ;;  %v1847_v42 = vor.u32 %v1846_v33, %v1843_v32  ;;  %v2888_v17 = vor.u32 %v3140_v12, %v2887_v11  ;;  %v2102_v19 = vpack.c.b16 %v2098_v14, %v2097_v13 }
  0x92   : > { %v1861_v44 = vor.u32 %v1860_v35, %v1857_v34 }
  0x93   : > { %v1903_v39 = vpack.c.b16 %v1898_v28, %v1897_v27  ;;  %v1848_v54 = vrot.slane %v1847_v42, 4 }
  0x94   : > { %v1862_v57 = vrot.slane %v1861_v44, 4 }
  0x96   : > { %v1867_v3 = vsel %vm3342_vm2, %v1862_v57, %v1866_v58 }
  0x97   : > { %v1900_v10 = vunpack.c.l.b16 %v1867_v3 }
  0x9c   : > { %1708 = vmatmul.bf16.gmra.mxu2 %v2880_v0 }
  0x9d   : > { %1970 = vmatmul.bf16.gmra.mxu3 %v1902_v1 }
  0x9e   : > { %2168 = vmatmul.bf16.gmra.mxu0 %v2100_v4 }
  0xa0   : > { %3074 = vmatmul.msk.bf16.gmra.mxu1 %vm2249_vm7, %v3166_v2  ;;  %v1853_v2 = vsel %vm3342_vm2, %v1848_v54, %v1852_v56 }
  0xa1   : > { %v1899_v9 = vunpack.c.l.b16 %v1853_v2 }
  0xa3   : > { %v1904_v18 = vpack.c.b16 %v1900_v10, %v1899_v9 }
  0xa9   : > { %v476_v47 = vpop.f32.mrf.mxu0 }
  0xab   : > { %v741_v48 = vpop.f32.mrf.mxu1 }
  0xac   : > { %v3742_v50 = vadd.f32 %v741_v48, %v476_v47  ;;  %1713 = vmatmul.bf16.gmra.mxu2 %v2884_v38 }
  0xad   : > { %1975 = vmatmul.bf16.gmra.mxu3 %v1903_v39 }
  0xae   : > { %2173 = vmatmul.bf16.gmra.mxu0 %v2101_v40 }
  0xaf   : > { %v486_v63 = vpop.f32.mrf.mxu2 }
  0xb0   : > { %3075 = vmatmul.msk.bf16.gmra.mxu1 %vm2249_vm7, %v3167_v41  ;;  %v751_v0 = vpop.f32.mrf.mxu3 }
  0xb1   : > { %v3748_v1 = vadd.f32 %v751_v0, %v486_v63  ;;  %v478_v4 = vpop.f32.mrf.mxu0 }
  0xb3   : > { %v743_v5 = vpop.f32.mrf.mxu1 }
  0xb4   : > { %v3758_v8 = vadd.f32 %v743_v5, %v478_v4 }
  0xb7   : > { %v488_v15 = vpop.f32.mrf.mxu2 }
  0xb8   : > { %v753_v45 = vpop.f32.mrf.mxu3 }
  0xb9   : > { %v3762_v16 = vadd.f32 %v753_v45, %v488_v15  ;;  %v481_v21 = vpop.f32.mrf.mxu0 }
  0xbb   : > { %v746_v22 = vpop.f32.mrf.mxu1 }
  0xbc   : > { %v763_v55 = vadd.f32 %v746_v22, %v481_v21  ;;  %1718 = vmatmul.bf16.gmra.mxu2 %v2888_v17 }
  0xbd   : > { %1980 = vmatmul.bf16.gmra.mxu3 %v1904_v18  ;;  %v3811_v18 = vld [vmem:[%s3881_s2] ss:$0 sm:$0xff] }
  0xbe   : > { %2178 = vmatmul.bf16.gmra.mxu0 %v2102_v19 }
  0xbf   : > { %v491_v23 = vpop.f32.mrf.mxu2 }
  0xc0   : > { %3076 = vmatmul.msk.bf16.gmra.mxu1 %vm2249_vm7, %v3168_v20  ;;  %v756_v24 = vpop.f32.mrf.mxu3 }
  0xc1   : > { %v3766_v25 = vadd.f32 %v756_v24, %v491_v23  ;;  %v483_v26 = vpop.f32.mrf.mxu0  ;;  %v3817_v24 = vld [vmem:[%s3884_s5] ss:$0 sm:$0xff] }
  0xc3   : > { %v748_v27 = vpop.f32.mrf.mxu1 }
  0xc4   : > { %v3768_v28 = vadd.f32 %v748_v27, %v483_v26 }
  0xc7   : > { %v493_v29 = vpop.f32.mrf.mxu2 }
  0xc8   : > { %v758_v30 = vpop.f32.mrf.mxu3 }
  0xc9   : > { %v3770_v31 = vadd.f32 %v758_v30, %v493_v29 }
  0xcb   : > { %v1355_v32 = vpop.f32.mrf.mxu0 }
  0xcd   : > { %v1553_v33 = vpop.f32.mrf.mxu1 }
  0xcf   : > { %v942_v34 = vpop.f32.mrf.mxu2 }
  0xd0   : > { %v1093_v35 = vpop.f32.mrf.mxu3  ;;  %v962_v63 = vadd.f32 %v942_v34, %v3742_v50 }
  0xd2   : > { %v1113_v3 = vadd.f32 %v1093_v35, %v962_v63 }
  0xd3   : > { %v1357_v36 = vpop.f32.mrf.mxu0 }
  0xd4   : > { %v1375_v6 = vadd.f32 %v1355_v32, %v1113_v3 }
  0xd5   : > { %v1555_v37 = vpop.f32.mrf.mxu1 }
  0xd6   : > { %v1573_v11 = vadd.f32 %v1553_v33, %v1375_v6 }
  0xd7   : > { %v944_v38 = vpop.f32.mrf.mxu2 }
  0xd8   : > { %v1095_v39 = vpop.f32.mrf.mxu3  ;;  %v963_v7 = vadd.f32 %v944_v38, %v3758_v8 }
  0xda   : > { %v1114_v12 = vadd.f32 %v1095_v39, %v963_v7 }
  0xdb   : > { %v1360_v40 = vpop.f32.mrf.mxu0 }
  0xdc   : > { %v1376_v15 = vadd.f32 %v1357_v36, %v1114_v12 }
  0xdd   : > { %v1558_v41 = vpop.f32.mrf.mxu1 }
  0xde   : > { %v1574_v8 = vadd.f32 %v1555_v37, %v1376_v15 }
  0xdf   : > { %v947_v42 = vpop.f32.mrf.mxu2 }
  0xe0   : > { %v1098_v43 = vpop.f32.mrf.mxu3  ;;  %v964_v45 = vadd.f32 %v947_v42, %v763_v55 }
  0xe2   : > { %v1115_v22 = vadd.f32 %v1098_v43, %v964_v45 }
  0xe3   : > { %v3772_v44 = vpop.f32.mrf.mxu0 }
  0xe4   : > { %v1377_v30 = vadd.f32 %v1360_v40, %v1115_v22 }
  0xe5   : > { %v3774_v46 = vpop.f32.mrf.mxu1 }
  0xe6   : > { %v1575_v39 = vadd.f32 %v1558_v41, %v1377_v30 }
  0xe7   : > { %v949_v47 = vpop.f32.mrf.mxu2 }
  0xe8   : > { %v1100_v48 = vpop.f32.mrf.mxu3  ;;  %v965_v32 = vadd.f32 %v949_v47, %v3768_v28 }
  0xea   : > { %v1116_v42 = vadd.f32 %v1100_v48, %v965_v32 }
  0xeb   : > { %v3776_v49 = vpop.f32.mrf.mxu0 }
  0xec   : > { %v1378_v3 = vadd.f32 %v3772_v44, %v1116_v42 }
  0xed   : > { %v3778_v51 = vpop.f32.mrf.mxu1 }
  0xee   : > { %v1576_v41 = vadd.f32 %v3774_v46, %v1378_v3 }
  0xef   : > { %v952_v52 = vpop.f32.mrf.mxu2 }
  0xf0   : > { %v3780_v53 = vpop.f32.mrf.mxu3  ;;  %v966_v6 = vadd.f32 %v952_v52, %v3748_v1 }
  0xf2   : > { %v1117_v48 = vadd.f32 %v3780_v53, %v966_v6 }
  0xf3   : > { %v3782_v54 = vpop.f32.mrf.mxu0 }
  0xf4   : > { %v1379_v1 = vadd.f32 %v3776_v49, %v1117_v48 }
  0xf5   : > { %v3784_v56 = vpop.f32.mrf.mxu1 }
  0xf7   : > { %v3786_v57 = vpop.f32.mrf.mxu2 }
  0xf8   : > { %v3788_v58 = vpop.f32.mrf.mxu3  ;;  %v967_v52 = vadd.f32 %v3786_v57, %v3762_v16 }
  0xfb   : > { %v3790_v59 = vpop.f32.mrf.mxu0 }
  0xfd   : > { %v3792_v60 = vpop.f32.mrf.mxu1 }
  0xff   : > { %v3794_v61 = vpop.f32.mrf.mxu2 }
 0x100   : > { %v3796_v62 = vpop.f32.mrf.mxu3  ;;  %v968_v57 = vadd.f32 %v3794_v61, %v3766_v25 }
 0x103   : > { %v3799_v0 = vpop.f32.mrf.mxu0 }
 0x105   : > { %v3801_v2 = vpop.f32.mrf.mxu1 }
 0x107   : > { %v3803_v4 = vpop.f32.mrf.mxu2 }
 0x108   : > { %v3805_v5 = vpop.f32.mrf.mxu3  ;;  %v969_v61 = vadd.f32 %v3803_v4, %v3770_v31 }
 0x10b   : > { %v2164_v9 = vpop.f32.mrf.mxu0 }
 0x10d   : > { %v2275_v10 = vpop.f32.mrf.mxu1 }
 0x10f   : > { %v1704_v13 = vpop.f32.mrf.mxu2 }
 0x110   : > { %v1966_v14 = vpop.f32.mrf.mxu3  ;;  %v1724_v50 = vadd.f32 %v1704_v13, %v1573_v11 }
 0x112   : > { %v1986_v17 = vadd.f32 %v1966_v14, %v1724_v50 }
 0x113   : > { %v2166_v19 = vpop.f32.mrf.mxu0 }
 0x114   : > { %v2184_v21 = vadd.f32 %v2164_v9, %v1986_v17 }
 0x115   : > { %v2277_v20 = vpop.f32.mrf.mxu1 }
 0x116   : > { %v2212_v23 = vadd.f32 %v3811_v18, %v2184_v21  ;;  %v1577_v21 = vadd.f32 %v3778_v51, %v1379_v1 }
 0x117   : > { %v1706_v26 = vpop.f32.mrf.mxu2 }
 0x118   : > { %v1968_v55 = vpop.f32.mrf.mxu3  ;;  %v2295_v27 = vadd.f32 %v2275_v10, %v2212_v23  ;;  %v1725_v29 = vadd.f32 %v1706_v26, %v1574_v8  ;;  %v1118_v8 = vadd.f32 %v3788_v58, %v967_v52 }
 0x11a   : > { %v2307_v33 = vadd.f32 %v3817_v24, %v2295_v27  ;;  %v1987_v34 = vadd.f32 %v1968_v55, %v1725_v29  ;;  %v1380_v16 = vadd.f32 %v3782_v54, %v1118_v8 }
 0x11b   : > { %v2169_v35 = vpop.f32.mrf.mxu0 }
 0x11c   : > { %v2315_v36 = vmax.f32 %v2307_v33, 0.0  ;;  %v2185_v37 = vadd.f32 %v2166_v19, %v1987_v34  ;;  %v1578_v58 = vadd.f32 %v3784_v56, %v1380_v16  ;;  %v1119_v33 = vadd.f32 %v3796_v62, %v968_v57 }
 0x11d   : > { %v2280_v38 = vpop.f32.mrf.mxu1 }
 0x11e   : > { %2323 = vst [vmem:[%s3825_s8] sm:$0xff] %v2315_v36  ;;  %v2213_v40 = vadd.f32 %v3811_v18, %v2185_v37  ;;  %v1381_v25 = vadd.f32 %v3790_v59, %v1119_v33 }
 0x11f   : > { %v1709_v28 = vpop.f32.mrf.mxu2 }
 0x120   : > { %v1971_v43 = vpop.f32.mrf.mxu3  ;;  %v2296_v47 = vadd.f32 %v2277_v20, %v2213_v40  ;;  %v1726_v63 = vadd.f32 %v1709_v28, %v1575_v39  ;;  %v1579_v28 = vadd.f32 %v3792_v60, %v1381_v25 }
 0x122   : > { %v2308_v7 = vadd.f32 %v3817_v24, %v2296_v47  ;;  %v1988_v9 = vadd.f32 %v1971_v43, %v1726_v63  ;;  %v1120_v43 = vadd.f32 %v3805_v5, %v969_v61 }
 0x123   : > { %v2171_v10 = vpop.f32.mrf.mxu0 }
 0x124   : > { %v2316_v11 = vmax.f32 %v2308_v7, 0.0  ;;  %v2186_v12 = vadd.f32 %v2169_v35, %v1988_v9  ;;  %v1382_v31 = vadd.f32 %v3799_v0, %v1120_v43 }
 0x125   : > { %v2282_v14 = vpop.f32.mrf.mxu1 }
 0x126   : > { %2324 = vst [vmem:[%s3825_s8 + $0x8] sm:$0xff] %v2316_v11  ;;  %v2214_v13 = vadd.f32 %v3811_v18, %v2186_v12  ;;  %v1580_v12 = vadd.f32 %v3801_v2, %v1382_v31 }
 0x127   : > { %v1711_v50 = vpop.f32.mrf.mxu2 }
 0x128   : > { %v1973_v15 = vpop.f32.mrf.mxu3  ;;  %v2297_v44 = vadd.f32 %v2280_v38, %v2214_v13  ;;  %v1727_v45 = vadd.f32 %v1711_v50, %v1576_v41 }
 0x12a   : > { %v2309_v17 = vadd.f32 %v3817_v24, %v2297_v44  ;;  %v1989_v19 = vadd.f32 %v1973_v15, %v1727_v45 }
 0x12b   : > { %v2174_v53 = vpop.f32.mrf.mxu0 }
 0x12c   : > { %v2317_v46 = vmax.f32 %v2309_v17, 0.0  ;;  %v2187_v20 = vadd.f32 %v2171_v10, %v1989_v19 }
 0x12d   : > { %v2285_v27 = vpop.f32.mrf.mxu1 }
 0x12e   : > { %2325 = vst [vmem:[%s3825_s8 + $0x10] sm:$0xff] %v2317_v46  ;;  %v2215_v22 = vadd.f32 %v3811_v18, %v2187_v20 }
 0x12f   : > { %v1714_v23 = vpop.f32.mrf.mxu2 }
 0x130   : > { %v1976_v26 = vpop.f32.mrf.mxu3  ;;  %v2298_v49 = vadd.f32 %v2282_v14, %v2215_v22  ;;  %v1728_v55 = vadd.f32 %v1714_v23, %v1577_v21 }
 0x132   : > { %v2310_v29 = vadd.f32 %v3817_v24, %v2298_v49  ;;  %v1990_v30 = vadd.f32 %v1976_v26, %v1728_v55 }
 0x133   : > { %v2176_v35 = vpop.f32.mrf.mxu0 }
 0x134   : > { %v2318_v51 = vmax.f32 %v2310_v29, 0.0  ;;  %v2188_v32 = vadd.f32 %v2174_v53, %v1990_v30 }
 0x135   : > { %v2287_v56 = vpop.f32.mrf.mxu1 }
 0x136   : > { %2326 = vst [vmem:[%s3825_s8 + $0x18] sm:$0xff] %v2318_v51  ;;  %v2216_v34 = vadd.f32 %v3811_v18, %v2188_v32 }
 0x137   : > { %v1716_v36 = vpop.f32.mrf.mxu2 }
 0x138   : > { %v1978_v37 = vpop.f32.mrf.mxu3  ;;  %v2299_v54 = vadd.f32 %v2285_v27, %v2216_v34  ;;  %v1729_v38 = vadd.f32 %v1716_v36, %v1578_v58 }
 0x13a   : > { %v2311_v39 = vadd.f32 %v3817_v24, %v2299_v54  ;;  %v1991_v42 = vadd.f32 %v1978_v37, %v1729_v38 }
 0x13b   : > { %v2179_v7 = vpop.f32.mrf.mxu0 }
 0x13c   : > { %v2319_v40 = vmax.f32 %v2311_v39, 0.0  ;;  %v2189_v62 = vadd.f32 %v2176_v35, %v1991_v42 }
 0x13d   : > { %v2290_v60 = vpop.f32.mrf.mxu1 }
 0x13e   : > { %2327 = vst [vmem:[%s3825_s8 + $0x20] sm:$0xff] %v2319_v40  ;;  %v2217_v47 = vadd.f32 %v3811_v18, %v2189_v62 }
 0x13f   : > { %v1719_v63 = vpop.f32.mrf.mxu2 }
 0x140   : > { %v1981_v3 = vpop.f32.mrf.mxu3  ;;  %v2300_v59 = vadd.f32 %v2287_v56, %v2217_v47  ;;  %v1730_v6 = vadd.f32 %v1719_v63, %v1579_v28 }
 0x142   : > { %v2312_v4 = vadd.f32 %v3817_v24, %v2300_v59  ;;  %v1992_v9 = vadd.f32 %v1981_v3, %v1730_v6 }
 0x143   : > { %v2181_v15 = vpop.f32.mrf.mxu0 }
 0x144   : > { %v2320_v10 = vmax.f32 %v2312_v4, 0.0  ;;  %v2190_v11 = vadd.f32 %v2179_v7, %v1992_v9 }
 0x145   : > { %v2292_v52 = vpop.f32.mrf.mxu1 }
 0x146   : > { %2328 = vst [vmem:[%s3825_s8 + $0x28] sm:$0xff] %v2320_v10  ;;  %v2218_v5 = vadd.f32 %v3811_v18, %v2190_v11 }
 0x147   : > { %v1721_v41 = vpop.f32.mrf.mxu2 }
 0x148   : > { %v2301_v48 = vadd.f32 %v2290_v60, %v2218_v5  ;;  %v1731_v13 = vadd.f32 %v1721_v41, %v1580_v12  ;;  %v1983_v14 = vpop.f32.mrf.mxu3 }
 0x14a   : > { %v2313_v50 = vadd.f32 %v3817_v24, %v2301_v48  ;;  %v1993_v0 = vadd.f32 %v1983_v14, %v1731_v13 }
 0x14c   : > { %v2321_v44 = vmax.f32 %v2313_v50, 0.0  ;;  %v2191_v45 = vadd.f32 %v2181_v15, %v1993_v0 }
 0x14e   : > { %2329 = vst [vmem:[%s3825_s8 + $0x30] sm:$0xff] %v2321_v44  ;;  %v2219_v1 = vadd.f32 %v3811_v18, %v2191_v45 }
 0x150   : > { %v2302_v17 = vadd.f32 %v2292_v52, %v2219_v1 }
 0x152   : > { %v2314_v2 = vadd.f32 %v3817_v24, %v2302_v17 }
 0x154   : > { %v2322_v19 = vmax.f32 %v2314_v2, 0.0 }
 0x156   : > { %2330 = vst [vmem:[%s3825_s8 + $0x38] sm:$0xff] %v2322_v19 }
 0x157 PF: > { %s16_s23 = sadd.s32 1, %s3234_s23   ;;  %s3890_s21 = smov %s3230_s22 }
 0x158   : > { %p13_p5 = scmp.ge.s32.totalorder %s16_s23, 4   ;;  %s3891_s22 = smov %s3893_s24 }
 0x15a   :  { %15 = sbr.rel (!%p13_p5) target bundleno = 2 (0x2), region = 99 }

</bundles_post_ra>
